<compile_context>
chip_gen: v6e
topology: v6e:2x2x1
jax: 0.10.0
libtpu: 0.0.40
codegen_flags: <defaults>
</compile_context>

<pallas_src>
import jax
import jax.numpy as jnp
from jax.experimental import pallas as pl
from jax.experimental.pallas import tpu as pltpu

LRELU_SLOPE = 0.1
BN_EPS = 1e-5


def _leaky_relu(x):
    return jnp.where(x > 0, x, LRELU_SLOPE * x)


# ---------------------------------------------------------------------------
# Pallas kernels
# ---------------------------------------------------------------------------

def conv_bn_lrelu_kernel(a_ref, w_ref, g_ref, b_ref, o_ref):
    # layer2: single-block conv-as-matmul (bf16 operands, f32 accumulation)
    # -> training-mode BN over rows (= per channel over N*H*W) -> affine
    # -> LeakyReLU.  No accumulator scratch needed (single grid step).
    y = jnp.dot(a_ref[...], w_ref[...], preferred_element_type=jnp.float32)
    mean = jnp.mean(y, axis=0, keepdims=True)
    var = jnp.mean(jnp.square(y - mean), axis=0, keepdims=True)  # biased
    z = (y - mean) * jax.lax.rsqrt(var + BN_EPS) * g_ref[...] + b_ref[...]
    o_ref[...] = _leaky_relu(z).astype(o_ref.dtype)


def fc_bn_lrelu_kernel(a_ref, w_ref, g_ref, b_ref, o_ref):
    # layer3: K-tiled matmul streaming the big FC weight.  The f32 output
    # block index is constant across the K grid axis, so it stays resident in
    # VMEM and doubles as the accumulator (no scratch).  Final K step applies
    # training-mode BN over rows + affine + LeakyReLU in place.
    k = pl.program_id(0)

    @pl.when(k == 0)
    def _():
        o_ref[...] = jnp.zeros_like(o_ref)

    o_ref[...] += jnp.dot(a_ref[...], w_ref[...],
                          preferred_element_type=jnp.float32)

    @pl.when(k == pl.num_programs(0) - 1)
    def _():
        y = o_ref[...]
        mean = jnp.mean(y, axis=0, keepdims=True)
        var = jnp.mean(jnp.square(y - mean), axis=0, keepdims=True)  # biased
        z = (y - mean) * jax.lax.rsqrt(var + BN_EPS) * g_ref[...] + b_ref[...]
        o_ref[...] = _leaky_relu(z)


# ---------------------------------------------------------------------------
# pallas_call wrappers
# ---------------------------------------------------------------------------

def conv_bn_lrelu(a, w, gamma, beta, out_dtype=jnp.bfloat16):
    M, K = a.shape
    K2, N = w.shape
    assert K == K2
    g2 = gamma.reshape(1, N).astype(jnp.float32)
    b2 = beta.reshape(1, N).astype(jnp.float32)
    return pl.pallas_call(
        conv_bn_lrelu_kernel,
        out_shape=jax.ShapeDtypeStruct((M, N), out_dtype),
        grid=(1,),
        in_specs=[pl.BlockSpec((M, K), lambda i: (0, 0)),
                  pl.BlockSpec((K, N), lambda i: (0, 0)),
                  pl.BlockSpec((1, N), lambda i: (0, 0)),
                  pl.BlockSpec((1, N), lambda i: (0, 0))],
        out_specs=pl.BlockSpec((M, N), lambda i: (0, 0)),
        compiler_params=pltpu.CompilerParams(
            dimension_semantics=("arbitrary",)),
    )(a, w, g2, b2)


def fc_bn_lrelu(a, w, gamma, beta, *, k_tiles=7, out_dtype=jnp.float32):
    M, K = a.shape
    K2, N = w.shape
    assert K == K2
    assert K % k_tiles == 0
    tk = K // k_tiles
    # Lane-aligned (or full-extent) tiles for the (8, 128) constraint.
    assert tk == K or tk % 128 == 0
    g = gamma.reshape(1, N).astype(jnp.float32)
    b = beta.reshape(1, N).astype(jnp.float32)
    return pl.pallas_call(
        fc_bn_lrelu_kernel,
        out_shape=jax.ShapeDtypeStruct((M, N), out_dtype),
        grid=(k_tiles,),
        in_specs=[pl.BlockSpec((M, tk), lambda k: (0, k)),
                  pl.BlockSpec((tk, N), lambda k: (k, 0)),
                  pl.BlockSpec((1, N), lambda k: (0, 0)),
                  pl.BlockSpec((1, N), lambda k: (0, 0))],
        out_specs=pl.BlockSpec((M, N), lambda k: (0, 0)),
        compiler_params=pltpu.CompilerParams(
            dimension_semantics=("arbitrary",)),
    )(a, w, g, b)


# ---------------------------------------------------------------------------
# Glue: NHWC im2col, parameters, full forward
# ---------------------------------------------------------------------------

def im2col_nhwc(x, k, stride, pad):
    """x: (N, H, W, C) -> patches (N*Ho*Wo, k*k*C), cols ordered (kh, kw, c)."""
    N, H, W, C = x.shape
    xp = jnp.pad(x, ((0, 0), (pad, pad), (pad, pad), (0, 0)))
    Ho = (H + 2 * pad - k) // stride + 1
    Wo = (W + 2 * pad - k) // stride + 1
    cols = []
    for i in range(k):
        for j in range(k):
            cols.append(xp[:, i:i + stride * Ho:stride,
                           j:j + stride * Wo:stride, :])
    patches = jnp.stack(cols, axis=3)              # (N, Ho, Wo, k*k, C)
    return patches.reshape(N * Ho * Wo, k * k * C), Ho, Wo


def init_params(key):
    """PyTorch-layout parameters (as the nn.Module would hold them)."""
    ks = jax.random.split(key, 8)
    return {
        # Conv2d(1, 64, 4, stride=2, padding=1, bias=False)
        "w1": 0.05 * jax.random.normal(ks[0], (64, 1, 4, 4), jnp.float32),
        # Conv2d(64, 128, 4, stride=2, padding=1, bias=False)
        "w2": 0.05 * jax.random.normal(ks[1], (128, 64, 4, 4), jnp.float32),
        # BatchNorm2d(128)
        "g2": 1.0 + 0.1 * jax.random.normal(ks[2], (128,), jnp.float32),
        "beta2": 0.1 * jax.random.normal(ks[3], (128,), jnp.float32),
        # Linear(128*7*7, 1024)
        "w3": 0.02 * jax.random.normal(ks[4], (1024, 128 * 7 * 7), jnp.float32),
        "bias3": 0.1 * jax.random.normal(ks[5], (1024,), jnp.float32),
        # BatchNorm1d(1024)
        "g3": 1.0 + 0.1 * jax.random.normal(ks[6], (1024,), jnp.float32),
        "beta3": 0.1 * jax.random.normal(ks[7], (1024,), jnp.float32),
    }


def prepare_kernel_params(p):
    """One-time weight layout work, hoisted out of the forward pass."""
    bf = jnp.bfloat16
    # layer1: OIHW -> (kh*kw*Cin, O), consumed by a plain XLA dot.
    w1m = p["w1"].transpose(2, 3, 1, 0).reshape(16, 64)
    # layer2: OIHW -> (kh*kw*Cin, O), matching the NHWC im2col column order.
    w2m = p["w2"].transpose(2, 3, 1, 0).reshape(4 * 4 * 64, 128)
    # layer3: Linear weight (O, C*H*W) -> (H*W*C, O), matching NHWC flatten.
    w3m = p["w3"].reshape(1024, 128, 7, 7).transpose(2, 3, 1, 0)
    w3m = w3m.reshape(7 * 7 * 128, 1024)
    return {
        "w1": w1m.astype(bf),
        "w2": w2m.astype(bf),
        "w3": w3m.astype(bf),
        "g2": p["g2"], "beta2": p["beta2"],
        "g3": p["g3"], "beta3": p["beta3"],
        # bias3 intentionally dropped: a per-feature constant added before
        # training-mode BatchNorm is exactly cancelled by the mean subtraction.
    }


@jax.jit
def shared_network_forward(x, kp):
    """x: (N, 1, 28, 28) NCHW (PyTorch layout). Returns (N, 1024) float32."""
    N = x.shape[0]
    x = jnp.transpose(x, (0, 2, 3, 1)).astype(jnp.bfloat16)   # NHWC, bf16

    # layer1: Conv2d(1->64, k4, s2, p1, no bias) + LeakyReLU(0.1).
    # Tiny matmul -> plain XLA dot (fuses with im2col), no pallas_call launch.
    p1, H1, W1 = im2col_nhwc(x, 4, 2, 1)                      # (N*14*14, 16)
    y1 = jnp.dot(p1, kp["w1"], preferred_element_type=jnp.float32)
    y1 = _leaky_relu(y1).astype(jnp.bfloat16)
    y1 = y1.reshape(N, H1, W1, 64)                            # NHWC

    # layer2: Conv2d(64->128, k4, s2, p1, no bias) + BatchNorm2d + LeakyReLU
    p2, H2, W2 = im2col_nhwc(y1, 4, 2, 1)                     # (N*7*7, 1024)
    y2 = conv_bn_lrelu(p2, kp["w2"], kp["g2"], kp["beta2"],
                       out_dtype=jnp.bfloat16)                # (N*49, 128)
    flat = y2.reshape(N, 7 * 7 * 128)                         # zero-copy flatten

    # layer3: Linear(6272->1024) + BatchNorm1d + LeakyReLU (bias cancelled by
    # BN).  Single K-tiled grid (7 steps of tk=896), output-resident accum.
    return fc_bn_lrelu(flat, kp["w3"], kp["g3"], kp["beta3"],
                       k_tiles=7, out_dtype=jnp.float32)


# ---------------------------------------------------------------------------
# Pure-JAX reference (sanity check). Mirrors the same bf16 matmul-operand
# precision (f32 accumulation / BN) so the comparison is tight; keeps the
# Linear bias to demonstrate numerically that BN cancels it.
# ---------------------------------------------------------------------------

def reference_forward(x, p):
    bf = jnp.bfloat16
    dn = ("NCHW", "OIHW", "NCHW")
    y1 = jax.lax.conv_general_dilated(
        x.astype(bf), p["w1"].astype(bf), (2, 2), [(1, 1), (1, 1)],
        dimension_numbers=dn, preferred_element_type=jnp.float32)
    y1 = _leaky_relu(y1).astype(bf)
    y2 = jax.lax.conv_general_dilated(
        y1, p["w2"].astype(bf), (2, 2), [(1, 1), (1, 1)],
        dimension_numbers=dn, preferred_element_type=jnp.float32)
    m2 = y2.mean(axis=(0, 2, 3), keepdims=True)
    v2 = ((y2 - m2) ** 2).mean(axis=(0, 2, 3), keepdims=True)
    y2 = (y2 - m2) * jax.lax.rsqrt(v2 + BN_EPS) * p["g2"].reshape(1, -1, 1, 1) \
         + p["beta2"].reshape(1, -1, 1, 1)
    y2 = _leaky_relu(y2).astype(bf)
    flat = y2.reshape(x.shape[0], -1)                     # (C, H, W) flatten
    y3 = jnp.dot(flat, p["w3"].astype(bf).T,
                 preferred_element_type=jnp.float32) + p["bias3"]
    m3 = y3.mean(axis=0, keepdims=True)
    v3 = ((y3 - m3) ** 2).mean(axis=0, keepdims=True)
    y3 = (y3 - m3) * jax.lax.rsqrt(v3 + BN_EPS) * p["g3"] + p["beta3"]
    return _leaky_relu(y3)


if __name__ == "__main__":
    key = jax.random.PRNGKey(0)
    kx, kpk = jax.random.split(key)
    # Forward implies MNIST-like input: 1 channel, 28x28 (view(-1, 128*7*7)).
    x = jax.random.normal(kx, (4, 1, 28, 28), jnp.float32)
    params = init_params(kpk)
    kernel_params = prepare_kernel_params(params)

    out = jax.block_until_ready(shared_network_forward(x, kernel_params))
    assert out.shape == (4, 1024), out.shape

    ref = jax.block_until_ready(reference_forward(x, params))
    max_err = float(jnp.max(jnp.abs(out - ref)))
    assert jnp.allclose(out, ref, atol=1e-2, rtol=1e-2), max_err

    print("KERNEL_OK")
</pallas_src>

<mosaic_0001>
module attributes {stable_mosaic.version = 11 : i64} {
  func.func @fc_bn_lrelu_kernel(%arg0: i32, %arg1: memref<4x896xbf16, #tpu.memory_space<vmem>>, %arg2: memref<896x1024xbf16, #tpu.memory_space<vmem>>, %arg3: memref<1x1024xf32, #tpu.memory_space<vmem>>, %arg4: memref<1x1024xf32, #tpu.memory_space<vmem>>, %arg5: memref<4x1024xf32, #tpu.memory_space<vmem>>) attributes {dimension_semantics = [#tpu.dimension_semantics<arbitrary>], iteration_bounds = array<i64: 7>, scalar_prefetch = 0 : i64, scratch_operands = 0 : i64, tpu.core_type = #tpu.core_type<tc>, window_params = [{transform_indices = @transform_0, window_bounds = array<i64: 4, 896>}, {transform_indices = @transform_1, window_bounds = array<i64: 896, 1024>}, {pipeline_mode = #tpu.pipeline_mode<synchronous>, transform_indices = @transform_2, window_bounds = array<i64: 1, 1024>}, {pipeline_mode = #tpu.pipeline_mode<synchronous>, transform_indices = @transform_3, window_bounds = array<i64: 1, 1024>}, {pipeline_mode = #tpu.pipeline_mode<synchronous>, transform_indices = @transform_4, window_bounds = array<i64: 4, 1024>}]} {
    %c0_i32 = arith.constant 0 : i32
    %0 = arith.cmpi eq, %arg0, %c0_i32 : i32
    %1 = arith.extui %0 : i1 to i32
    %c0_i32_0 = arith.constant 0 : i32
    %2 = arith.cmpi ne, %1, %c0_i32_0 : i32
    scf.if %2 {
      %cst_9 = arith.constant 0.000000e+00 : f32
      %12 = vector.broadcast %cst_9 : f32 to vector<4x1024xf32>
      %c0_10 = arith.constant 0 : index
      %c0_11 = arith.constant 0 : index
      %13 = vector.load %arg5[%c0_10, %c0_11] : memref<4x1024xf32, #tpu.memory_space<vmem>>, vector<4x1024xf32>
      tpu.vector_store %arg5[%c0_10, %c0_11], %12 {strides = array<i32>} : memref<4x1024xf32, #tpu.memory_space<vmem>>, vector<4x1024xf32>,
    } else {
    }
    %c0 = arith.constant 0 : index
    %c0_1 = arith.constant 0 : index
    %3 = vector.load %arg5[%c0, %c0_1] : memref<4x1024xf32, #tpu.memory_space<vmem>>, vector<4x1024xf32>
    %c0_2 = arith.constant 0 : index
    %c0_3 = arith.constant 0 : index
    %4 = vector.load %arg1[%c0_2, %c0_3] : memref<4x896xbf16, #tpu.memory_space<vmem>>, vector<4x896xbf16>
    %c0_4 = arith.constant 0 : index
    %c0_5 = arith.constant 0 : index
    %5 = vector.load %arg2[%c0_4, %c0_5] : memref<896x1024xbf16, #tpu.memory_space<vmem>>, vector<896x1024xbf16>
    %cst = arith.constant dense<0.000000e+00> : vector<4x1024xf32>
    %6 = tpu.matmul %4, %5, %cst {dimension_numbers = #tpu.dot_dimension_numbers<[1], [0], [0], [1], [0, 0, 1, 1], [], []>} : vector<4x896xbf16>, vector<896x1024xbf16>, vector<4x1024xf32> -> vector<4x1024xf32>
    %7 = arith.addf %3, %6 : vector<4x1024xf32>
    %c0_6 = arith.constant 0 : index
    %c0_7 = arith.constant 0 : index
    %8 = vector.load %arg5[%c0_6, %c0_7] : memref<4x1024xf32, #tpu.memory_space<vmem>>, vector<4x1024xf32>
    tpu.vector_store %arg5[%c0_6, %c0_7], %7 {strides = array<i32>} : memref<4x1024xf32, #tpu.memory_space<vmem>>, vector<4x1024xf32>,
    %c6_i32 = arith.constant 6 : i32
    %9 = arith.cmpi eq, %arg0, %c6_i32 : i32
    %10 = arith.extui %9 : i1 to i32
    %c0_i32_8 = arith.constant 0 : i32
    %11 = arith.cmpi ne, %10, %c0_i32_8 : i32
    scf.if %11 {
      %c0_9 = arith.constant 0 : index
      %c0_10 = arith.constant 0 : index
      %12 = vector.load %arg5[%c0_9, %c0_10] : memref<4x1024xf32, #tpu.memory_space<vmem>>, vector<4x1024xf32>
      %cst_11 = arith.constant dense<0.000000e+00> : vector<1024xf32>
      %13 = vector.multi_reduction <add>, %12, %cst_11 [0] : vector<4x1024xf32> to vector<1024xf32>
      %14 = vector.shape_cast %13 : vector<1024xf32> to vector<1x1024xf32>
      %cst_12 = arith.constant 4.000000e+00 : f32
      %15 = vector.broadcast %cst_12 : f32 to vector<1x1024xf32>
      %16 = arith.divf %14, %15 : vector<1x1024xf32>
      %17 = vector.broadcast %16 : vector<1x1024xf32> to vector<4x1024xf32>
      %18 = arith.subf %12, %17 : vector<4x1024xf32>
      %19 = arith.mulf %18, %18 : vector<4x1024xf32>
      %cst_13 = arith.constant dense<0.000000e+00> : vector<1024xf32>
      %20 = vector.multi_reduction <add>, %19, %cst_13 [0] : vector<4x1024xf32> to vector<1024xf32>
      %21 = vector.shape_cast %20 : vector<1024xf32> to vector<1x1024xf32>
      %cst_14 = arith.constant 4.000000e+00 : f32
      %22 = vector.broadcast %cst_14 : f32 to vector<1x1024xf32>
      %23 = arith.divf %21, %22 : vector<1x1024xf32>
      %24 = vector.broadcast %16 : vector<1x1024xf32> to vector<4x1024xf32>
      %25 = arith.subf %12, %24 : vector<4x1024xf32>
      %cst_15 = arith.constant 9.99999974E-6 : f32
      %26 = vector.broadcast %cst_15 : f32 to vector<1x1024xf32>
      %27 = arith.addf %23, %26 : vector<1x1024xf32>
      %28 = math.rsqrt %27 : vector<1x1024xf32>
      %29 = vector.broadcast %28 : vector<1x1024xf32> to vector<4x1024xf32>
      %30 = arith.mulf %25, %29 : vector<4x1024xf32>
      %c0_16 = arith.constant 0 : index
      %c0_17 = arith.constant 0 : index
      %31 = vector.load %arg3[%c0_16, %c0_17] : memref<1x1024xf32, #tpu.memory_space<vmem>>, vector<1x1024xf32>
      %32 = vector.broadcast %31 : vector<1x1024xf32> to vector<4x1024xf32>
      %33 = arith.mulf %30, %32 : vector<4x1024xf32>
      %c0_18 = arith.constant 0 : index
      %c0_19 = arith.constant 0 : index
      %34 = vector.load %arg4[%c0_18, %c0_19] : memref<1x1024xf32, #tpu.memory_space<vmem>>, vector<1x1024xf32>
      %35 = vector.broadcast %34 : vector<1x1024xf32> to vector<4x1024xf32>
      %36 = arith.addf %33, %35 : vector<4x1024xf32>
      %cst_20 = arith.constant 0.000000e+00 : f32
      %37 = vector.broadcast %cst_20 : f32 to vector<4x1024xf32>
      %38 = arith.cmpf ogt, %36, %37 : vector<4x1024xf32>
      %cst_21 = arith.constant 1.000000e-01 : f32
      %39 = vector.broadcast %cst_21 : f32 to vector<4x1024xf32>
      %40 = arith.mulf %39, %36 : vector<4x1024xf32>
      %41 = arith.select %38, %36, %40 : vector<4x1024xi1>, vector<4x1024xf32>
      %c0_22 = arith.constant 0 : index
      %c0_23 = arith.constant 0 : index
      %42 = vector.load %arg5[%c0_22, %c0_23] : memref<4x1024xf32, #tpu.memory_space<vmem>>, vector<4x1024xf32>
      tpu.vector_store %arg5[%c0_22, %c0_23], %41 {strides = array<i32>} : memref<4x1024xf32, #tpu.memory_space<vmem>>, vector<4x1024xf32>,
    } else {
    }
    return
  }
  func.func @transform_0(%arg0: i32) -> (i32, i32) {
    %c0_i32 = arith.constant 0 : i32
    %c0_i32_0 = arith.constant 0 : i32
    return %c0_i32, %arg0 : i32, i32
  }
  func.func @transform_1(%arg0: i32) -> (i32, i32) {
    %c0_i32 = arith.constant 0 : i32
    %c0_i32_0 = arith.constant 0 : i32
    return %arg0, %c0_i32 : i32, i32
  }
  func.func @transform_2(%arg0: i32) -> (i32, i32) {
    %c0_i32 = arith.constant 0 : i32
    %c0_i32_0 = arith.constant 0 : i32
    %c0_i32_1 = arith.constant 0 : i32
    return %c0_i32, %c0_i32_0 : i32, i32
  }
  func.func @transform_3(%arg0: i32) -> (i32, i32) {
    %c0_i32 = arith.constant 0 : i32
    %c0_i32_0 = arith.constant 0 : i32
    %c0_i32_1 = arith.constant 0 : i32
    return %c0_i32, %c0_i32_0 : i32, i32
  }
  func.func @transform_4(%arg0: i32) -> (i32, i32) {
    %c0_i32 = arith.constant 0 : i32
    %c0_i32_0 = arith.constant 0 : i32
    %c0_i32_1 = arith.constant 0 : i32
    return %c0_i32, %c0_i32_0 : i32, i32
  }
}

module attributes {stable_mosaic.version = 11 : i64} {
  func.func @conv_bn_lrelu_kernel(%arg0: i32, %arg1: memref<196x1024xbf16, #tpu.memory_space<vmem>>, %arg2: memref<1024x128xbf16, #tpu.memory_space<vmem>>, %arg3: memref<1x128xf32, #tpu.memory_space<vmem>>, %arg4: memref<1x128xf32, #tpu.memory_space<vmem>>, %arg5: memref<196x128xbf16, #tpu.memory_space<vmem>>) attributes {dimension_semantics = [#tpu.dimension_semantics<arbitrary>], iteration_bounds = array<i64: 1>, scalar_prefetch = 0 : i64, scratch_operands = 0 : i64, tpu.core_type = #tpu.core_type<tc>, window_params = [{pipeline_mode = #tpu.pipeline_mode<synchronous>, transform_indices = @transform_0, window_bounds = array<i64: 196, 1024>}, {pipeline_mode = #tpu.pipeline_mode<synchronous>, transform_indices = @transform_1, window_bounds = array<i64: 1024, 128>}, {pipeline_mode = #tpu.pipeline_mode<synchronous>, transform_indices = @transform_2, window_bounds = array<i64: 1, 128>}, {pipeline_mode = #tpu.pipeline_mode<synchronous>, transform_indices = @transform_3, window_bounds = array<i64: 1, 128>}, {pipeline_mode = #tpu.pipeline_mode<synchronous>, transform_indices = @transform_4, window_bounds = array<i64: 196, 128>}]} {
    %c0 = arith.constant 0 : index
    %c0_0 = arith.constant 0 : index
    %0 = vector.load %arg1[%c0, %c0_0] : memref<196x1024xbf16, #tpu.memory_space<vmem>>, vector<196x1024xbf16>
    %c0_1 = arith.constant 0 : index
    %c0_2 = arith.constant 0 : index
    %1 = vector.load %arg2[%c0_1, %c0_2] : memref<1024x128xbf16, #tpu.memory_space<vmem>>, vector<1024x128xbf16>
    %cst = arith.constant dense<0.000000e+00> : vector<196x128xf32>
    %2 = tpu.matmul %0, %1, %cst {dimension_numbers = #tpu.dot_dimension_numbers<[1], [0], [0], [1], [0, 0, 1, 1], [], []>} : vector<196x1024xbf16>, vector<1024x128xbf16>, vector<196x128xf32> -> vector<196x128xf32>
    %cst_3 = arith.constant dense<0.000000e+00> : vector<128xf32>
    %3 = vector.multi_reduction <add>, %2, %cst_3 [0] : vector<196x128xf32> to vector<128xf32>
    %4 = vector.shape_cast %3 : vector<128xf32> to vector<1x128xf32>
    %cst_4 = arith.constant 1.960000e+02 : f32
    %5 = vector.broadcast %cst_4 : f32 to vector<1x128xf32>
    %6 = arith.divf %4, %5 : vector<1x128xf32>
    %7 = vector.broadcast %6 : vector<1x128xf32> to vector<196x128xf32>
    %8 = arith.subf %2, %7 : vector<196x128xf32>
    %9 = arith.mulf %8, %8 : vector<196x128xf32>
    %cst_5 = arith.constant dense<0.000000e+00> : vector<128xf32>
    %10 = vector.multi_reduction <add>, %9, %cst_5 [0] : vector<196x128xf32> to vector<128xf32>
    %11 = vector.shape_cast %10 : vector<128xf32> to vector<1x128xf32>
    %cst_6 = arith.constant 1.960000e+02 : f32
    %12 = vector.broadcast %cst_6 : f32 to vector<1x128xf32>
    %13 = arith.divf %11, %12 : vector<1x128xf32>
    %14 = vector.broadcast %6 : vector<1x128xf32> to vector<196x128xf32>
    %15 = arith.subf %2, %14 : vector<196x128xf32>
    %cst_7 = arith.constant 9.99999974E-6 : f32
    %16 = vector.broadcast %cst_7 : f32 to vector<1x128xf32>
    %17 = arith.addf %13, %16 : vector<1x128xf32>
    %18 = math.rsqrt %17 : vector<1x128xf32>
    %19 = vector.broadcast %18 : vector<1x128xf32> to vector<196x128xf32>
    %20 = arith.mulf %15, %19 : vector<196x128xf32>
    %c0_8 = arith.constant 0 : index
    %c0_9 = arith.constant 0 : index
    %21 = vector.load %arg3[%c0_8, %c0_9] : memref<1x128xf32, #tpu.memory_space<vmem>>, vector<1x128xf32>
    %22 = vector.broadcast %21 : vector<1x128xf32> to vector<196x128xf32>
    %23 = arith.mulf %20, %22 : vector<196x128xf32>
    %c0_10 = arith.constant 0 : index
    %c0_11 = arith.constant 0 : index
    %24 = vector.load %arg4[%c0_10, %c0_11] : memref<1x128xf32, #tpu.memory_space<vmem>>, vector<1x128xf32>
    %25 = vector.broadcast %24 : vector<1x128xf32> to vector<196x128xf32>
    %26 = arith.addf %23, %25 : vector<196x128xf32>
    %cst_12 = arith.constant 0.000000e+00 : f32
    %27 = vector.broadcast %cst_12 : f32 to vector<196x128xf32>
    %28 = arith.cmpf ogt, %26, %27 : vector<196x128xf32>
    %cst_13 = arith.constant 1.000000e-01 : f32
    %29 = vector.broadcast %cst_13 : f32 to vector<196x128xf32>
    %30 = arith.mulf %29, %26 : vector<196x128xf32>
    %31 = arith.select %28, %26, %30 : vector<196x128xi1>, vector<196x128xf32>
    %32 = arith.truncf %31 : vector<196x128xf32> to vector<196x128xbf16>
    %c0_14 = arith.constant 0 : index
    %c0_15 = arith.constant 0 : index
    %33 = vector.load %arg5[%c0_14, %c0_15] : memref<196x128xbf16, #tpu.memory_space<vmem>>, vector<196x128xbf16>
    tpu.vector_store %arg5[%c0_14, %c0_15], %32 {strides = array<i32>} : memref<196x128xbf16, #tpu.memory_space<vmem>>, vector<196x128xbf16>,
    return
  }
  func.func @transform_0(%arg0: i32) -> (i32, i32) {
    %c0_i32 = arith.constant 0 : i32
    %c0_i32_0 = arith.constant 0 : i32
    %c0_i32_1 = arith.constant 0 : i32
    return %c0_i32, %c0_i32_0 : i32, i32
  }
  func.func @transform_1(%arg0: i32) -> (i32, i32) {
    %c0_i32 = arith.constant 0 : i32
    %c0_i32_0 = arith.constant 0 : i32
    %c0_i32_1 = arith.constant 0 : i32
    return %c0_i32, %c0_i32_0 : i32, i32
  }
  func.func @transform_2(%arg0: i32) -> (i32, i32) {
    %c0_i32 = arith.constant 0 : i32
    %c0_i32_0 = arith.constant 0 : i32
    %c0_i32_1 = arith.constant 0 : i32
    return %c0_i32, %c0_i32_0 : i32, i32
  }
  func.func @transform_3(%arg0: i32) -> (i32, i32) {
    %c0_i32 = arith.constant 0 : i32
    %c0_i32_0 = arith.constant 0 : i32
    %c0_i32_1 = arith.constant 0 : i32
    return %c0_i32, %c0_i32_0 : i32, i32
  }
  func.func @transform_4(%arg0: i32) -> (i32, i32) {
    %c0_i32 = arith.constant 0 : i32
    %c0_i32_0 = arith.constant 0 : i32
    %c0_i32_1 = arith.constant 0 : i32
    return %c0_i32, %c0_i32_0 : i32, i32
  }
}

</mosaic_0001>

<bundles_post_ra>
// kernel: shared_network_forward.2
= control target key start
LH: loop header
LB: loop body
LE: loop exit
PB: predicated region body
PF: predicated region fallthrough
CT: control target
= control target key end

     0   :  { %9 = vsyncpa [#allocation3], 0  ;;  %s3776_s0 = inlined_call_operand.vmem [shape: bf16[196,1024], index: 0, kind: input, shape index: {}]   ;;  %s3777_s1 = inlined_call_operand.hbm [shape: bf16[1024,128], index: 1, kind: input, shape index: {}]   ;;  %s3778_s2 = inlined_call_operand.hbm [shape: f32[1,128], index: 2, kind: input, shape index: {}]   ;;  %s3779_s3 = inlined_call_operand.hbm [shape: f32[1,128], index: 3, kind: input, shape index: {}]   ;;  %s3780_s4 = inlined_call_operand.vmem [shape: bf16[196,128], index: 4, kind: output, shape index: {}]  }
   0x1   :  { %10 = vsyncpa [#allocation5], 0  ;;  %s2943_s15 = smov [#allocation4]   ;;  %s2944_s17 = smov [#allocation2]  }
   0x2   :  { %s31_s16 = sshll.u32 %s2943_s15, 4  ;;  %s18_s18 = sshll.u32 %s2944_s17, 4  ;;  %s32_s16 = int_to_ptr.vmem [resolvable:$true] %s31_s16  ;;  %s19_s18 = int_to_ptr.vmem [resolvable:$true] %s18_s18 }
   0x3   :  { %s2887_s19 = scalar_lea.vmem %s32_s16, 16  ;;  %s2891_s20 = scalar_lea.vmem %s32_s16, 32 }
   0x4   :  { %p2888_p0 = scmp.ne.s32.totalorder %s32_s16, %s2887_s19  ;;  %p2892_p1 = scmp.lt.s32.totalorder %s32_s16, %s32_s16 }
   0x5   :  { %p2893_p2 = scmp.lt.s32.totalorder %s2891_s20, %s2887_s19 }
   0x7   :  { %p2894_p3 = por %p2893_p2, %p2892_p1 }
   0x9   :  { %p2895_p4 = pnand %p2894_p3, %p2888_p0 }
   0xb   :  { %2898 = shalt.err (!%p2895_p4)
}
   0xc   :  { %34 = dma.hbm_to_vmem [thread:$0]  %s3778_s2, 16, %s32_s16, [#allocation5]  }
   0xd   :  { %s2907_s23 = scalar_lea.vmem %s19_s18, 8192  ;;  %p2912_p6 = scmp.lt.s32.totalorder %s19_s18, %s19_s18 }
   0xe   :  { %p2908_p5 = scmp.ne.s32.totalorder %s19_s18, %s2907_s23  ;;  %p2913_p7 = scmp.lt.s32.totalorder %s2907_s23, %s2907_s23 }
  0x10   :  { %p2914_p8 = por %p2913_p7, %p2912_p6 }
  0x12   :  { %p2915_p9 = pnand %p2914_p8, %p2908_p5 }
  0x14   :  { %2918 = shalt.err (!%p2915_p9)
}
  0x15   :  { %s2945_s24 = smov 64   ;;  %s2946_s25 = smov 4  }
  0x16   :  { %24 = dma.hbm_to_vmem [thread:$0]  %s3777_s1, 8192, %s19_s18, [#allocation3], %s2945_s24, %s2945_s24, %s2946_s25  }
  0x17   :  { %s2947_s28 = smov [#allocation6]  }
  0x18   :  { %s41_s29 = sshll.u32 %s2947_s28, 4  ;;  %s42_s29 = int_to_ptr.vmem [resolvable:$true] %s41_s29 }
  0x19   :  { %s2927_s30 = scalar_lea.vmem %s42_s29, 16  ;;  %s2931_s5 = scalar_lea.vmem %s42_s29, 32 }
  0x1a   :  { %p2928_p10 = scmp.ne.s32.totalorder %s42_s29, %s2927_s30  ;;  %p2932_p11 = scmp.lt.s32.totalorder %s42_s29, %s42_s29 }
  0x1b   :  { %p2933_p12 = scmp.lt.s32.totalorder %s2931_s5, %s2927_s30 }
  0x1d   :  { %p2934_p13 = por %p2933_p12, %p2932_p11 }
  0x1f   :  { %p2935_p0 = pnand %p2934_p13, %p2928_p10 }
  0x21   :  { %2938 = shalt.err (!%p2935_p0)
}
  0x22   :  { %44 = dma.hbm_to_vmem [thread:$0]  %s3779_s3, 16, %s42_s29, [#allocation5]  }
  0x23   :  { %2939 = dma.done.wait [#allocation3], 8192  }
  0x24   :  { %2940 = vsyncadd [#allocation3], 4294959104 }
  0x25   :  { %2941 = dma.done.wait [#allocation5], 32  }
  0x26   :  { %2942 = vsyncadd [#allocation5], 4294967264  ;;  %v2805_v0 = vld [vmem:[#allocation2 + $0x78] sm:$0xff]   ;;  %v2809_v4 = vld [vmem:[#allocation2 + $0x70] sm:$0xff]   ;;  %vm1742_vm0 = vcmask 1043456  }
  0x27   :  { %v2806_v1 = vld [vmem:[#allocation2 + $0xf8] sm:$0xff]   ;;  %2424 = vmatprep.subr.bf16.mxu0 %v2805_v0  ;;  %v2810_v5 = vld [vmem:[#allocation2 + $0xf0] sm:$0xff]   ;;  %v2813_v8 = vld [vmem:[#allocation2 + $0x68] sm:$0xff]  }
  0x28   :  { %v2807_v2 = vld [vmem:[#allocation2 + $0x38] sm:$0xff]   ;;  %2518 = vmatprep.subr.bf16.mxu1 %v2806_v1  ;;  %v2811_v6 = vld [vmem:[#allocation2 + $0x30] sm:$0xff]   ;;  %v2814_v9 = vld [vmem:[#allocation2 + $0xe8] sm:$0xff]  }
  0x29   :  { %v2808_v3 = vld [vmem:[#allocation2 + $0xb8] sm:$0xff]   ;;  %2425 = vmatpush3.bf16.msra.mxu0 %v2807_v2  ;;  %v2812_v7 = vld [vmem:[#allocation2 + $0xb0] sm:$0xff]   ;;  %v2815_v10 = vld [vmem:[#allocation2 + $0x28] sm:$0xff]  }
  0x2a   :  { %2519 = vmatpush3.bf16.msra.mxu1 %v2808_v3  ;;  %2426 = vmatprep.subr.bf16.mxu0 %v2809_v4  ;;  %v2816_v11 = vld [vmem:[#allocation2 + $0xa8] sm:$0xff]   ;;  %v2817_v12 = vld [vmem:[#allocation2 + $0x60] sm:$0xff]   ;;  %v2821_v16 = vld [vmem:[#allocation2 + $0x58] sm:$0xff]  }
  0x2b   :  { %2520 = vmatprep.subr.bf16.mxu1 %v2810_v5  ;;  %v2818_v13 = vld [vmem:[#allocation2 + $0xe0] sm:$0xff]   ;;  %v2822_v17 = vld [vmem:[#allocation2 + $0xd8] sm:$0xff]   ;;  %v2825_v20 = vld [vmem:[#allocation2 + $0x50] sm:$0xff]  }
  0x2c   :  { %v2819_v14 = vld [vmem:[#allocation2 + $0x20] sm:$0xff]   ;;  %v2823_v18 = vld [vmem:[#allocation2 + $0x18] sm:$0xff]   ;;  %v2826_v21 = vld [vmem:[#allocation2 + $0xd0] sm:$0xff]  }
  0x2d   :  { %2427 = vmatpush3.bf16.msra.mxu0 %v2811_v6  ;;  %v2820_v15 = vld [vmem:[#allocation2 + $0xa0] sm:$0xff]   ;;  %v2824_v19 = vld [vmem:[#allocation2 + $0x98] sm:$0xff]   ;;  %v2827_v22 = vld [vmem:[#allocation2 + $0x10] sm:$0xff]  }
  0x2e   :  { %2521 = vmatpush3.bf16.msra.mxu1 %v2812_v7  ;;  %2428 = vmatprep.subr.bf16.mxu0 %v2813_v8  ;;  %v2828_v23 = vld [vmem:[#allocation2 + $0x90] sm:$0xff]   ;;  %v2829_v24 = vld [vmem:[#allocation2 + $0x48] sm:$0xff]   ;;  %v2833_v28 = vld [vmem:[#allocation2 + $0x40] sm:$0xff]  }
  0x2f   :  { %2522 = vmatprep.subr.bf16.mxu1 %v2814_v9  ;;  %v2830_v25 = vld [vmem:[#allocation2 + $0xc8] sm:$0xff]   ;;  %v2834_v29 = vld [vmem:[#allocation2 + $0xc0] sm:$0xff]   ;;  %v2837_v40 = vld [vmem:[#allocation2 + $0x178] sm:$0xff]  }
  0x30   :  { %v2831_v26 = vld [vmem:[#allocation2 + $0x8] sm:$0xff]   ;;  %v2835_v30 = vld [vmem:[#allocation2] sm:$0xff]   ;;  %v2838_v41 = vld [vmem:[#allocation2 + $0x138] sm:$0xff]  }
  0x31   :  { %2429 = vmatpush3.bf16.msra.mxu0 %v2815_v10  ;;  %v2832_v27 = vld [vmem:[#allocation2 + $0x88] sm:$0xff]   ;;  %v2836_v31 = vld [vmem:[#allocation2 + $0x80] sm:$0xff]   ;;  %v2839_v42 = vld [vmem:[#allocation2 + $0x1f8] sm:$0xff]  }
  0x32   :  { %2523 = vmatpush3.bf16.msra.mxu1 %v2816_v11  ;;  %2430 = vmatprep.subr.bf16.mxu0 %v2817_v12  ;;  %v55_v32 = vld [vmem:[%s3776_s0] sm:$0xff]  ;;  %v56_v34 = vld [vmem:[%s3776_s0 + $0x8] sm:$0xff]  ;;  %v2840_v43 = vld [vmem:[#allocation2 + $0x1b8] sm:$0xff]  }
  0x33   :  { %2524 = vmatprep.subr.bf16.mxu1 %v2818_v13  ;;  %v59_v33 = vld [vmem:[%s3776_s0 + $0x20] sm:$0xff]  ;;  %v60_v37 = vld [vmem:[%s3776_s0 + $0x28] sm:$0xff]  ;;  %v2841_v50 = vld [vmem:[#allocation2 + $0x170] sm:$0xff]  }
  0x34   :  { %v2133_v35 = vcombine.low %v55_v32, %v59_v33  ;;  %v2134_v36 = vcombine.high %v55_v32, %v59_v33  ;;  %v2135_v38 = vcombine.low %v56_v34, %v60_v37  ;;  %v2136_v39 = vcombine.high %v56_v34, %v60_v37  ;;  %v63_v44 = vld [vmem:[%s3776_s0 + $0x40] sm:$0xff]  ;;  %v64_v47 = vld [vmem:[%s3776_s0 + $0x48] sm:$0xff]  ;;  %v2842_v52 = vld [vmem:[#allocation2 + $0x130] sm:$0xff]  }
  0x35   :  { %2431 = vmatpush3.bf16.msra.mxu0 %v2819_v14  ;;  %v67_v45 = vld [vmem:[%s3776_s0 + $0x60] sm:$0xff]  ;;  %v68_v48 = vld [vmem:[%s3776_s0 + $0x68] sm:$0xff]  ;;  %v2843_v60 = vld [vmem:[#allocation2 + $0x1f0] sm:$0xff]  }
  0x36   :  { %2525 = vmatpush3.bf16.msra.mxu1 %v2820_v15  ;;  %2432 = vmatprep.subr.bf16.mxu0 %v2821_v16  ;;  %v2142_v46 = vcombine.high %v63_v44, %v67_v45  ;;  %v2144_v49 = vcombine.high %v64_v47, %v68_v48  ;;  %v2141_v51 = vcombine.low %v63_v44, %v67_v45  ;;  %v71_v53 = vld [vmem:[%s3776_s0 + $0x80] sm:$0xff]  ;;  %v72_v56 = vld [vmem:[%s3776_s0 + $0x88] sm:$0xff]  ;;  %v2844_v61 = vld [vmem:[#allocation2 + $0x1b0] sm:$0xff]  }
  0x37   :  { %2526 = vmatprep.subr.bf16.mxu1 %v2822_v17  ;;  %1207 = vmatprep.mubr.bf16.mxu0 %v2134_v36  ;;  %v2143_v54 = vcombine.low %v64_v47, %v68_v48  ;;  %v75_v55 = vld [vmem:[%s3776_s0 + $0xa0] sm:$0xff]  ;;  %v76_v57 = vld [vmem:[%s3776_s0 + $0xa8] sm:$0xff]  ;;  %v2858_v34 = vld [vmem:[#allocation2 + $0x110] sm:$0xff]  }
  0x38   :  { %1343 = vmatprep.mubr.bf16.mxu1 %v2136_v39  ;;  %v2150_v58 = vcombine.high %v71_v53, %v75_v55  ;;  %v2152_v59 = vcombine.high %v72_v56, %v76_v57  ;;  %v79_v62 = vld [vmem:[%s3776_s0 + $0xc0] sm:$0xff]  ;;  %v80_v0 = vld [vmem:[%s3776_s0 + $0xc8] sm:$0xff]  ;;  %v2149_v4 = vcombine.low %v71_v53, %v75_v55  ;;  %v2151_v6 = vcombine.low %v72_v56, %v76_v57  ;;  %v2859_v36 = vld [vmem:[#allocation2 + $0x1d0] sm:$0xff]  }
  0x39   :  { %2433 = vmatpush3.bf16.msra.mxu0 %v2823_v18  ;;  %v83_v63 = vld [vmem:[%s3776_s0 + $0xe0] sm:$0xff]  ;;  %v84_v1 = vld [vmem:[%s3776_s0 + $0xe8] sm:$0xff]  ;;  %v2860_v37 = vld [vmem:[#allocation2 + $0x190] sm:$0xff]  }
  0x3a   :  { %2527 = vmatpush3.bf16.msra.mxu1 %v2824_v19  ;;  %2434 = vmatprep.subr.bf16.mxu0 %v2825_v20  ;;  %v2845_v2 = vld [vmem:[#allocation2 + $0x168] sm:$0xff]   ;;  %v2158_v7 = vcombine.high %v79_v62, %v83_v63  ;;  %v2160_v9 = vcombine.high %v80_v0, %v84_v1  ;;  %v87_v10 = vld [vmem:[%s3776_s0 + $0x100] sm:$0xff]  ;;  %v2157_v18 = vcombine.low %v79_v62, %v83_v63 }
  0x3b   :  { %2528 = vmatprep.subr.bf16.mxu1 %v2826_v21  ;;  %v2846_v3 = vld [vmem:[#allocation2 + $0x128] sm:$0xff]   ;;  %v91_v11 = vld [vmem:[%s3776_s0 + $0x120] sm:$0xff]  ;;  %v2159_v19 = vcombine.low %v80_v0, %v84_v1 }
  0x3c   :  { %v2847_v5 = vld [vmem:[#allocation2 + $0x1e8] sm:$0xff]   ;;  %v2849_v12 = vld [vmem:[#allocation2 + $0x160] sm:$0xff]   ;;  %v2166_v20 = vcombine.high %v87_v10, %v91_v11 }
  0x3d   :  { %2435 = vmatpush3.bf16.msra.mxu0 %v2827_v22  ;;  %v2848_v8 = vld [vmem:[#allocation2 + $0x1a8] sm:$0xff]   ;;  %v2850_v15 = vld [vmem:[#allocation2 + $0x120] sm:$0xff]   ;;  %v2853_v22 = vld [vmem:[#allocation2 + $0x158] sm:$0xff]  }
  0x3e   :  { %2529 = vmatpush3.bf16.msra.mxu1 %v2828_v23  ;;  %2436 = vmatprep.subr.bf16.mxu0 %v2829_v24  ;;  %v88_v13 = vld [vmem:[%s3776_s0 + $0x108] sm:$0xff]  ;;  %v2851_v16 = vld [vmem:[#allocation2 + $0x1e0] sm:$0xff]   ;;  %v2854_v23 = vld [vmem:[#allocation2 + $0x118] sm:$0xff]  }
  0x3f   :  { %2530 = vmatprep.subr.bf16.mxu1 %v2830_v25  ;;  %v92_v14 = vld [vmem:[%s3776_s0 + $0x128] sm:$0xff]  ;;  %v2852_v17 = vld [vmem:[#allocation2 + $0x1a0] sm:$0xff]   ;;  %v2855_v24 = vld [vmem:[#allocation2 + $0x1d8] sm:$0xff]  }
  0x40   :  { %v2168_v21 = vcombine.high %v88_v13, %v92_v14  ;;  %v95_v25 = vld [vmem:[%s3776_s0 + $0x140] sm:$0xff]  ;;  %v2167_v32 = vcombine.low %v88_v13, %v92_v14  ;;  %v2862_v44 = vld [vmem:[#allocation2 + $0x108] sm:$0xff]  }
  0x41   :  { %2437 = vmatpush3.bf16.msra.mxu0 %v2831_v26  ;;  %v99_v26 = vld [vmem:[%s3776_s0 + $0x160] sm:$0xff]  ;;  %v2863_v47 = vld [vmem:[#allocation2 + $0x1c8] sm:$0xff]  }
  0x42   :  { %2531 = vmatpush3.bf16.msra.mxu1 %v2832_v27  ;;  %2438 = vmatprep.subr.bf16.mxu0 %v2833_v28  ;;  %v2856_v27 = vld [vmem:[#allocation2 + $0x198] sm:$0xff]   ;;  %v96_v28 = vld [vmem:[%s3776_s0 + $0x148] sm:$0xff]  ;;  %v2174_v33 = vcombine.high %v95_v25, %v99_v26  ;;  %v107_v39 = vld [vmem:[%s3776_s0 + $0x1a0] sm:$0xff] }
  0x43   :  { %2532 = vmatprep.subr.bf16.mxu1 %v2834_v29  ;;  %v100_v29 = vld [vmem:[%s3776_s0 + $0x168] sm:$0xff]  ;;  %v2866_v55 = vld [vmem:[#allocation2 + $0x100] sm:$0xff]  }
  0x44   :  { %v2175_v45 = vcombine.low %v96_v28, %v100_v29  ;;  %v112_v53 = vld [vmem:[%s3776_s0 + $0x1c8] sm:$0xff]  ;;  %v2867_v56 = vld [vmem:[#allocation2 + $0x1c0] sm:$0xff]  }
  0x45   :  { %2439 = vmatpush3.bf16.msra.mxu0 %v2835_v30  ;;  %v2165_v30 = vcombine.low %v87_v10, %v91_v11  ;;  %v2868_v57 = vld [vmem:[#allocation2 + $0x180] sm:$0xff]   ;;  %v120_v0 = vld [vmem:[%s3776_s0 + $0x208] sm:$0xff] }
  0x46   :  { %2533 = vmatpush3.bf16.msra.mxu1 %v2836_v31  ;;  %2612 = vmatprep.subr.bf16.mxu0 %v2837_v40  ;;  %v2857_v31 = vld [vmem:[#allocation2 + $0x150] sm:$0xff]   ;;  %v2861_v40 = vld [vmem:[#allocation2 + $0x148] sm:$0xff]   ;;  %v119_v62 = vld [vmem:[%s3776_s0 + $0x200] sm:$0xff] }
  0x47   :  { %2706 = vmatprep.subr.bf16.mxu1 %v2839_v42  ;;  %v108_v42 = vld [vmem:[%s3776_s0 + $0x1a8] sm:$0xff]  ;;  %v123_v63 = vld [vmem:[%s3776_s0 + $0x220] sm:$0xff] }
  0x48   :  { %1208 = vmatmul.mubr.bf16.vlgmr.msra.gmra.mxu0 %v2133_v35  ;;  %v2176_v35 = vcombine.high %v96_v28, %v100_v29  ;;  %v124_v1 = vld [vmem:[%s3776_s0 + $0x228] sm:$0xff]  ;;  %v2197_v10 = vcombine.low %v119_v62, %v123_v63  ;;  %v135_v14 = vld [vmem:[%s3776_s0 + $0x280] sm:$0xff] }
  0x49   :  { %1344 = vmatmul.mubr.bf16.vlgmr.msra.gmra.mxu1 %v2135_v38  ;;  %2613 = vmatpush3.bf16.msra.mxu0 %v2838_v41  ;;  %v103_v38 = vld [vmem:[%s3776_s0 + $0x180] sm:$0xff]  ;;  %v104_v41 = vld [vmem:[%s3776_s0 + $0x188] sm:$0xff]  ;;  %v2199_v11 = vcombine.low %v120_v0, %v124_v1 }
  0x4a   :  { %2707 = vmatpush3.bf16.msra.mxu1 %v2840_v43  ;;  %1215 = vmatprep.mubr.bf16.mxu0 %v2142_v46  ;;  %v2173_v43 = vcombine.low %v95_v25, %v99_v26  ;;  %v2182_v46 = vcombine.high %v103_v38, %v107_v39  ;;  %v2184_v48 = vcombine.high %v104_v41, %v108_v42  ;;  %v148_v25 = vld [vmem:[%s3776_s0 + $0x2e8] sm:$0xff] }
  0x4b   :  { %1351 = vmatprep.mubr.bf16.mxu1 %v2144_v49  ;;  %2614 = vmatprep.subr.bf16.mxu0 %v2841_v50  ;;  %v2864_v49 = vld [vmem:[#allocation2 + $0x188] sm:$0xff]   ;;  %v111_v50 = vld [vmem:[%s3776_s0 + $0x1c0] sm:$0xff] }
  0x4c   :  { %2708 = vmatprep.subr.bf16.mxu1 %v2843_v60 }
  0x4d   :  { %2615 = vmatpush3.bf16.msra.mxu0 %v2842_v52  ;;  %v2865_v52 = vld [vmem:[#allocation2 + $0x140] sm:$0xff]  }
  0x4e   :  { %2709 = vmatpush3.bf16.msra.mxu1 %v2844_v61  ;;  %2616 = vmatprep.subr.bf16.mxu0 %v2845_v2 }
  0x4f   :  { %2710 = vmatprep.subr.bf16.mxu1 %v2847_v5  ;;  %v2200_v5 = vcombine.high %v120_v0, %v124_v1 }
  0x50   :  { %1216 = vmatmul.mubr.bf16.gmra.mxu0 %v2141_v51  ;;  %v115_v51 = vld [vmem:[%s3776_s0 + $0x1e0] sm:$0xff] }
  0x51   :  { %1352 = vmatmul.mubr.bf16.gmra.mxu1 %v2143_v54  ;;  %1223 = vmatprep.mubr.bf16.mxu0 %v2150_v58  ;;  %v116_v54 = vld [vmem:[%s3776_s0 + $0x1e8] sm:$0xff]  ;;  %v2181_v58 = vcombine.low %v103_v38, %v107_v39  ;;  %v2190_v60 = vcombine.high %v111_v50, %v115_v51  ;;  %v2189_v2 = vcombine.low %v111_v50, %v115_v51  ;;  %v58_v38 = vld [vmem:[%s3776_s0 + $0x18] sm:$0xff] }
  0x52   :  { %1359 = vmatprep.mubr.bf16.mxu1 %v2152_v59  ;;  %2617 = vmatpush3.bf16.msra.mxu0 %v2846_v3  ;;  %v2183_v59 = vcombine.low %v104_v41, %v108_v42  ;;  %v2192_v61 = vcombine.high %v112_v53, %v116_v54  ;;  %v2191_v3 = vcombine.low %v112_v53, %v116_v54  ;;  %v62_v39 = vld [vmem:[%s3776_s0 + $0x38] sm:$0xff]  ;;  %v77_v53 = vld [vmem:[%s3776_s0 + $0xb0] sm:$0xff] }
  0x53   :  { %2711 = vmatpush3.bf16.msra.mxu1 %v2848_v8  ;;  %2618 = vmatprep.subr.bf16.mxu0 %v2849_v12  ;;  %v128_v8 = vld [vmem:[%s3776_s0 + $0x248] sm:$0xff]  ;;  %v74_v54 = vld [vmem:[%s3776_s0 + $0x98] sm:$0xff] }
  0x54   :  { %2712 = vmatprep.subr.bf16.mxu1 %v2851_v16  ;;  %v136_v16 = vld [vmem:[%s3776_s0 + $0x288] sm:$0xff] }
  0x56   :  { %2619 = vmatpush3.bf16.msra.mxu0 %v2850_v15  ;;  %v139_v15 = vld [vmem:[%s3776_s0 + $0x2a0] sm:$0xff] }
  0x57   :  { %2713 = vmatpush3.bf16.msra.mxu1 %v2852_v17  ;;  %2620 = vmatprep.subr.bf16.mxu0 %v2853_v22  ;;  %v140_v17 = vld [vmem:[%s3776_s0 + $0x2a8] sm:$0xff]  ;;  %v143_v22 = vld [vmem:[%s3776_s0 + $0x2c0] sm:$0xff]  ;;  %v2213_v26 = vcombine.low %v135_v14, %v139_v15 }
  0x58   :  { %1224 = vmatmul.mubr.bf16.gmra.mxu0 %v2149_v4  ;;  %2714 = vmatprep.subr.bf16.mxu1 %v2855_v24  ;;  %v2198_v4 = vcombine.high %v119_v62, %v123_v63  ;;  %v144_v24 = vld [vmem:[%s3776_s0 + $0x2c8] sm:$0xff]  ;;  %v82_v62 = vld [vmem:[%s3776_s0 + $0xd8] sm:$0xff] }
  0x59   :  { %1360 = vmatmul.mubr.bf16.gmra.mxu1 %v2151_v6  ;;  %1231 = vmatprep.mubr.bf16.mxu0 %v2158_v7  ;;  %v127_v6 = vld [vmem:[%s3776_s0 + $0x240] sm:$0xff]  ;;  %v2224_v29 = vcombine.high %v144_v24, %v148_v25  ;;  %v86_v63 = vld [vmem:[%s3776_s0 + $0xf8] sm:$0xff] }
  0x5a   :  { %1367 = vmatprep.mubr.bf16.mxu1 %v2160_v9  ;;  %2621 = vmatpush3.bf16.msra.mxu0 %v2854_v23  ;;  %v131_v7 = vld [vmem:[%s3776_s0 + $0x260] sm:$0xff]  ;;  %v132_v9 = vld [vmem:[%s3776_s0 + $0x268] sm:$0xff] }
  0x5b   :  { %2715 = vmatpush3.bf16.msra.mxu1 %v2856_v27  ;;  %2622 = vmatprep.subr.bf16.mxu0 %v2857_v31  ;;  %v2206_v12 = vcombine.high %v127_v6, %v131_v7  ;;  %v2208_v13 = vcombine.high %v128_v8, %v132_v9  ;;  %v147_v23 = vld [vmem:[%s3776_s0 + $0x2e0] sm:$0xff]  ;;  %v2215_v27 = vcombine.low %v136_v16, %v140_v17  ;;  %v152_v31 = vld [vmem:[%s3776_s0 + $0x308] sm:$0x33] }
  0x5c   :  { %2716 = vmatprep.subr.bf16.mxu1 %v2859_v36  ;;  %v2222_v28 = vcombine.high %v143_v22, %v147_v23  ;;  %v57_v36 = vld [vmem:[%s3776_s0 + $0x10] sm:$0xff]  ;;  %v2231_v41 = vcombine.low %v152_v31, %v152_v31 }
  0x5e   :  { %2623 = vmatpush3.bf16.msra.mxu0 %v2858_v34 }
  0x5f   :  { %2717 = vmatpush3.bf16.msra.mxu1 %v2860_v37  ;;  %2624 = vmatprep.subr.bf16.mxu0 %v2861_v40  ;;  %v61_v37 = vld [vmem:[%s3776_s0 + $0x30] sm:$0xff] }
  0x60   :  { %1232 = vmatmul.mubr.bf16.gmra.mxu0 %v2157_v18  ;;  %2718 = vmatprep.subr.bf16.mxu1 %v2863_v47  ;;  %v2205_v18 = vcombine.low %v127_v6, %v131_v7  ;;  %v2138_v42 = vcombine.high %v57_v36, %v61_v37  ;;  %v70_v47 = vld [vmem:[%s3776_s0 + $0x78] sm:$0xff] }
  0x61   :  { %1368 = vmatmul.mubr.bf16.gmra.mxu1 %v2159_v19  ;;  %1239 = vmatprep.mubr.bf16.mxu0 %v2166_v20  ;;  %v2207_v19 = vcombine.low %v128_v8, %v132_v9  ;;  %v2214_v20 = vcombine.high %v135_v14, %v139_v15  ;;  %v90_v6 = vld [vmem:[%s3776_s0 + $0x118] sm:$0xff]  ;;  %v2163_v9 = vcombine.low %v82_v62, %v86_v63 }
  0x62   :  { %1375 = vmatprep.mubr.bf16.mxu1 %v2168_v21  ;;  %2625 = vmatpush3.bf16.msra.mxu0 %v2862_v44  ;;  %v2216_v21 = vcombine.high %v136_v16, %v140_v17  ;;  %v65_v44 = vld [vmem:[%s3776_s0 + $0x50] sm:$0xff]  ;;  %v94_v7 = vld [vmem:[%s3776_s0 + $0x138] sm:$0xff] }
  0x63   :  { %2719 = vmatpush3.bf16.msra.mxu1 %v2864_v49  ;;  %2626 = vmatprep.subr.bf16.mxu0 %v2865_v52  ;;  %v2139_v49 = vcombine.low %v58_v38, %v62_v39  ;;  %v73_v52 = vld [vmem:[%s3776_s0 + $0x90] sm:$0xff]  ;;  %v98_v14 = vld [vmem:[%s3776_s0 + $0x158] sm:$0xff]  ;;  %v2171_v17 = vcombine.low %v90_v6, %v94_v7 }
  0x64   :  { %2720 = vmatprep.subr.bf16.mxu1 %v2867_v56  ;;  %v2153_v0 = vcombine.low %v73_v52, %v77_v53  ;;  %v102_v15 = vld [vmem:[%s3776_s0 + $0x178] sm:$0xff] }
  0x66   :  { %2627 = vmatpush3.bf16.msra.mxu0 %v2866_v55  ;;  %v78_v55 = vld [vmem:[%s3776_s0 + $0xb8] sm:$0xff] }
  0x67   :  { %2721 = vmatpush3.bf16.msra.mxu1 %v2868_v57  ;;  %v2155_v1 = vcombine.low %v74_v54, %v78_v55 }
  0x68   :  { %1240 = vmatmul.mubr.bf16.gmra.mxu0 %v2165_v30  ;;  %v151_v30 = vld [vmem:[%s3776_s0 + $0x300] sm:$0x33] }
  0x69   :  { %1376 = vmatmul.mubr.bf16.gmra.mxu1 %v2167_v32  ;;  %1247 = vmatprep.mubr.bf16.mxu0 %v2174_v33  ;;  %v2221_v32 = vcombine.low %v143_v22, %v147_v23  ;;  %v2223_v33 = vcombine.low %v144_v24, %v148_v25  ;;  %v2230_v34 = vcombine.high %v151_v30, %v151_v30  ;;  %v106_v22 = vld [vmem:[%s3776_s0 + $0x198] sm:$0xff] }
  0x6a   :  { %1383 = vmatprep.mubr.bf16.mxu1 %v2176_v35  ;;  %v2232_v35 = vcombine.high %v152_v31, %v152_v31  ;;  %v2229_v40 = vcombine.low %v151_v30, %v151_v30  ;;  %v110_v23 = vld [vmem:[%s3776_s0 + $0x1b8] sm:$0xff]  ;;  %v2179_v25 = vcombine.low %v98_v14, %v102_v15 }
  0x6b   :  { %v114_v30 = vld [vmem:[%s3776_s0 + $0x1d8] sm:$0xff] }
  0x6c   :  { %v118_v31 = vld [vmem:[%s3776_s0 + $0x1f8] sm:$0xff] }
  0x70   :  { %1248 = vmatmul.mubr.bf16.gmra.mxu0 %v2173_v43  ;;  %v2140_v43 = vcombine.high %v58_v38, %v62_v39  ;;  %v122_v38 = vld [vmem:[%s3776_s0 + $0x218] sm:$0xff] }
  0x71   :  { %1384 = vmatmul.mubr.bf16.gmra.mxu1 %v2175_v45  ;;  %1255 = vmatprep.mubr.bf16.mxu0 %v2182_v46  ;;  %v69_v45 = vld [vmem:[%s3776_s0 + $0x70] sm:$0xff]  ;;  %v66_v46 = vld [vmem:[%s3776_s0 + $0x58] sm:$0xff] }
  0x72   :  { %1391 = vmatprep.mubr.bf16.mxu1 %v2184_v48  ;;  %v2137_v48 = vcombine.low %v57_v36, %v61_v37  ;;  %v2146_v50 = vcombine.high %v65_v44, %v69_v45  ;;  %v2148_v51 = vcombine.high %v66_v46, %v70_v47  ;;  %v2145_v56 = vcombine.low %v65_v44, %v69_v45  ;;  %v121_v36 = vld [vmem:[%s3776_s0 + $0x210] sm:$0xff]  ;;  %v126_v39 = vld [vmem:[%s3776_s0 + $0x238] sm:$0xff] }
  0x73   :  { %v2147_v57 = vcombine.low %v66_v46, %v70_v47  ;;  %v125_v37 = vld [vmem:[%s3776_s0 + $0x230] sm:$0xff]  ;;  %v130_v46 = vld [vmem:[%s3776_s0 + $0x258] sm:$0xff] }
  0x74   :  { %v129_v44 = vld [vmem:[%s3776_s0 + $0x250] sm:$0xff]  ;;  %v134_v47 = vld [vmem:[%s3776_s0 + $0x278] sm:$0xff] }
  0x75   :  { %v133_v45 = vld [vmem:[%s3776_s0 + $0x270] sm:$0xff] }
  0x78   :  { %1256 = vmatmul.mubr.bf16.gmra.mxu0 %v2181_v58  ;;  %v2154_v58 = vcombine.high %v73_v52, %v77_v53  ;;  %v137_v52 = vld [vmem:[%s3776_s0 + $0x290] sm:$0xff] }
  0x79   :  { %1392 = vmatmul.mubr.bf16.gmra.mxu1 %v2183_v59  ;;  %1263 = vmatprep.mubr.bf16.mxu0 %v2190_v60  ;;  %v2156_v59 = vcombine.high %v74_v54, %v78_v55  ;;  %v81_v60 = vld [vmem:[%s3776_s0 + $0xd0] sm:$0xff]  ;;  %v138_v54 = vld [vmem:[%s3776_s0 + $0x298] sm:$0xff] }
  0x7a   :  { %1399 = vmatprep.mubr.bf16.mxu1 %v2192_v61  ;;  %v85_v61 = vld [vmem:[%s3776_s0 + $0xf0] sm:$0xff]  ;;  %v142_v55 = vld [vmem:[%s3776_s0 + $0x2b8] sm:$0xff] }
  0x7b   :  { %v2161_v8 = vcombine.low %v81_v60, %v85_v61  ;;  %v141_v53 = vld [vmem:[%s3776_s0 + $0x2b0] sm:$0xff] }
  0x80   :  { %1264 = vmatmul.mubr.bf16.gmra.mxu0 %v2189_v2  ;;  %v2162_v2 = vcombine.high %v81_v60, %v85_v61  ;;  %v145_v60 = vld [vmem:[%s3776_s0 + $0x2d0] sm:$0xff] }
  0x81   :  { %1400 = vmatmul.mubr.bf16.gmra.mxu1 %v2191_v3  ;;  %1271 = vmatprep.mubr.bf16.mxu0 %v2198_v4  ;;  %v2164_v3 = vcombine.high %v82_v62, %v86_v63  ;;  %v89_v4 = vld [vmem:[%s3776_s0 + $0x110] sm:$0xff]  ;;  %v146_v62 = vld [vmem:[%s3776_s0 + $0x2d8] sm:$0xff] }
  0x82   :  { %1407 = vmatprep.mubr.bf16.mxu1 %v2200_v5  ;;  %v93_v5 = vld [vmem:[%s3776_s0 + $0x130] sm:$0xff]  ;;  %v150_v63 = vld [vmem:[%s3776_s0 + $0x2f8] sm:$0xff] }
  0x83   :  { %v2169_v16 = vcombine.low %v89_v4, %v93_v5  ;;  %v149_v61 = vld [vmem:[%s3776_s0 + $0x2f0] sm:$0xff] }
  0x88   :  { %1272 = vmatmul.mubr.bf16.gmra.mxu0 %v2197_v10  ;;  %v2170_v10 = vcombine.high %v89_v4, %v93_v5  ;;  %v153_v4 = vld [vmem:[%s3776_s0 + $0x310] sm:$0x33]  ;;  %v154_v5 = vld [vmem:[%s3776_s0 + $0x318] sm:$0x33] }
  0x89   :  { %1408 = vmatmul.mubr.bf16.gmra.mxu1 %v2199_v11  ;;  %1279 = vmatprep.mubr.bf16.mxu0 %v2206_v12  ;;  %v2172_v11 = vcombine.high %v90_v6, %v94_v7  ;;  %v97_v12 = vld [vmem:[%s3776_s0 + $0x150] sm:$0xff]  ;;  %v2225_v6 = vcombine.low %v145_v60, %v149_v61  ;;  %v2227_v7 = vcombine.low %v146_v62, %v150_v63 }
  0x8a   :  { %1415 = vmatprep.mubr.bf16.mxu1 %v2208_v13  ;;  %v101_v13 = vld [vmem:[%s3776_s0 + $0x170] sm:$0xff] }
  0x8b   :  { %v2177_v24 = vcombine.low %v97_v12, %v101_v13 }
  0x90   :  { %1280 = vmatmul.mubr.bf16.gmra.mxu0 %v2205_v18  ;;  %v2178_v18 = vcombine.high %v97_v12, %v101_v13 }
  0x91   :  { %1416 = vmatmul.mubr.bf16.gmra.mxu1 %v2207_v19  ;;  %1287 = vmatprep.mubr.bf16.mxu0 %v2214_v20  ;;  %v2180_v19 = vcombine.high %v98_v14, %v102_v15  ;;  %v105_v20 = vld [vmem:[%s3776_s0 + $0x190] sm:$0xff] }
  0x92   :  { %1423 = vmatprep.mubr.bf16.mxu1 %v2216_v21  ;;  %v109_v21 = vld [vmem:[%s3776_s0 + $0x1b0] sm:$0xff] }
  0x98   :  { %1288 = vmatmul.mubr.bf16.gmra.mxu0 %v2213_v26  ;;  %v2186_v26 = vcombine.high %v105_v20, %v109_v21 }
  0x99   :  { %1424 = vmatmul.mubr.bf16.gmra.mxu1 %v2215_v27  ;;  %1295 = vmatprep.mubr.bf16.mxu0 %v2222_v28  ;;  %v2188_v27 = vcombine.high %v106_v22, %v110_v23  ;;  %v113_v28 = vld [vmem:[%s3776_s0 + $0x1d0] sm:$0xff] }
  0x9a   :  { %1431 = vmatprep.mubr.bf16.mxu1 %v2224_v29  ;;  %v117_v29 = vld [vmem:[%s3776_s0 + $0x1f0] sm:$0xff] }
  0xa0   :  { %1296 = vmatmul.mubr.bf16.gmra.mxu0 %v2221_v32  ;;  %v2185_v32 = vcombine.low %v105_v20, %v109_v21 }
  0xa1   :  { %1432 = vmatmul.mubr.bf16.gmra.mxu1 %v2223_v33  ;;  %1303 = vmatprep.mubr.bf16.mxu0 %v2230_v34  ;;  %v2187_v33 = vcombine.low %v106_v22, %v110_v23  ;;  %v2194_v34 = vcombine.high %v113_v28, %v117_v29 }
  0xa2   :  { %1439 = vmatprep.mubr.bf16.mxu1 %v2232_v35  ;;  %v2196_v35 = vcombine.high %v114_v30, %v118_v31 }
  0xa8   :  { %1304 = vmatmul.mubr.bf16.gmra.mxu0 %v2229_v40  ;;  %v2193_v40 = vcombine.low %v113_v28, %v117_v29 }
  0xa9   :  { %1440 = vmatmul.mubr.bf16.gmra.mxu1 %v2231_v41  ;;  %1479 = vmatprep.mubr.bf16.mxu0 %v2138_v42  ;;  %v2195_v41 = vcombine.low %v114_v30, %v118_v31  ;;  %v2202_v42 = vcombine.high %v121_v36, %v125_v37 }
  0xaa   :  { %1615 = vmatprep.mubr.bf16.mxu1 %v2140_v43  ;;  %v2204_v43 = vcombine.high %v122_v38, %v126_v39 }
  0xb0   :  { %1480 = vmatmul.mubr.bf16.vlgmr.msra.gmra.mxu0 %v2137_v48  ;;  %v2201_v48 = vcombine.low %v121_v36, %v125_v37 }
  0xb1   :  { %1616 = vmatmul.mubr.bf16.vlgmr.msra.gmra.mxu1 %v2139_v49  ;;  %1487 = vmatprep.mubr.bf16.mxu0 %v2146_v50  ;;  %v2203_v49 = vcombine.low %v122_v38, %v126_v39  ;;  %v2210_v50 = vcombine.high %v129_v44, %v133_v45 }
  0xb2   :  { %1623 = vmatprep.mubr.bf16.mxu1 %v2148_v51  ;;  %v2212_v51 = vcombine.high %v130_v46, %v134_v47 }
  0xb8   :  { %1488 = vmatmul.mubr.bf16.gmra.mxu0 %v2145_v56  ;;  %v2209_v56 = vcombine.low %v129_v44, %v133_v45 }
  0xb9   :  { %1624 = vmatmul.mubr.bf16.gmra.mxu1 %v2147_v57  ;;  %1495 = vmatprep.mubr.bf16.mxu0 %v2154_v58  ;;  %v2211_v57 = vcombine.low %v130_v46, %v134_v47  ;;  %v2218_v58 = vcombine.high %v137_v52, %v141_v53 }
  0xba   :  { %1631 = vmatprep.mubr.bf16.mxu1 %v2156_v59  ;;  %v2220_v59 = vcombine.high %v138_v54, %v142_v55 }
  0xc0   :  { %1496 = vmatmul.mubr.bf16.gmra.mxu0 %v2153_v0  ;;  %v2217_v0 = vcombine.low %v137_v52, %v141_v53 }
  0xc1   :  { %1632 = vmatmul.mubr.bf16.gmra.mxu1 %v2155_v1  ;;  %1503 = vmatprep.mubr.bf16.mxu0 %v2162_v2  ;;  %v2219_v1 = vcombine.low %v138_v54, %v142_v55  ;;  %v2226_v2 = vcombine.high %v145_v60, %v149_v61 }
  0xc2   :  { %1639 = vmatprep.mubr.bf16.mxu1 %v2164_v3  ;;  %v2228_v3 = vcombine.high %v146_v62, %v150_v63 }
  0xc8   :  { %1504 = vmatmul.mubr.bf16.gmra.mxu0 %v2161_v8  ;;  %v2234_v8 = vcombine.high %v153_v4, %v153_v4 }
  0xc9   :  { %1640 = vmatmul.mubr.bf16.gmra.mxu1 %v2163_v9  ;;  %1511 = vmatprep.mubr.bf16.mxu0 %v2170_v10  ;;  %v2236_v9 = vcombine.high %v154_v5, %v154_v5 }
  0xca   :  { %1647 = vmatprep.mubr.bf16.mxu1 %v2172_v11 }
  0xd0   :  { %1512 = vmatmul.mubr.bf16.gmra.mxu0 %v2169_v16 }
  0xd1   :  { %1648 = vmatmul.mubr.bf16.gmra.mxu1 %v2171_v17  ;;  %1519 = vmatprep.mubr.bf16.mxu0 %v2178_v18  ;;  %v2233_v17 = vcombine.low %v153_v4, %v153_v4 }
  0xd2   :  { %1655 = vmatprep.mubr.bf16.mxu1 %v2180_v19  ;;  %v2235_v19 = vcombine.low %v154_v5, %v154_v5 }
  0xd8   :  { %1520 = vmatmul.mubr.bf16.gmra.mxu0 %v2177_v24 }
  0xd9   :  { %1656 = vmatmul.mubr.bf16.gmra.mxu1 %v2179_v25  ;;  %1527 = vmatprep.mubr.bf16.mxu0 %v2186_v26 }
  0xda   :  { %1663 = vmatprep.mubr.bf16.mxu1 %v2188_v27 }
  0xe0   :  { %1528 = vmatmul.mubr.bf16.gmra.mxu0 %v2185_v32 }
  0xe1   :  { %1664 = vmatmul.mubr.bf16.gmra.mxu1 %v2187_v33  ;;  %1535 = vmatprep.mubr.bf16.mxu0 %v2194_v34 }
  0xe2   :  { %1671 = vmatprep.mubr.bf16.mxu1 %v2196_v35 }
  0xe8   :  { %1536 = vmatmul.mubr.bf16.gmra.mxu0 %v2193_v40 }
  0xe9   :  { %1672 = vmatmul.mubr.bf16.gmra.mxu1 %v2195_v41  ;;  %1543 = vmatprep.mubr.bf16.mxu0 %v2202_v42 }
  0xea   :  { %1679 = vmatprep.mubr.bf16.mxu1 %v2204_v43 }
  0xf0   :  { %1544 = vmatmul.mubr.bf16.gmra.mxu0 %v2201_v48 }
  0xf1   :  { %1680 = vmatmul.mubr.bf16.gmra.mxu1 %v2203_v49  ;;  %1551 = vmatprep.mubr.bf16.mxu0 %v2210_v50 }
  0xf2   :  { %1687 = vmatprep.mubr.bf16.mxu1 %v2212_v51 }
  0xf8   :  { %1552 = vmatmul.mubr.bf16.gmra.mxu0 %v2209_v56 }
  0xf9   :  { %1688 = vmatmul.mubr.bf16.gmra.mxu1 %v2211_v57  ;;  %1559 = vmatprep.mubr.bf16.mxu0 %v2218_v58 }
  0xfa   :  { %1695 = vmatprep.mubr.bf16.mxu1 %v2220_v59 }
 0x100   :  { %1560 = vmatmul.mubr.bf16.gmra.mxu0 %v2217_v0 }
 0x101   :  { %1696 = vmatmul.mubr.bf16.gmra.mxu1 %v2219_v1  ;;  %1567 = vmatprep.mubr.bf16.mxu0 %v2226_v2 }
 0x102   :  { %1703 = vmatprep.mubr.bf16.mxu1 %v2228_v3 }
 0x108   :  { %v2440_v10 = vpop.f32.mrf.mxu0  ;;  %1568 = vmatmul.mubr.bf16.gmra.mxu0 %v2225_v6 }
 0x109   :  { %v2534_v11 = vpop.f32.mrf.mxu1  ;;  %1704 = vmatmul.mubr.bf16.gmra.mxu1 %v2227_v7  ;;  %1575 = vmatprep.mubr.bf16.mxu0 %v2234_v8 }
 0x10a   :  { %v2441_v12 = vpop.f32.mrf.mxu0  ;;  %1711 = vmatprep.mubr.bf16.mxu1 %v2236_v9 }
 0x10b   :  { %v2442_v13 = vadd.f32 %v2441_v12, %v2440_v10  ;;  %v2535_v14 = vpop.f32.mrf.mxu1 }
 0x10c   :  { %v2536_v15 = vadd.f32 %v2535_v14, %v2534_v11  ;;  %v2443_v16 = vpop.f32.mrf.mxu0 }
 0x10d   :  { %v2537_v18 = vpop.f32.mrf.mxu1 }
 0x10e   :  { %v3282_v20 = vadd.f32 %v2536_v15, %v2442_v13  ;;  %v2444_v21 = vpop.f32.mrf.mxu0 }
 0x10f   :  { %v2445_v22 = vadd.f32 %v2444_v21, %v2443_v16  ;;  %v2538_v23 = vpop.f32.mrf.mxu1 }
 0x110   :  { %v2539_v24 = vadd.f32 %v2538_v23, %v2537_v18  ;;  %v2446_v25 = vpop.f32.mrf.mxu0  ;;  %1576 = vmatmul.mubr.bf16.gmra.mxu0 %v2233_v17 }
 0x111   :  { %v2540_v26 = vpop.f32.mrf.mxu1  ;;  %1712 = vmatmul.mubr.bf16.gmra.mxu1 %v2235_v19 }
 0x112   :  { %v3284_v27 = vadd.f32 %v2539_v24, %v2445_v22  ;;  %v2447_v28 = vpop.f32.mrf.mxu0 }
 0x113   :  { %v2448_v29 = vadd.f32 %v2447_v28, %v2446_v25  ;;  %v2541_v30 = vpop.f32.mrf.mxu1 }
 0x114   :  { %v2542_v31 = vadd.f32 %v2541_v30, %v2540_v26  ;;  %v2449_v32 = vpop.f32.mrf.mxu0 }
 0x115   :  { %v2543_v33 = vpop.f32.mrf.mxu1 }
 0x116   :  { %v3286_v34 = vadd.f32 %v2542_v31, %v2448_v29  ;;  %v2450_v35 = vpop.f32.mrf.mxu0 }
 0x117   :  { %v2451_v36 = vadd.f32 %v2450_v35, %v2449_v32  ;;  %v2544_v37 = vpop.f32.mrf.mxu1 }
 0x118   :  { %v2545_v38 = vadd.f32 %v2544_v37, %v2543_v33  ;;  %v2452_v39 = vpop.f32.mrf.mxu0 }
 0x119   :  { %v2546_v40 = vpop.f32.mrf.mxu1 }
 0x11a   :  { %v3288_v41 = vadd.f32 %v2545_v38, %v2451_v36  ;;  %v2453_v42 = vpop.f32.mrf.mxu0 }
 0x11b   :  { %v2454_v43 = vadd.f32 %v2453_v42, %v2452_v39  ;;  %v2547_v44 = vpop.f32.mrf.mxu1 }
 0x11c   :  { %v2548_v45 = vadd.f32 %v2547_v44, %v2546_v40  ;;  %v2455_v46 = vpop.f32.mrf.mxu0 }
 0x11d   :  { %v2549_v47 = vpop.f32.mrf.mxu1 }
 0x11e   :  { %v3290_v48 = vadd.f32 %v2548_v45, %v2454_v43  ;;  %v2456_v49 = vpop.f32.mrf.mxu0 }
 0x11f   :  { %v2457_v50 = vadd.f32 %v2456_v49, %v2455_v46  ;;  %v2550_v51 = vpop.f32.mrf.mxu1 }
 0x120   :  { %v2551_v52 = vadd.f32 %v2550_v51, %v2549_v47  ;;  %v2458_v53 = vpop.f32.mrf.mxu0 }
 0x121   :  { %v2552_v54 = vpop.f32.mrf.mxu1 }
 0x122   :  { %v3292_v55 = vadd.f32 %v2551_v52, %v2457_v50  ;;  %v2459_v56 = vpop.f32.mrf.mxu0 }
 0x123   :  { %v2460_v57 = vadd.f32 %v2459_v56, %v2458_v53  ;;  %v2553_v58 = vpop.f32.mrf.mxu1 }
 0x124   :  { %v2554_v59 = vadd.f32 %v2553_v58, %v2552_v54  ;;  %v2461_v60 = vpop.f32.mrf.mxu0 }
 0x125   :  { %v2555_v61 = vpop.f32.mrf.mxu1 }
 0x126   :  { %v3294_v62 = vadd.f32 %v2554_v59, %v2460_v57  ;;  %v2462_v63 = vpop.f32.mrf.mxu0 }
 0x127   :  { %v2463_v0 = vadd.f32 %v2462_v63, %v2461_v60  ;;  %v2556_v1 = vpop.f32.mrf.mxu1 }
 0x128   :  { %v2557_v2 = vadd.f32 %v2556_v1, %v2555_v61  ;;  %v2464_v3 = vpop.f32.mrf.mxu0 }
 0x129   :  { %v2558_v4 = vpop.f32.mrf.mxu1 }
 0x12a   :  { %v3296_v5 = vadd.f32 %v2557_v2, %v2463_v0  ;;  %v2465_v6 = vpop.f32.mrf.mxu0 }
 0x12b   :  { %v2466_v7 = vadd.f32 %v2465_v6, %v2464_v3  ;;  %v2559_v8 = vpop.f32.mrf.mxu1 }
 0x12c   :  { %v2560_v9 = vadd.f32 %v2559_v8, %v2558_v4  ;;  %v2467_v10 = vpop.f32.mrf.mxu0 }
 0x12d   :  { %v2561_v11 = vpop.f32.mrf.mxu1 }
 0x12e   :  { %v3298_v12 = vadd.f32 %v2560_v9, %v2466_v7  ;;  %v2468_v13 = vpop.f32.mrf.mxu0 }
 0x12f   :  { %v2469_v14 = vadd.f32 %v2468_v13, %v2467_v10  ;;  %v2562_v15 = vpop.f32.mrf.mxu1 }
 0x130   :  { %v2563_v16 = vadd.f32 %v2562_v15, %v2561_v11  ;;  %v2470_v17 = vpop.f32.mrf.mxu0 }
 0x131   :  { %v2564_v18 = vpop.f32.mrf.mxu1 }
 0x132   :  { %v3300_v19 = vadd.f32 %v2563_v16, %v2469_v14  ;;  %v2471_v21 = vpop.f32.mrf.mxu0 }
 0x133   :  { %v2472_v22 = vadd.f32 %v2471_v21, %v2470_v17  ;;  %v2565_v23 = vpop.f32.mrf.mxu1 }
 0x134   :  { %v2566_v24 = vadd.f32 %v2565_v23, %v2564_v18  ;;  %v2473_v25 = vpop.f32.mrf.mxu0 }
 0x135   :  { %v2567_v26 = vpop.f32.mrf.mxu1 }
 0x136   :  { %v3302_v28 = vadd.f32 %v2566_v24, %v2472_v22  ;;  %v2474_v29 = vpop.f32.mrf.mxu0 }
 0x137   :  { %v2475_v30 = vadd.f32 %v2474_v29, %v2473_v25  ;;  %v2568_v31 = vpop.f32.mrf.mxu1 }
 0x138   :  { %v2569_v32 = vadd.f32 %v2568_v31, %v2567_v26  ;;  %v2476_v33 = vpop.f32.mrf.mxu0 }
 0x139   :  { %v2570_v35 = vpop.f32.mrf.mxu1 }
 0x13a   :  { %v3304_v36 = vadd.f32 %v2569_v32, %v2475_v30  ;;  %v2477_v37 = vpop.f32.mrf.mxu0 }
 0x13b   :  { %v2478_v38 = vadd.f32 %v2477_v37, %v2476_v33  ;;  %v2571_v39 = vpop.f32.mrf.mxu1 }
 0x13c   :  { %v2572_v40 = vadd.f32 %v2571_v39, %v2570_v35  ;;  %v2479_v42 = vpop.f32.mrf.mxu0 }
 0x13d   :  { %v2573_v43 = vpop.f32.mrf.mxu1 }
 0x13e   :  { %v3306_v44 = vadd.f32 %v2572_v40, %v2478_v38  ;;  %v2480_v45 = vpop.f32.mrf.mxu0 }
 0x13f   :  { %v2481_v46 = vadd.f32 %v2480_v45, %v2479_v42  ;;  %v2574_v47 = vpop.f32.mrf.mxu1 }
 0x140   :  { %v2575_v49 = vadd.f32 %v2574_v47, %v2573_v43  ;;  %v2482_v50 = vpop.f32.mrf.mxu0 }
 0x141   :  { %v2576_v51 = vpop.f32.mrf.mxu1 }
 0x142   :  { %v3308_v52 = vadd.f32 %v2575_v49, %v2481_v46  ;;  %v2483_v53 = vpop.f32.mrf.mxu0 }
 0x143   :  { %v2484_v54 = vadd.f32 %v2483_v53, %v2482_v50  ;;  %v2577_v56 = vpop.f32.mrf.mxu1 }
 0x144   :  { %v2578_v57 = vadd.f32 %v2577_v56, %v2576_v51  ;;  %v2485_v58 = vpop.f32.mrf.mxu0 }
 0x145   :  { %v2579_v59 = vpop.f32.mrf.mxu1 }
 0x146   :  { %v3310_v60 = vadd.f32 %v2578_v57, %v2484_v54  ;;  %v2486_v61 = vpop.f32.mrf.mxu0 }
 0x147   :  { %v2487_v63 = vadd.f32 %v2486_v61, %v2485_v58  ;;  %v2580_v0 = vpop.f32.mrf.mxu1 }
 0x148   :  { %v2581_v1 = vadd.f32 %v2580_v0, %v2579_v59  ;;  %v2488_v2 = vpop.f32.mrf.mxu0 }
 0x149   :  { %v2582_v3 = vpop.f32.mrf.mxu1 }
 0x14a   :  { %v3312_v4 = vadd.f32 %v2581_v1, %v2487_v63  ;;  %v2489_v6 = vpop.f32.mrf.mxu0 }
 0x14b   :  { %v2490_v7 = vadd.f32 %v2489_v6, %v2488_v2  ;;  %v2583_v8 = vpop.f32.mrf.mxu1 }
 0x14c   :  { %v2584_v9 = vadd.f32 %v2583_v8, %v2582_v3  ;;  %v2491_v10 = vpop.f32.mrf.mxu0 }
 0x14d   :  { %v2585_v11 = vpop.f32.mrf.mxu1 }
 0x14e   :  { %v3314_v13 = vadd.f32 %v2584_v9, %v2490_v7  ;;  %v2492_v14 = vpop.f32.mrf.mxu0 }
 0x14f   :  { %v2493_v15 = vadd.f32 %v2492_v14, %v2491_v10  ;;  %v2586_v16 = vpop.f32.mrf.mxu1 }
 0x150   :  { %v2587_v17 = vadd.f32 %v2586_v16, %v2585_v11  ;;  %v2494_v18 = vpop.f32.mrf.mxu0 }
 0x151   :  { %v2588_v21 = vpop.f32.mrf.mxu1 }
 0x152   :  { %v3316_v22 = vadd.f32 %v2587_v17, %v2493_v15  ;;  %v2495_v23 = vpop.f32.mrf.mxu0 }
 0x153   :  { %v2496_v24 = vadd.f32 %v2495_v23, %v2494_v18  ;;  %v2589_v25 = vpop.f32.mrf.mxu1 }
 0x154   :  { %v2590_v26 = vadd.f32 %v2589_v25, %v2588_v21  ;;  %v2497_v29 = vpop.f32.mrf.mxu0 }
 0x155   :  { %v2591_v30 = vpop.f32.mrf.mxu1 }
 0x156   :  { %v3318_v31 = vadd.f32 %v2590_v26, %v2496_v24  ;;  %v2498_v32 = vpop.f32.mrf.mxu0 }
 0x157   :  { %v2499_v33 = vadd.f32 %v2498_v32, %v2497_v29  ;;  %v2592_v35 = vpop.f32.mrf.mxu1 }
 0x158   :  { %v2593_v37 = vadd.f32 %v2592_v35, %v2591_v30  ;;  %v2500_v38 = vpop.f32.mrf.mxu0 }
 0x159   :  { %v2594_v39 = vpop.f32.mrf.mxu1 }
 0x15a   :  { %v3320_v40 = vadd.f32 %v2593_v37, %v2499_v33  ;;  %v2501_v42 = vpop.f32.mrf.mxu0 }
 0x15b   :  { %v2502_v43 = vadd.f32 %v2501_v42, %v2500_v38  ;;  %v2595_v45 = vpop.f32.mrf.mxu1 }
 0x15c   :  { %v2596_v46 = vadd.f32 %v2595_v45, %v2594_v39  ;;  %v2503_v47 = vpop.f32.mrf.mxu0 }
 0x15d   :  { %v2597_v49 = vpop.f32.mrf.mxu1 }
 0x15e   :  { %v3322_v50 = vadd.f32 %v2596_v46, %v2502_v43  ;;  %v2504_v51 = vpop.f32.mrf.mxu0 }
 0x15f   :  { %v2505_v53 = vadd.f32 %v2504_v51, %v2503_v47  ;;  %v2598_v54 = vpop.f32.mrf.mxu1 }
 0x160   :  { %v2599_v56 = vadd.f32 %v2598_v54, %v2597_v49  ;;  %v2506_v57 = vpop.f32.mrf.mxu0 }
 0x161   :  { %v2600_v58 = vpop.f32.mrf.mxu1 }
 0x162   :  { %v3324_v59 = vadd.f32 %v2599_v56, %v2505_v53  ;;  %v2507_v61 = vpop.f32.mrf.mxu0 }
 0x163   :  { %v2508_v63 = vadd.f32 %v2507_v61, %v2506_v57  ;;  %v2601_v0 = vpop.f32.mrf.mxu1 }
 0x164   :  { %v2602_v1 = vadd.f32 %v2601_v0, %v2600_v58  ;;  %v2509_v2 = vpop.f32.mrf.mxu0 }
 0x165   :  { %v2603_v3 = vpop.f32.mrf.mxu1 }
 0x166   :  { %v3326_v6 = vadd.f32 %v2602_v1, %v2508_v63  ;;  %v2510_v7 = vpop.f32.mrf.mxu0 }
 0x167   :  { %v2511_v8 = vadd.f32 %v2510_v7, %v2509_v2  ;;  %v2604_v9 = vpop.f32.mrf.mxu1 }
 0x168   :  { %v2605_v10 = vadd.f32 %v2604_v9, %v2603_v3  ;;  %v2512_v11 = vpop.f32.mrf.mxu0 }
 0x169   :  { %v2606_v14 = vpop.f32.mrf.mxu1 }
 0x16a   :  { %v3328_v15 = vadd.f32 %v2605_v10, %v2511_v8  ;;  %v2513_v16 = vpop.f32.mrf.mxu0 }
 0x16b   :  { %v2514_v17 = vadd.f32 %v2513_v16, %v2512_v11  ;;  %v2607_v18 = vpop.f32.mrf.mxu1 }
 0x16c   :  { %v2608_v21 = vadd.f32 %v2607_v18, %v2606_v14  ;;  %v2515_v23 = vpop.f32.mrf.mxu0 }
 0x16d   :  { %v2609_v24 = vpop.f32.mrf.mxu1 }
 0x16e   :  { %v3330_v25 = vadd.f32 %v2608_v21, %v2514_v17  ;;  %v2516_v26 = vpop.f32.mrf.mxu0 }
 0x16f   :  { %v2610_v29 = vpop.f32.mrf.mxu1 }
 0x170   :  { %v2628_v30 = vpop.f32.mrf.mxu0 }
 0x171   :  { %v2722_v32 = vpop.f32.mrf.mxu1 }
 0x172   :  { %v2629_v33 = vpop.f32.mrf.mxu0 }
 0x173   :  { %v2630_v35 = vadd.f32 %v2629_v33, %v2628_v30  ;;  %v2723_v37 = vpop.f32.mrf.mxu1 }
 0x174   :  { %v2724_v38 = vadd.f32 %v2723_v37, %v2722_v32  ;;  %v2631_v39 = vpop.f32.mrf.mxu0 }
 0x175   :  { %v1482_v42 = vadd.f32 %v2630_v35, %v3282_v20  ;;  %v2725_v43 = vpop.f32.mrf.mxu1 }
 0x176   :  { %v2632_v45 = vpop.f32.mrf.mxu0 }
 0x177   :  { %v3333_v46 = vadd.f32 %v2724_v38, %v1482_v42  ;;  %v2633_v47 = vadd.f32 %v2632_v45, %v2631_v39  ;;  %v2726_v49 = vpop.f32.mrf.mxu1 }
 0x178   :  { %v2727_v51 = vadd.f32 %v2726_v49, %v2725_v43  ;;  %v2634_v53 = vpop.f32.mrf.mxu0 }
 0x179   :  { %v1485_v54 = vadd.f32 %v2633_v47, %v3284_v27  ;;  %v2728_v56 = vpop.f32.mrf.mxu1 }
 0x17a   :  { %v2635_v57 = vpop.f32.mrf.mxu0 }
 0x17b   :  { %v3336_v58 = vadd.f32 %v2727_v51, %v1485_v54  ;;  %v2636_v61 = vadd.f32 %v2635_v57, %v2634_v53  ;;  %v2729_v63 = vpop.f32.mrf.mxu1 }
 0x17c   :  { %v2730_v0 = vadd.f32 %v2729_v63, %v2728_v56  ;;  %v2637_v1 = vpop.f32.mrf.mxu0 }
 0x17d   :  { %v1719_v20 = vadd.f32 %v3336_v58, %v3333_v46  ;;  %v1490_v2 = vadd.f32 %v2636_v61, %v3286_v34  ;;  %v2731_v3 = vpop.f32.mrf.mxu1 }
 0x17e   :  { %v2638_v7 = vpop.f32.mrf.mxu0 }
 0x17f   :  { %v3341_v8 = vadd.f32 %v2730_v0, %v1490_v2  ;;  %v2639_v9 = vadd.f32 %v2638_v7, %v2637_v1  ;;  %v2732_v10 = vpop.f32.mrf.mxu1 }
 0x180   :  { %v2733_v27 = vadd.f32 %v2732_v10, %v2731_v3  ;;  %v2640_v11 = vpop.f32.mrf.mxu0 }
 0x181   :  { %v1720_v14 = vadd.f32 %v1719_v20, %v3341_v8  ;;  %v1493_v16 = vadd.f32 %v2639_v9, %v3288_v41  ;;  %v2734_v17 = vpop.f32.mrf.mxu1 }
 0x182   :  { %v2641_v18 = vpop.f32.mrf.mxu0 }
 0x183   :  { %v3345_v21 = vadd.f32 %v2733_v27, %v1493_v16  ;;  %v2642_v23 = vadd.f32 %v2641_v18, %v2640_v11  ;;  %v2735_v24 = vpop.f32.mrf.mxu1 }
 0x184   :  { %v2736_v26 = vadd.f32 %v2735_v24, %v2734_v17  ;;  %v2643_v34 = vpop.f32.mrf.mxu0 }
 0x185   :  { %v1721_v29 = vadd.f32 %v1720_v14, %v3345_v21  ;;  %v1498_v30 = vadd.f32 %v2642_v23, %v3290_v48  ;;  %v2737_v32 = vpop.f32.mrf.mxu1 }
 0x186   :  { %v2644_v33 = vpop.f32.mrf.mxu0 }
 0x187   :  { %v3349_v35 = vadd.f32 %v2736_v26, %v1498_v30  ;;  %v2645_v37 = vadd.f32 %v2644_v33, %v2643_v34  ;;  %v2738_v38 = vpop.f32.mrf.mxu1 }
 0x188   :  { %v2739_v39 = vadd.f32 %v2738_v38, %v2737_v32  ;;  %v2646_v41 = vpop.f32.mrf.mxu0 }
 0x189   :  { %v1722_v42 = vadd.f32 %v1721_v29, %v3349_v35  ;;  %v1501_v43 = vadd.f32 %v2645_v37, %v3292_v55  ;;  %v2740_v45 = vpop.f32.mrf.mxu1 }
 0x18a   :  { %v2647_v47 = vpop.f32.mrf.mxu0 }
 0x18b   :  { %v3353_v49 = vadd.f32 %v2739_v39, %v1501_v43  ;;  %v2648_v51 = vadd.f32 %v2647_v47, %v2646_v41  ;;  %v2741_v53 = vpop.f32.mrf.mxu1 }
 0x18c   :  { %v2742_v54 = vadd.f32 %v2741_v53, %v2740_v45  ;;  %v2649_v48 = vpop.f32.mrf.mxu0 }
 0x18d   :  { %v1723_v56 = vadd.f32 %v1722_v42, %v3353_v49  ;;  %v1506_v57 = vadd.f32 %v2648_v51, %v3294_v62  ;;  %v2743_v61 = vpop.f32.mrf.mxu1 }
 0x18e   :  { %v2650_v63 = vpop.f32.mrf.mxu0 }
 0x18f   :  { %v3357_v0 = vadd.f32 %v2742_v54, %v1506_v57  ;;  %v2651_v1 = vadd.f32 %v2650_v63, %v2649_v48  ;;  %v2744_v20 = vpop.f32.mrf.mxu1 }
 0x190   :  { %v2745_v2 = vadd.f32 %v2744_v20, %v2743_v61  ;;  %v2652_v55 = vpop.f32.mrf.mxu0 }
 0x191   :  { %v1724_v3 = vadd.f32 %v1723_v56, %v3357_v0  ;;  %v1509_v7 = vadd.f32 %v2651_v1, %v3296_v5  ;;  %v2746_v9 = vpop.f32.mrf.mxu1 }
 0x192   :  { %v2653_v10 = vpop.f32.mrf.mxu0 }
 0x193   :  { %v3361_v27 = vadd.f32 %v2745_v2, %v1509_v7  ;;  %v2654_v11 = vadd.f32 %v2653_v10, %v2652_v55  ;;  %v2747_v14 = vpop.f32.mrf.mxu1 }
 0x194   :  { %v2748_v16 = vadd.f32 %v2747_v14, %v2746_v9  ;;  %v2655_v62 = vpop.f32.mrf.mxu0 }
 0x195   :  { %v1725_v17 = vadd.f32 %v1724_v3, %v3361_v27  ;;  %v1514_v18 = vadd.f32 %v2654_v11, %v3298_v12  ;;  %v2749_v23 = vpop.f32.mrf.mxu1 }
 0x196   :  { %v2656_v24 = vpop.f32.mrf.mxu0 }
 0x197   :  { %v3365_v26 = vadd.f32 %v2748_v16, %v1514_v18  ;;  %v2657_v34 = vadd.f32 %v2656_v24, %v2655_v62  ;;  %v2750_v29 = vpop.f32.mrf.mxu1 }
 0x198   :  { %v2751_v30 = vadd.f32 %v2750_v29, %v2749_v23  ;;  %v2658_v5 = vpop.f32.mrf.mxu0 }
 0x199   :  { %v1726_v32 = vadd.f32 %v1725_v17, %v3365_v26  ;;  %v1517_v33 = vadd.f32 %v2657_v34, %v3300_v19  ;;  %v2752_v37 = vpop.f32.mrf.mxu1 }
 0x19a   :  { %v2659_v38 = vpop.f32.mrf.mxu0 }
 0x19b   :  { %v3369_v39 = vadd.f32 %v2751_v30, %v1517_v33  ;;  %v2660_v41 = vadd.f32 %v2659_v38, %v2658_v5  ;;  %v2753_v42 = vpop.f32.mrf.mxu1 }
 0x19c   :  { %v2754_v43 = vadd.f32 %v2753_v42, %v2752_v37  ;;  %v2661_v12 = vpop.f32.mrf.mxu0 }
 0x19d   :  { %v1727_v45 = vadd.f32 %v1726_v32, %v3369_v39  ;;  %v1522_v47 = vadd.f32 %v2660_v41, %v3302_v28  ;;  %v2755_v51 = vpop.f32.mrf.mxu1 }
 0x19e   :  { %v2662_v53 = vpop.f32.mrf.mxu0 }
 0x19f   :  { %v3373_v54 = vadd.f32 %v2754_v43, %v1522_v47  ;;  %v2663_v48 = vadd.f32 %v2662_v53, %v2661_v12  ;;  %v2756_v56 = vpop.f32.mrf.mxu1 }
 0x1a0   :  { %v2757_v57 = vadd.f32 %v2756_v56, %v2755_v51  ;;  %v2664_v19 = vpop.f32.mrf.mxu0 }
 0x1a1   :  { %v1728_v61 = vadd.f32 %v1727_v45, %v3373_v54  ;;  %v1525_v63 = vadd.f32 %v2663_v48, %v3304_v36  ;;  %v2758_v1 = vpop.f32.mrf.mxu1 }
 0x1a2   :  { %v2665_v20 = vpop.f32.mrf.mxu0 }
 0x1a3   :  { %v3377_v2 = vadd.f32 %v2757_v57, %v1525_v63  ;;  %v2666_v55 = vadd.f32 %v2665_v20, %v2664_v19  ;;  %v2759_v3 = vpop.f32.mrf.mxu1 }
 0x1a4   :  { %v2667_v7 = vpop.f32.mrf.mxu0  ;;  %v2760_v10 = vadd.f32 %v2759_v3, %v2758_v1 }
 0x1a5   :  { %v1729_v28 = vadd.f32 %v1728_v61, %v3377_v2  ;;  %v1530_v9 = vadd.f32 %v2666_v55, %v3306_v44  ;;  %v2761_v11 = vpop.f32.mrf.mxu1 }
 0x1a6   :  { %v2668_v14 = vpop.f32.mrf.mxu0 }
 0x1a7   :  { %v3381_v16 = vadd.f32 %v2760_v10, %v1530_v9  ;;  %v2669_v62 = vadd.f32 %v2668_v14, %v2667_v7  ;;  %v2762_v17 = vpop.f32.mrf.mxu1 }
 0x1a8   :  { %v2670_v18 = vpop.f32.mrf.mxu0  ;;  %v2763_v24 = vadd.f32 %v2762_v17, %v2761_v11 }
 0x1a9   :  { %v1730_v36 = vadd.f32 %v1729_v28, %v3381_v16  ;;  %v1533_v23 = vadd.f32 %v2669_v62, %v3308_v52  ;;  %v2764_v34 = vpop.f32.mrf.mxu1 }
 0x1aa   :  { %v2671_v29 = vpop.f32.mrf.mxu0 }
 0x1ab   :  { %v3385_v30 = vadd.f32 %v2763_v24, %v1533_v23  ;;  %v2672_v5 = vadd.f32 %v2671_v29, %v2670_v18  ;;  %v2765_v32 = vpop.f32.mrf.mxu1 }
 0x1ac   :  { %v2673_v44 = vpop.f32.mrf.mxu0  ;;  %v2766_v38 = vadd.f32 %v2765_v32, %v2764_v34 }
 0x1ad   :  { %v1731_v33 = vadd.f32 %v1730_v36, %v3385_v30  ;;  %v1538_v37 = vadd.f32 %v2672_v5, %v3310_v60  ;;  %v2767_v41 = vpop.f32.mrf.mxu1 }
 0x1ae   :  { %v2674_v42 = vpop.f32.mrf.mxu0 }
 0x1af   :  { %v3389_v43 = vadd.f32 %v2766_v38, %v1538_v37  ;;  %v2675_v12 = vadd.f32 %v2674_v42, %v2673_v44  ;;  %v2768_v45 = vpop.f32.mrf.mxu1 }
 0x1b0   :  { %v2676_v52 = vpop.f32.mrf.mxu0  ;;  %v2769_v53 = vadd.f32 %v2768_v45, %v2767_v41 }
 0x1b1   :  { %v1732_v47 = vadd.f32 %v1731_v33, %v3389_v43  ;;  %v1541_v51 = vadd.f32 %v2675_v12, %v3312_v4  ;;  %v2770_v48 = vpop.f32.mrf.mxu1 }
 0x1b2   :  { %v2677_v56 = vpop.f32.mrf.mxu0 }
 0x1b3   :  { %v3393_v57 = vadd.f32 %v2769_v53, %v1541_v51  ;;  %v2678_v19 = vadd.f32 %v2677_v56, %v2676_v52  ;;  %v2771_v61 = vpop.f32.mrf.mxu1 }
 0x1b4   :  { %v2679_v60 = vpop.f32.mrf.mxu0  ;;  %v2772_v20 = vadd.f32 %v2771_v61, %v2770_v48 }
 0x1b5   :  { %v1733_v63 = vadd.f32 %v1732_v47, %v3393_v57  ;;  %v1546_v1 = vadd.f32 %v2678_v19, %v3314_v13  ;;  %v2773_v55 = vpop.f32.mrf.mxu1 }
 0x1b6   :  { %v2680_v3 = vpop.f32.mrf.mxu0 }
 0x1b7   :  { %v3397_v7 = vadd.f32 %v2772_v20, %v1546_v1  ;;  %v2681_v28 = vadd.f32 %v2680_v3, %v2679_v60  ;;  %v2774_v9 = vpop.f32.mrf.mxu1 }
 0x1b8   :  { %v2682_v4 = vpop.f32.mrf.mxu0  ;;  %v2775_v14 = vadd.f32 %v2774_v9, %v2773_v55 }
 0x1b9   :  { %v1734_v10 = vadd.f32 %v1733_v63, %v3397_v7  ;;  %v1549_v11 = vadd.f32 %v2681_v28, %v3316_v22  ;;  %v2776_v62 = vpop.f32.mrf.mxu1 }
 0x1ba   :  { %v2683_v17 = vpop.f32.mrf.mxu0 }
 0x1bb   :  { %v3401_v18 = vadd.f32 %v2775_v14, %v1549_v11  ;;  %v2684_v36 = vadd.f32 %v2683_v17, %v2682_v4  ;;  %v2777_v23 = vpop.f32.mrf.mxu1 }
 0x1bc   :  { %v2685_v13 = vpop.f32.mrf.mxu0  ;;  %v2778_v29 = vadd.f32 %v2777_v23, %v2776_v62 }
 0x1bd   :  { %v1735_v24 = vadd.f32 %v1734_v10, %v3401_v18  ;;  %v1554_v34 = vadd.f32 %v2684_v36, %v3318_v31  ;;  %v2779_v5 = vpop.f32.mrf.mxu1 }
 0x1be   :  { %v2686_v32 = vpop.f32.mrf.mxu0 }
 0x1bf   :  { %v3405_v44 = vadd.f32 %v2778_v29, %v1554_v34  ;;  %v2687_v33 = vadd.f32 %v2686_v32, %v2685_v13  ;;  %v2780_v37 = vpop.f32.mrf.mxu1 }
 0x1c0   :  { %v2688_v22 = vpop.f32.mrf.mxu0  ;;  %v2781_v42 = vadd.f32 %v2780_v37, %v2779_v5 }
 0x1c1   :  { %v1736_v38 = vadd.f32 %v1735_v24, %v3405_v44  ;;  %v1557_v41 = vadd.f32 %v2687_v33, %v3320_v40  ;;  %v2782_v12 = vpop.f32.mrf.mxu1 }
 0x1c2   :  { %v2689_v45 = vpop.f32.mrf.mxu0 }
 0x1c3   :  { %v3409_v52 = vadd.f32 %v2781_v42, %v1557_v41  ;;  %v2690_v47 = vadd.f32 %v2689_v45, %v2688_v22  ;;  %v2783_v51 = vpop.f32.mrf.mxu1 }
 0x1c4   :  { %v2691_v31 = vpop.f32.mrf.mxu0  ;;  %v2784_v56 = vadd.f32 %v2783_v51, %v2782_v12 }
 0x1c5   :  { %v1737_v53 = vadd.f32 %v1736_v38, %v3409_v52  ;;  %v1562_v48 = vadd.f32 %v2690_v47, %v3322_v50  ;;  %v2785_v19 = vpop.f32.mrf.mxu1 }
 0x1c6   :  { %v2692_v61 = vpop.f32.mrf.mxu0 }
 0x1c7   :  { %v3413_v60 = vadd.f32 %v2784_v56, %v1562_v48  ;;  %v2693_v63 = vadd.f32 %v2692_v61, %v2691_v31  ;;  %v2786_v1 = vpop.f32.mrf.mxu1 }
 0x1c8   :  { %v2694_v40 = vpop.f32.mrf.mxu0  ;;  %v2787_v3 = vadd.f32 %v2786_v1, %v2785_v19 }
 0x1c9   :  { %v1738_v20 = vadd.f32 %v1737_v53, %v3413_v60  ;;  %v1565_v55 = vadd.f32 %v2693_v63, %v3324_v59  ;;  %v2788_v28 = vpop.f32.mrf.mxu1 }
 0x1ca   :  { %v2695_v9 = vpop.f32.mrf.mxu0 }
 0x1cb   :  { %v1701_v4 = vadd.f32 %v2787_v3, %v1565_v55  ;;  %v2696_v10 = vadd.f32 %v2695_v9, %v2694_v40  ;;  %v2789_v11 = vpop.f32.mrf.mxu1 }
 0x1cc   :  { %v2697_v14 = vpop.f32.mrf.mxu0  ;;  %v2790_v17 = vadd.f32 %v2789_v11, %v2788_v28 }
 0x1cd   :  { %v1739_v50 = vadd.f32 %v1738_v20, %v1701_v4  ;;  %v1570_v62 = vadd.f32 %v2696_v10, %v3326_v6  ;;  %v2791_v36 = vpop.f32.mrf.mxu1 }
 0x1ce   :  { %v2698_v23 = vpop.f32.mrf.mxu0 }
 0x1cf   :  { %v1706_v13 = vadd.f32 %v2790_v17, %v1570_v62  ;;  %v2699_v24 = vadd.f32 %v2698_v23, %v2697_v14  ;;  %v2792_v34 = vpop.f32.mrf.mxu1 }
 0x1d0   :  { %v2700_v29 = vpop.f32.mrf.mxu0  ;;  %v2793_v32 = vadd.f32 %v2792_v34, %v2791_v36 }
 0x1d1   :  { %v1740_v5 = vadd.f32 %v1739_v50, %v1706_v13  ;;  %v1573_v59 = vadd.f32 %v2699_v24, %v3328_v15  ;;  %v2794_v33 = vpop.f32.mrf.mxu1 }
 0x1d2   :  { %v2701_v37 = vpop.f32.mrf.mxu0 }
 0x1d3   :  { %v1709_v22 = vadd.f32 %v2793_v32, %v1573_v59  ;;  %v2702_v38 = vadd.f32 %v2701_v37, %v2700_v29  ;;  %v2795_v41 = vpop.f32.mrf.mxu1 }
 0x1d4   :  { %v2703_v42 = vpop.f32.mrf.mxu0  ;;  %v2796_v45 = vadd.f32 %v2795_v41, %v2794_v33 }
 0x1d5   :  { %v1741_v12 = vadd.f32 %v1740_v5, %v1709_v22  ;;  %v1578_v6 = vadd.f32 %v2702_v38, %v3330_v25  ;;  %v2797_v47 = vpop.f32.mrf.mxu1 }
 0x1d6   :  { %v2704_v51 = vpop.f32.mrf.mxu0 }
 0x1d7   :  { %v1714_v31 = vadd.f32 %v2796_v45, %v1578_v6  ;;  %v2798_v53 = vpop.f32.mrf.mxu1 }
 0x1d9   :  { %v1743_v48 = vsel %vm1742_vm0, %v1714_v31, 0.0 }
 0x1da   :  { %v1744_v56 = vadd.f32 %v1743_v48, %v1741_v12 }
 0x1dc   :  { %v1745_v15 = vrot.slane %v1744_v56, 4 }
 0x1de   :  { %v1746_v19 = vadd.f32 %v1745_v15, %v1744_v56 }
 0x1e0   :  { %v1747_v61 = vrot.slane %v1746_v19, 2 }
 0x1e2   :  { %v1748_v63 = vadd.f32 %v1747_v61, %v1746_v19 }
 0x1e4   :  { %v1749_v1 = vrot.slane %v1748_v63, 1 }
 0x1e6   :  { %v1750_v40 = vadd.f32 %v1749_v1, %v1748_v63 }
 0x1e8   :  { %v1752_v20 = vmul.f32 0.0051020407, %v1750_v40 }
 0x1ea   :  { %v3422_v55 = vsub.f32 %v3333_v46, %v1752_v20  ;;  %v3425_v25 = vsub.f32 %v3336_v58, %v1752_v20  ;;  %v3428_v3 = vsub.f32 %v3341_v8, %v1752_v20  ;;  %v3431_v28 = vsub.f32 %v3345_v21, %v1752_v20 }
 0x1eb   :  { %v3434_v9 = vsub.f32 %v3349_v35, %v1752_v20  ;;  %v3437_v10 = vsub.f32 %v3353_v49, %v1752_v20  ;;  %v3440_v11 = vsub.f32 %v3357_v0, %v1752_v20  ;;  %v3443_v46 = vsub.f32 %v3361_v27, %v1752_v20 }
 0x1ec   :  { %v3446_v58 = vsub.f32 %v3365_v26, %v1752_v20  ;;  %v3449_v8 = vsub.f32 %v3369_v39, %v1752_v20  ;;  %v3452_v21 = vsub.f32 %v3373_v54, %v1752_v20  ;;  %v3455_v35 = vsub.f32 %v3377_v2, %v1752_v20 }
 0x1ed   :  { %v3458_v49 = vsub.f32 %v3381_v16, %v1752_v20  ;;  %v3461_v0 = vsub.f32 %v3385_v30, %v1752_v20  ;;  %v3464_v27 = vsub.f32 %v3389_v43, %v1752_v20  ;;  %v3467_v26 = vsub.f32 %v3393_v57, %v1752_v20 }
 0x1ee   :  { %v3470_v39 = vsub.f32 %v3397_v7, %v1752_v20  ;;  %v3473_v54 = vsub.f32 %v3401_v18, %v1752_v20  ;;  %v3476_v2 = vsub.f32 %v3405_v44, %v1752_v20  ;;  %v3479_v16 = vsub.f32 %v3409_v52, %v1752_v20 }
 0x1ef   :  { %v3482_v30 = vsub.f32 %v3413_v60, %v1752_v20  ;;  %v3484_v43 = vsub.f32 %v1701_v4, %v1752_v20  ;;  %v3486_v14 = vsub.f32 %v1706_v13, %v1752_v20  ;;  %v3488_v57 = vsub.f32 %v1709_v22, %v1752_v20 }
 0x1f0   :  { %v3490_v7 = vsub.f32 %v1714_v31, %v1752_v20  ;;  %v1778_v18 = vmul.f32 %v3422_v55, %v3422_v55  ;;  %v1779_v44 = vmul.f32 %v3425_v25, %v3425_v25  ;;  %v1780_v52 = vmul.f32 %v3428_v3, %v3428_v3 }
 0x1f1   :  { %v1781_v50 = vmul.f32 %v3431_v28, %v3431_v28  ;;  %v1782_v36 = vmul.f32 %v3434_v9, %v3434_v9  ;;  %v1783_v13 = vmul.f32 %v3437_v10, %v3437_v10  ;;  %v1784_v34 = vmul.f32 %v3440_v11, %v3440_v11 }
 0x1f2   :  { %v1802_v60 = vmul.f32 %v3490_v7, %v3490_v7  ;;  %v1803_v4 = vadd.f32 %v1779_v44, %v1778_v18  ;;  %v1785_v5 = vmul.f32 %v3443_v46, %v3443_v46  ;;  %v1786_v32 = vmul.f32 %v3446_v58, %v3446_v58 }
 0x1f3   :  { %v1787_v37 = vmul.f32 %v3449_v8, %v3449_v8  ;;  %v1788_v38 = vmul.f32 %v3452_v21, %v3452_v21  ;;  %v1789_v42 = vmul.f32 %v3455_v35, %v3455_v35  ;;  %v1790_v6 = vmul.f32 %v3458_v49, %v3458_v49 }
 0x1f4   :  { %v1804_v62 = vadd.f32 %v1803_v4, %v1780_v52  ;;  %v1826_v17 = vsel %vm1742_vm0, %v1802_v60, 0.0  ;;  %v1791_v47 = vmul.f32 %v3461_v0, %v3461_v0  ;;  %v1792_v31 = vmul.f32 %v3464_v27, %v3464_v27 }
 0x1f5   :  { %v1793_v48 = vmul.f32 %v3467_v26, %v3467_v26  ;;  %v1794_v15 = vmul.f32 %v3470_v39, %v3470_v39  ;;  %v1795_v61 = vmul.f32 %v3473_v54, %v3473_v54  ;;  %v1796_v1 = vmul.f32 %v3476_v2, %v3476_v2 }
 0x1f6   :  { %v1805_v23 = vadd.f32 %v1804_v62, %v1781_v50  ;;  %v1797_v20 = vmul.f32 %v3479_v16, %v3479_v16  ;;  %v1798_v44 = vmul.f32 %v3482_v30, %v3482_v30  ;;  %v1799_v60 = vmul.f32 %v3484_v43, %v3484_v43 }
 0x1f7   :  { %v1800_v50 = vmul.f32 %v3486_v14, %v3486_v14 }
 0x1f8   :  { %v1806_v24 = vadd.f32 %v1805_v23, %v1782_v36  ;;  %v1801_v36 = vmul.f32 %v3488_v57, %v3488_v57 }
 0x1fa   :  { %v1807_v29 = vadd.f32 %v1806_v24, %v1783_v13 }
 0x1fc   :  { %v1808_v59 = vadd.f32 %v1807_v29, %v1784_v34 }
 0x1fe   :  { %v1809_v33 = vadd.f32 %v1808_v59, %v1785_v5 }
 0x200   :  { %v1810_v22 = vadd.f32 %v1809_v33, %v1786_v32 }
 0x202   :  { %v1811_v41 = vadd.f32 %v1810_v22, %v1787_v37 }
 0x204   :  { %v1812_v12 = vadd.f32 %v1811_v41, %v1788_v38 }
 0x206   :  { %v1813_v45 = vadd.f32 %v1812_v12, %v1789_v42 }
 0x208   :  { %v1814_v51 = vadd.f32 %v1813_v45, %v1790_v6 }
 0x20a   :  { %v1815_v53 = vadd.f32 %v1814_v51, %v1791_v47 }
 0x20c   :  { %v1816_v56 = vadd.f32 %v1815_v53, %v1792_v31 }
 0x20e   :  { %v1817_v19 = vadd.f32 %v1816_v56, %v1793_v48  ;;  %v2301_v48 = vld [vmem:[#allocation4] ss:$0 sm:$0xff] }
 0x210   :  { %v1818_v63 = vadd.f32 %v1817_v19, %v1794_v15 }
 0x212   :  { %v1819_v40 = vadd.f32 %v1818_v63, %v1795_v61 }
 0x214   :  { %v1820_v18 = vadd.f32 %v1819_v40, %v1796_v1 }
 0x216   :  { %v1821_v52 = vadd.f32 %v1820_v18, %v1797_v20 }
 0x218   :  { %v1822_v4 = vadd.f32 %v1821_v52, %v1798_v44 }
 0x21a   :  { %v1823_v62 = vadd.f32 %v1822_v4, %v1799_v60 }
 0x21c   :  { %v1824_v23 = vadd.f32 %v1823_v62, %v1800_v50 }
 0x21e   :  { %v1825_v13 = vadd.f32 %v1824_v23, %v1801_v36 }
 0x220   :  { %v1827_v24 = vadd.f32 %v1826_v17, %v1825_v13 }
 0x222   :  { %v1828_v34 = vrot.slane %v1827_v24, 4 }
 0x224   :  { %v1829_v29 = vadd.f32 %v1828_v34, %v1827_v24 }
 0x226   :  { %v1830_v5 = vrot.slane %v1829_v29, 2 }
 0x228   :  { %v1831_v59 = vadd.f32 %v1830_v5, %v1829_v29 }
 0x22a   :  { %v1832_v32 = vrot.slane %v1831_v59, 1 }
 0x22c   :  { %v1833_v33 = vadd.f32 %v1832_v32, %v1831_v59 }
 0x22e   :  { %v1834_v37 = vmul.f32 0.0051020407, %v1833_v33 }
 0x230   :  { %v1835_v22 = vadd.f32 1e-05, %v1834_v37 }
 0x232   :  { %2877 = vrsqrt.f32 %v1835_v22 }
 0x23f   :  { %v2878_v38 = vpop.eup %2877 }
 0x240   :  { %v1837_v41 = vmul.f32 %v2878_v38, %v3422_v55  ;;  %v1838_v42 = vmul.f32 %v2878_v38, %v3425_v25  ;;  %v1839_v12 = vmul.f32 %v2878_v38, %v3428_v3  ;;  %v1840_v6 = vmul.f32 %v2878_v38, %v3431_v28 }
 0x241   :  { %v1841_v17 = vmul.f32 %v2878_v38, %v3434_v9  ;;  %v1842_v45 = vmul.f32 %v2878_v38, %v3437_v10  ;;  %v1843_v47 = vmul.f32 %v2878_v38, %v3440_v11  ;;  %v1847_v51 = vmul.f32 %v2878_v38, %v3452_v21 }
 0x242   :  { %v1848_v31 = vmul.f32 %v2878_v38, %v3455_v35  ;;  %v1849_v53 = vmul.f32 %v2878_v38, %v3458_v49  ;;  %v1850_v55 = vmul.f32 %v2878_v38, %v3461_v0  ;;  %v1851_v25 = vmul.f32 %v2878_v38, %v3464_v27 }
 0x243   :  { %v1852_v3 = vmul.f32 %v2878_v38, %v3467_v26  ;;  %v1853_v28 = vmul.f32 %v2878_v38, %v3470_v39  ;;  %v1854_v9 = vmul.f32 %v2878_v38, %v3473_v54  ;;  %v1855_v10 = vmul.f32 %v2878_v38, %v3476_v2 }
 0x244   :  { %v1856_v11 = vmul.f32 %v2878_v38, %v3479_v16  ;;  %v1857_v21 = vmul.f32 %v2878_v38, %v3482_v30  ;;  %v1858_v35 = vmul.f32 %v2878_v38, %v3484_v43  ;;  %v1859_v49 = vmul.f32 %v2878_v38, %v3486_v14 }
 0x245   :  { %v1860_v0 = vmul.f32 %v2878_v38, %v3488_v57  ;;  %v1844_v27 = vmul.f32 %v2878_v38, %v3443_v46  ;;  %v1845_v26 = vmul.f32 %v2878_v38, %v3446_v58  ;;  %v1846_v39 = vmul.f32 %v2878_v38, %v3449_v8  ;;  %v2302_v58 = vld [vmem:[#allocation6] ss:$0 sm:$0xff] }
 0x246   :  { %v1861_v54 = vmul.f32 %v2878_v38, %v3490_v7  ;;  %v1869_v2 = vmul.f32 %v2301_v48, %v1837_v41  ;;  %v1870_v56 = vmul.f32 %v2301_v48, %v1838_v42  ;;  %v1871_v16 = vmul.f32 %v2301_v48, %v1839_v12 }
 0x247   :  { %v1872_v15 = vmul.f32 %v2301_v48, %v1840_v6  ;;  %v1873_v30 = vmul.f32 %v2301_v48, %v1841_v17  ;;  %v1874_v19 = vmul.f32 %v2301_v48, %v1842_v45  ;;  %v1875_v43 = vmul.f32 %v2301_v48, %v1843_v47 }
 0x248   :  { %v1876_v61 = vmul.f32 %v2301_v48, %v1844_v27  ;;  %v1877_v14 = vmul.f32 %v2301_v48, %v1845_v26  ;;  %v1878_v63 = vmul.f32 %v2301_v48, %v1846_v39  ;;  %v1879_v57 = vmul.f32 %v2301_v48, %v1847_v51 }
 0x249   :  { %v1880_v1 = vmul.f32 %v2301_v48, %v1848_v31  ;;  %v1881_v40 = vmul.f32 %v2301_v48, %v1849_v53  ;;  %v1882_v46 = vmul.f32 %v2301_v48, %v1850_v55  ;;  %v1883_v20 = vmul.f32 %v2301_v48, %v1851_v25 }
 0x24a   :  { %v1884_v18 = vmul.f32 %v2301_v48, %v1852_v3  ;;  %v1885_v8 = vmul.f32 %v2301_v48, %v1853_v28  ;;  %v1886_v44 = vmul.f32 %v2301_v48, %v1854_v9  ;;  %v1887_v7 = vmul.f32 %v2301_v48, %v1855_v10 }
 0x24b   :  { %v1888_v52 = vmul.f32 %v2301_v48, %v1856_v11  ;;  %v1889_v60 = vmul.f32 %v2301_v48, %v1857_v21  ;;  %v1890_v4 = vmul.f32 %v2301_v48, %v1858_v35  ;;  %v1891_v50 = vmul.f32 %v2301_v48, %v1859_v49 }
 0x24c   :  { %v1892_v62 = vmul.f32 %v2301_v48, %v1860_v0  ;;  %v1893_v36 = vmul.f32 %v2301_v48, %v1861_v54  ;;  %v1901_v23 = vadd.f32 %v2302_v58, %v1869_v2  ;;  %v3568_v13 = vadd.f32 %v2302_v58, %v1870_v56 }
 0x24d   :  { %v3570_v24 = vadd.f32 %v2302_v58, %v1871_v16  ;;  %v3572_v34 = vadd.f32 %v2302_v58, %v1872_v15  ;;  %v3574_v29 = vadd.f32 %v2302_v58, %v1873_v30  ;;  %v3576_v5 = vadd.f32 %v2302_v58, %v1874_v19 }
 0x24e   :  { %v3578_v59 = vadd.f32 %v2302_v58, %v1875_v43  ;;  %v3580_v32 = vadd.f32 %v2302_v58, %v1876_v61  ;;  %v3582_v33 = vadd.f32 %v2302_v58, %v1877_v14  ;;  %v3584_v37 = vadd.f32 %v2302_v58, %v1878_v63 }
 0x24f   :  { %v3586_v22 = vadd.f32 %v2302_v58, %v1879_v57  ;;  %v3588_v38 = vadd.f32 %v2302_v58, %v1880_v1  ;;  %v3590_v41 = vadd.f32 %v2302_v58, %v1881_v40  ;;  %v3592_v42 = vadd.f32 %v2302_v58, %v1882_v46 }
 0x250   :  { %v3594_v12 = vadd.f32 %v2302_v58, %v1883_v20  ;;  %v3596_v6 = vadd.f32 %v2302_v58, %v1884_v18  ;;  %v3598_v17 = vadd.f32 %v2302_v58, %v1885_v8  ;;  %v3600_v45 = vadd.f32 %v2302_v58, %v1886_v44 }
 0x251   :  { %v3602_v47 = vadd.f32 %v2302_v58, %v1887_v7  ;;  %v3604_v51 = vadd.f32 %v2302_v58, %v1888_v52  ;;  %v3606_v31 = vadd.f32 %v2302_v58, %v1889_v60  ;;  %v3608_v53 = vadd.f32 %v2302_v58, %v1890_v4 }
 0x252   :  { %v3610_v55 = vadd.f32 %v2302_v58, %v1891_v50  ;;  %v3612_v25 = vadd.f32 %v2302_v58, %v1892_v62  ;;  %v3614_v3 = vadd.f32 %v2302_v58, %v1893_v36  ;;  %vm1926_vm1 = vcmp.gt.f32.partialorder %v1901_v23, 0.0 }
 0x253   :  { %vm1927_vm2 = vcmp.gt.f32.partialorder %v3568_v13, 0.0  ;;  %vm1928_vm3 = vcmp.gt.f32.partialorder %v3570_v24, 0.0  ;;  %vm1929_vm4 = vcmp.gt.f32.partialorder %v3572_v34, 0.0  ;;  %vm1930_vm5 = vcmp.gt.f32.partialorder %v3574_v29, 0.0 }
 0x254   :  { %vm1931_vm6 = vcmp.gt.f32.partialorder %v3576_v5, 0.0  ;;  %vm1937_vm12 = vcmp.gt.f32.partialorder %v3588_v38, 0.0  ;;  %vm1938_vm13 = vcmp.gt.f32.partialorder %v3590_v41, 0.0  ;;  %vm1943_vm8 = vcmp.gt.f32.partialorder %v3600_v45, 0.0 }
 0x255   :  { %vm1944_vm9 = vcmp.gt.f32.partialorder %v3602_v47, 0.0  ;;  %vm1945_vm10 = vcmp.gt.f32.partialorder %v3604_v51, 0.0  ;;  %vm1946_vm11 = vcmp.gt.f32.partialorder %v3606_v31, 0.0  ;;  %v1951_v28 = vmul.f32 0.1, %v1901_v23 }
 0x256   :  { %v1952_v9 = vmul.f32 0.1, %v3568_v13  ;;  %v1953_v10 = vmul.f32 0.1, %v3570_v24  ;;  %vm1947_vm14 = vcmp.gt.f32.partialorder %v3608_v53, 0.0  ;;  %vm1948_vm15 = vcmp.gt.f32.partialorder %v3610_v55, 0.0 }
 0x257   :  { %vm1949_vm0 = vcmp.gt.f32.partialorder %v3612_v25, 0.0  ;;  %vm1950_vm7 = vcmp.gt.f32.partialorder %v3614_v3, 0.0  ;;  %v1954_v11 = vmul.f32 0.1, %v3572_v34  ;;  %v1955_v21 = vmul.f32 0.1, %v3574_v29 }
 0x258   :  { %v1956_v35 = vmul.f32 0.1, %v3576_v5  ;;  %v1957_v49 = vmul.f32 0.1, %v3578_v59  ;;  %v1958_v0 = vmul.f32 0.1, %v3580_v32  ;;  %v1976_v27 = vsel %vm1926_vm1, %v1901_v23, %v1951_v28 }
 0x259   :  { %v1959_v48 = vmul.f32 0.1, %v3582_v33  ;;  %v1960_v26 = vmul.f32 0.1, %v3584_v37  ;;  %v1961_v39 = vmul.f32 0.1, %v3586_v22  ;;  %v1977_v2 = vsel %vm1927_vm2, %v3568_v13, %v1952_v9 }
 0x25a   :  { %v1962_v54 = vmul.f32 0.1, %v3588_v38  ;;  %v1963_v56 = vmul.f32 0.1, %v3590_v41  ;;  %v1964_v16 = vmul.f32 0.1, %v3592_v42  ;;  %v1978_v30 = vsel %vm1928_vm3, %v3570_v24, %v1953_v10 }
 0x25b   :  { %v1965_v15 = vmul.f32 0.1, %v3594_v12  ;;  %v1966_v19 = vmul.f32 0.1, %v3596_v6  ;;  %v1967_v43 = vmul.f32 0.1, %v3598_v17  ;;  %v1979_v14 = vsel %vm1929_vm4, %v3572_v34, %v1954_v11 }
 0x25c   :  { %v1968_v61 = vmul.f32 0.1, %v3600_v45  ;;  %v1969_v63 = vmul.f32 0.1, %v3602_v47  ;;  %v1970_v57 = vmul.f32 0.1, %v3604_v51  ;;  %v1980_v40 = vsel %vm1930_vm5, %v3574_v29, %v1955_v21 }
 0x25d   :  { %v1971_v1 = vmul.f32 0.1, %v3606_v31  ;;  %v1972_v46 = vmul.f32 0.1, %v3608_v53  ;;  %v1973_v20 = vmul.f32 0.1, %v3610_v55  ;;  %v1981_v18 = vsel %vm1931_vm6, %v3576_v5, %v1956_v35 }
 0x25e   :  { %v1974_v58 = vmul.f32 0.1, %v3612_v25  ;;  %v1975_v8 = vmul.f32 0.1, %v3614_v3  ;;  %vm3781_vm1 = vcmp.gt.f32.partialorder %v3578_v59, 0.0  ;;  %vm3782_vm2 = vcmp.gt.f32.partialorder %v3580_v32, 0.0 }
 0x25f   :  { %v1982_v44 = vsel %vm3781_vm1, %v3578_v59, %v1957_v49  ;;  %v1983_v7 = vsel %vm3782_vm2, %v3580_v32, %v1958_v0  ;;  %vm3783_vm3 = vcmp.gt.f32.partialorder %v3582_v33, 0.0  ;;  %vm3784_vm4 = vcmp.gt.f32.partialorder %v3584_v37, 0.0 }
 0x260   :  { %v1984_v52 = vsel %vm3783_vm3, %v3582_v33, %v1959_v48  ;;  %v1985_v60 = vsel %vm3784_vm4, %v3584_v37, %v1960_v26  ;;  %vm3785_vm5 = vcmp.gt.f32.partialorder %v3586_v22, 0.0  ;;  %v1987_v50 = vsel %vm1937_vm12, %v3588_v38, %v1962_v54 }
 0x261   :  { %v1986_v4 = vsel %vm3785_vm5, %v3586_v22, %v1961_v39  ;;  %v1988_v62 = vsel %vm1938_vm13, %v3590_v41, %v1963_v56  ;;  %vm3786_vm6 = vcmp.gt.f32.partialorder %v3592_v42, 0.0  ;;  %vm3787_vm1 = vcmp.gt.f32.partialorder %v3594_v12, 0.0 }
 0x262   :  { %v1989_v36 = vsel %vm3786_vm6, %v3592_v42, %v1964_v16  ;;  %v1990_v23 = vsel %vm3787_vm1, %v3594_v12, %v1965_v15  ;;  %vm3788_vm2 = vcmp.gt.f32.partialorder %v3596_v6, 0.0  ;;  %vm3789_vm3 = vcmp.gt.f32.partialorder %v3598_v17, 0.0 }
 0x263   :  { %v1991_v13 = vsel %vm3788_vm2, %v3596_v6, %v1966_v19  ;;  %v1992_v24 = vsel %vm3789_vm3, %v3598_v17, %v1967_v43  ;;  %v1993_v34 = vsel %vm1943_vm8, %v3600_v45, %v1968_v61  ;;  %v1994_v29 = vsel %vm1944_vm9, %v3602_v47, %v1969_v63 }
 0x264   :  { %v1995_v5 = vsel %vm1945_vm10, %v3604_v51, %v1970_v57  ;;  %v1996_v59 = vsel %vm1946_vm11, %v3606_v31, %v1971_v1  ;;  %v1997_v32 = vsel %vm1947_vm14, %v3608_v53, %v1972_v46  ;;  %v1998_v33 = vsel %vm1948_vm15, %v3610_v55, %v1973_v20 }
 0x265   :  { %v1999_v37 = vsel %vm1949_vm0, %v3612_v25, %v1974_v58  ;;  %v2000_v22 = vsel %vm1950_vm7, %v3614_v3, %v1975_v8  ;;  %v2356_v41 = vpack.c.bf16 %v1977_v2, %v1976_v27  ;;  %v2361_v42 = vpack.c.bf16 %v1979_v14, %v1978_v30 }
 0x266   :  { %v2352_v38 = vpack.c.bf16 %v2000_v22, %v2000_v22  ;;  %v2366_v12 = vpack.c.bf16 %v1981_v18, %v1980_v40  ;;  %v2371_v6 = vpack.c.bf16 %v1983_v7, %v1982_v44  ;;  %v2376_v17 = vpack.c.bf16 %v1985_v60, %v1984_v52 }
 0x267   :  { %v2381_v45 = vpack.c.bf16 %v1987_v50, %v1986_v4  ;;  %v2386_v47 = vpack.c.bf16 %v1989_v36, %v1988_v62  ;;  %2357 = vst [vmem:[%s3780_s4] sm:$0xff] %v2356_v41   ;;  %2413 = vst [vmem:[%s3780_s4 + $0x8] sm:$0xff] %v2361_v42   ;;  %v2391_v51 = vpack.c.bf16 %v1991_v13, %v1990_v23 }
 0x268   :  { %2414 = vst [vmem:[%s3780_s4 + $0x10] sm:$0xff] %v2366_v12   ;;  %v2396_v31 = vpack.c.bf16 %v1993_v34, %v1992_v24  ;;  %v2401_v53 = vpack.c.bf16 %v1995_v5, %v1994_v29  ;;  %v2406_v55 = vpack.c.bf16 %v1997_v32, %v1996_v59  ;;  %2126 = vst [vmem:[%s3780_s4 + $0x60] sm:$0x3] %v2352_v38 }
 0x269   :  { %2415 = vst [vmem:[%s3780_s4 + $0x18] sm:$0xff] %v2371_v6   ;;  %2416 = vst [vmem:[%s3780_s4 + $0x20] sm:$0xff] %v2376_v17   ;;  %v2411_v25 = vpack.c.bf16 %v1999_v37, %v1998_v33 }
 0x26a   :  { %2417 = vst [vmem:[%s3780_s4 + $0x28] sm:$0xff] %v2381_v45   ;;  %2418 = vst [vmem:[%s3780_s4 + $0x30] sm:$0xff] %v2386_v47  }
 0x26b   :  { %2419 = vst [vmem:[%s3780_s4 + $0x38] sm:$0xff] %v2391_v51   ;;  %2420 = vst [vmem:[%s3780_s4 + $0x40] sm:$0xff] %v2396_v31  }
 0x26c   :  { %2421 = vst [vmem:[%s3780_s4 + $0x48] sm:$0xff] %v2401_v53   ;;  %2422 = vst [vmem:[%s3780_s4 + $0x50] sm:$0xff] %v2406_v55  }
 0x26d   :  { %2423 = vst [vmem:[%s3780_s4 + $0x58] sm:$0xff] %v2411_v25  }
 0x26e   :  { %2131 = vsyncpa [#allocation3], 1 }
 0x26f   :  { %2132 = vsyncpa [#allocation5], 1 }

// kernel: shared_network_forward.3
= control target key start
LH: loop header
LB: loop body
LE: loop exit
PB: predicated region body
PF: predicated region fallthrough
CT: control target
= control target key end

     0   :  { %9 = vsyncpa [#allocation3], 0  ;;  %s5626_s0 = inlined_call_operand.vmem [shape: bf16[4,6272], index: 0, kind: input, shape index: {}]   ;;  %s5627_s1 = inlined_call_operand.hbm [shape: bf16[6272,1024], index: 1, kind: input, shape index: {}]   ;;  %s5628_s2 = inlined_call_operand.hbm [shape: f32[1,1024], index: 2, kind: input, shape index: {}]   ;;  %s5629_s3 = inlined_call_operand.hbm [shape: f32[1,1024], index: 3, kind: input, shape index: {}]   ;;  %s5630_s4 = inlined_call_operand.hbm [shape: f32[4,1024], index: 4, kind: output, shape index: {}]  }
   0x1   :  { %11 = vsyncpa [#allocation3 + $0x1], 0 }
   0x2   :  { %12 = vsyncpa [#allocation6], 0 }
   0x3   :  { %13 = vsyncpa [#allocation4], 0  ;;  %s4842_s15 = smov 0   ;;  %s4844_s16 = smov 0  }
   0x4   :  { %s4846_s17 = smov 0   ;;  %s4848_s18 = smov 0  }
   0x5 LB: > { %s4861_s19 = sadd.s32 4294967295, %s4806_s18   ;;  %s4864_s20 = sadd.s32 1, %s4806_s18   ;;  %s4806_s18 = sphi %s4848_s18, %s5649_s18   ;;  %s4802_s17 = sphi %s4846_s17, %s5648_s17   ;;  %s4798_s16 = sphi %s4844_s16, %s5647_s16   ;;  %s4794_s15 = sphi %s4842_s15, %s5646_s15  }
   0x6   : > { %s49_s21 = ssub.s32 %s4806_s18, %s4864_s20  ;;  %s52_s22 = sadd.s32 1, %s4802_s17 }
   0x7   : > { %p50_p0 = scmp.eq.s32.totalorder %s49_s21, 0  ;;  %p59_p1 = scmp.ne.s32.totalorder %s4802_s17, %s4798_s16 }
   0x8   : > { %p60_p2 = scmp.eq.s32.totalorder %s4806_s18, 0  ;;  %p65_p3 = scmp.ne.s32.totalorder %s4798_s16, %s4794_s15 }
   0x9   : > { %s4874_s23 = scalar_select %p50_p0, %s4802_s17, %s52_s22  }
   0xa   : > { %p4876_p4 = por %p60_p2, %p59_p1  ;;  %p5631_p5 = scmp.eq.s32.totalorder %s4861_s19, 0 }
   0xb   : > { %p4097_p6 = scmp.ge.s32.totalorder %s4806_s18, 1  ;;  %p139_p7 = scmp.lt.s32.totalorder %s4806_s18, 8 }
   0xc   : > { %p4885_p8 = por %p5631_p5, %p65_p3  ;;  %s4808_s27 = smov [#allocation5]  }
   0xd   : > { %p4890_p10 = pnand %p4097_p6, %p139_p7  ;;  %s152_s28 = sshll.u32 %s4808_s27, 4  ;;  %s153_s28 = int_to_ptr.vmem [resolvable:$true] %s152_s28 }
   0xe   : > { %s5636_s25 = scalar_select %p4885_p8, 1, 0 }
   0xf   : > { %s5637_s26 = scalar_select %p4890_p10, 1, 0 }
  0x10   : > { %p4580_p11 = pneg %p4890_p10  ;;  %p4593_p12 = scmp.lt.s32.totalorder %s4806_s18, 7 }
  0x11   : > { %s4809_s30 = smov [#allocation7]   ;;  %s183_s7 = sand.u32 1, %s4802_s17  }
  0x12   : > { %p4899_p13 = pnand %p4580_p11, %p5631_p5  ;;  %s163_s5 = sshll.u32 %s4809_s30, 4  ;;  %s164_s5 = int_to_ptr.vmem [resolvable:$true] %s163_s5 }
  0x13   : > { %p4905_p0 = pnand %p4593_p12, %p4876_p4  ;;  %s4671_s8 = scalar_lea.vmem %s153_s28, 128 }
  0x14   : > { %p4662_p1 = pneg %p4899_p13  ;;  %p4672_p2 = scmp.ne.s32.totalorder %s153_s28, %s4671_s8 }
  0x15   : > { %s5639_s6 = scalar_select %p4905_p0, 1, 0 }
  0x16   : > { %p4674_p3 = pnand %p4672_p2, %p4662_p1  ;;  %p4679_p7 = scmp.lt.s32.totalorder %s153_s28, %s153_s28 }
  0x17   : > { %p4680_p11 = scmp.lt.s32.totalorder %s4671_s8, %s4671_s8 }
  0x18   : > { %p4675_p6 = pneg %p4674_p3 }
  0x19   : > { %p4681_p9 = por %p4680_p11, %p4679_p7 }
  0x1b   : > { %p4682_p5 = pnand %p4681_p9, %p4675_p6 }
  0x1d   : > { %4685 = shalt.err (!%p4682_p5)
}
  0x1e   : > { %4583 = dma.hbm_to_vmem [thread:$0]  (!%p4899_p13), %s5628_s2, 128, %s153_s28, [#allocation6]  }
  0x1f   : > { %s4697_s11 = scalar_lea.vmem %s164_s5, 128  ;;  %p4705_p2 = scmp.lt.s32.totalorder %s164_s5, %s164_s5 }
  0x20   : > { %p4698_p4 = scmp.ne.s32.totalorder %s164_s5, %s4697_s11  ;;  %p4706_p3 = scmp.lt.s32.totalorder %s4697_s11, %s4697_s11 }
  0x22   : > { %p4700_p12 = pnand %p4698_p4, %p4662_p1  ;;  %p4707_p10 = por %p4706_p3, %p4705_p2 }
  0x24   : > { %p4701_p8 = pneg %p4700_p12 }
  0x26   : > { %p4708_p0 = pnand %p4707_p10, %p4701_p8 }
  0x28   : > { %4711 = shalt.err (!%p4708_p0)
}
  0x29   : > { %4586 = dma.hbm_to_vmem [thread:$0]  (!%p4899_p13), %s5629_s3, 128, %s164_s5, [#allocation6]  }
  0x2a   : > { %s4564_s14 = smul.u32 3584, %s183_s7  ;;  %s4936_s29 = scalar_lea.sflag [#allocation3], %s183_s7 }
  0x2b   : > { %s4563_s15 = smul.u32 57344, %s4806_s18  ;;  %p5640_p8 = scmp.ne.s32.totalorder %s5639_s6, 0 }
  0x2c   : > { %s187_s27 = scalar_lea.vmem [#allocation2], %s4564_s14  ;;  %s4717_s8 = scalar_lea.hbm %s5627_s1, 401408 }
  0x2d   : > { %s4932_s24 = scalar_lea.hbm %s5627_s1, %s4563_s15  ;;  %s195_s28 = sshll.u32 %s187_s27, 4  ;;  %s4934_s28 = int_to_ptr.vmem [resolvable:$true] %s195_s28 }
  0x2e   : > { %s4712_s30 = scalar_lea.hbm %s4932_s24, 57344  ;;  %p4714_p9 = pneg %p5640_p8 }
  0x2f   : > { %p4713_p5 = scmp.ne.s32.totalorder %s4932_s24, %s4712_s30  ;;  %p4718_p0 = scmp.lt.s32.totalorder %s4932_s24, %s5627_s1 }
  0x30   : > { %p4719_p1 = scmp.lt.s32.totalorder %s4717_s8, %s4712_s30 }
  0x31   : > { %p4715_p10 = pnand %p4714_p9, %p4713_p5 }
  0x32   : > { %p4720_p6 = por %p4719_p1, %p4718_p0 }
  0x33   : > { %p4716_p13 = pneg %p4715_p10 }
  0x35   : > { %p4721_p7 = pnand %p4720_p6, %p4716_p13 }
  0x37   : > { %4724 = shalt.err (!%p4721_p7)
}
  0x38   : > { %s4725_s7 = scalar_lea.vmem %s4934_s28, 57344  ;;  %s4810_s11 = smov [#allocation2]  }
  0x39   : > { %p4726_p11 = scmp.ne.s32.totalorder %s4934_s28, %s4725_s7  ;;  %s4730_s12 = sshll.u32 %s4810_s11, 4  ;;  %s4731_s12 = int_to_ptr.vmem [resolvable:$false] %s4730_s12 }
  0x3a   : > { %s4732_s13 = scalar_lea.vmem %s4731_s12, 114688  ;;  %p4733_p2 = scmp.lt.s32.totalorder %s4934_s28, %s4731_s12 }
  0x3b   : > { %p4728_p4 = pnand %p4726_p11, %p4714_p9  ;;  %p4734_p3 = scmp.lt.s32.totalorder %s4732_s13, %s4725_s7 }
  0x3d   : > { %p4729_p12 = pneg %p4728_p4  ;;  %p4735_p5 = por %p4734_p3, %p4733_p2 }
  0x3f   : > { %p4736_p10 = pnand %p4735_p5, %p4729_p12 }
  0x41   : > { %4739 = shalt.err (!%p4736_p10)
}
  0x42   : > { %s4811_s14 = smov 512   ;;  %s4812_s15 = smov 32  }
  0x43   : > { %4590 = dma.hbm_to_vmem [thread:$0]  (!%p5640_p8), %s4932_s24, 57344, %s4934_s28, %s4936_s29, %s4811_s14, %s4811_s14, %s4812_s15  }
  0x44   : > { %p5641_p9 = scmp.ne.s32.totalorder %s5637_s26, 0 }
  0x45   : > { %s209_s21 = sand.u32 (!%p5641_p9), 1, %s4798_s16   ;;  %p5642_p13 = scmp.ne.s32.totalorder (!%p5641_p9), %s5636_s25, 0 }
  0x46   : > { %207 = sbr.rel (%p5641_p9) target bundleno = 841 (0x349), region = 36  ;;  %s210_s27 = scalar_lea.sflag (!%p5641_p9), [#allocation3], %s209_s21 }
  0x47   : > { %s4565_s22 = smul.u32 (!%p5641_p9), 3584, %s209_s21 }
  0x49   : > { %s4960_s30 = scalar_lea.vmem (!%p5641_p9), [#allocation2], %s4565_s22 }
  0x4b   : > { %4781 = dma.done.wait (%p5642_p13), %s210_s27, 57344  }
  0x4c   : > { %4783 = vsyncadd (%p5642_p13), %s210_s27, 4294909952  ;;  %p5643_p0 = scmp.eq.s32.totalorder %s4861_s19, 0 }
  0x4e   : > { %4785 = dma.done.wait (%p5643_p0), [#allocation6], 256   ;;  %p5644_p8 = pmov %p5643_p0 }
  0x4f   : > { %s246_s26 = smul.u32 7, %s4861_s19  ;;  %p5645_p6 = scmp.ne.s32.totalorder %s4861_s19, 0 }
  0x50   : > { %4787 = vsyncadd (%p5644_p8), [#allocation6], 4294967040 }
  0x51   : > { %p247_p1 = scmp.lt.s32.totalorder %s246_s26, 48  ;;  %257 = sbr.rel (%p5645_p6) target bundleno = 89 (0x59), region = 52 }
  0x53   : > { %s5651_s26 = smov (!%p247_p1, %s246_s26), 48 }
  0x54   : > { %s4106_s6 = sshll.u32 %s5651_s26, 1 }
  0x55   : > { %s4974_s29 = scalar_lea.vmem %s5626_s0, %s4106_s6 }
  0x56   : > { %v4813_v0 = vmov 0.0  }
  0x57   : > { %258 = vst [vmem:[#allocation8] sm:$0xff] %v4813_v0  ;;  %259 = vst [vmem:[#allocation8 + $0x8] sm:$0xff] %v4813_v0 }
  0x58   : > { %260 = vst [vmem:[#allocation8 + $0x10] sm:$0xff] %v4813_v0  ;;  %261 = vst [vmem:[#allocation8 + $0x18] sm:$0xff] %v4813_v0 }
  0x59 PF: > { %v324_v1 = vld [vmem:[%s4960_s30 + $0x1c0] sm:$0xff]  ;;  %v4814_v33 = vmov 1983009808   ;;  %v722_v35 = vlaneseq  ;;  %p4556_p7 = scmp.ne.s32.totalorder %s4861_s19, 6 }
  0x5a   : > { %v328_v2 = vld [vmem:[%s4960_s30 + $0x1e0] sm:$0xff]  ;;  %v720_v34 = vunpack.c.l.s4 %v4814_v33 }
  0x5b   : > { %v452_v3 = vld [vmem:[%s4960_s30 + $0x5c0] sm:$0xff]  ;;  %v4165_v4 = vcombine.high %v324_v1, %v328_v2  ;;  %v4164_v6 = vcombine.low %v324_v1, %v328_v2  ;;  %v5000_v45 = vshrl.u32 %v722_v35, 7 }
  0x5c   : > { %v456_v5 = vld [vmem:[%s4960_s30 + $0x5e0] sm:$0xff]  ;;  %v721_v44 = vunpack.c.0.s8 %v720_v34 }
  0x5d   : > { %v316_v7 = vld [vmem:[%s4960_s30 + $0x180] sm:$0xff]  ;;  %v4293_v9 = vcombine.high %v452_v3, %v456_v5  ;;  %v4292_v10 = vcombine.low %v452_v3, %v456_v5  ;;  %2998 = vmatprep.subr.bf16.mxu0 %v4165_v4 }
  0x5e   : > { %v320_v8 = vld [vmem:[%s4960_s30 + $0x1a0] sm:$0xff]  ;;  %2999 = vmatpush1.bf16.msra.mxu0 %v4164_v6  ;;  %v5007_v54 = vsub.s32 %v721_v44, %v5000_v45 }
  0x5f   : > { %v4157_v11 = vcombine.high %v316_v7, %v320_v8  ;;  %v444_v12 = vld [vmem:[%s4960_s30 + $0x580] sm:$0xff]  ;;  %3039 = vmatprep.subr.bf16.mxu1 %v4293_v9  ;;  %v4156_v19 = vcombine.low %v316_v7, %v320_v8 }
  0x60   : > { %v448_v13 = vld [vmem:[%s4960_s30 + $0x5a0] sm:$0xff]  ;;  %3040 = vmatpush1.bf16.msra.mxu1 %v4292_v10 }
  0x61   : > { %v308_v14 = vld [vmem:[%s4960_s30 + $0x140] sm:$0xff]  ;;  %v4285_v15 = vcombine.high %v444_v12, %v448_v13  ;;  %3000 = vmatprep.subr.bf16.mxu0 %v4157_v11  ;;  %v4284_v20 = vcombine.low %v444_v12, %v448_v13 }
  0x62   : > { %v312_v16 = vld [vmem:[%s4960_s30 + $0x160] sm:$0xff]  ;;  %3001 = vmatpush1.bf16.msra.mxu0 %v4156_v19 }
  0x63   : > { %v436_v17 = vld [vmem:[%s4960_s30 + $0x540] sm:$0xff]  ;;  %v4149_v21 = vcombine.high %v308_v14, %v312_v16  ;;  %3041 = vmatprep.subr.bf16.mxu1 %v4285_v15  ;;  %v4148_v27 = vcombine.low %v308_v14, %v312_v16 }
  0x64   : > { %v440_v18 = vld [vmem:[%s4960_s30 + $0x560] sm:$0xff]  ;;  %3042 = vmatpush1.bf16.msra.mxu1 %v4284_v20 }
  0x65   : > { %v4277_v22 = vcombine.high %v436_v17, %v440_v18  ;;  %v300_v23 = vld [vmem:[%s4960_s30 + $0x100] sm:$0xff]  ;;  %3002 = vmatprep.subr.bf16.mxu0 %v4149_v21  ;;  %v4276_v28 = vcombine.low %v436_v17, %v440_v18 }
  0x66   : > { %v304_v24 = vld [vmem:[%s4960_s30 + $0x120] sm:$0xff]  ;;  %3003 = vmatpush1.bf16.msra.mxu0 %v4148_v27 }
  0x67   : > { %v428_v25 = vld [vmem:[%s4960_s30 + $0x500] sm:$0xff]  ;;  %v4141_v29 = vcombine.high %v300_v23, %v304_v24  ;;  %3043 = vmatprep.subr.bf16.mxu1 %v4277_v22  ;;  %v4140_v38 = vcombine.low %v300_v23, %v304_v24 }
  0x68   : > { %v432_v26 = vld [vmem:[%s4960_s30 + $0x520] sm:$0xff]  ;;  %3044 = vmatpush1.bf16.msra.mxu1 %v4276_v28 }
  0x69   : > { %v4269_v30 = vcombine.high %v428_v25, %v432_v26  ;;  %v292_v31 = vld [vmem:[%s4960_s30 + $0xc0] sm:$0xff]  ;;  %3004 = vmatprep.subr.bf16.mxu0 %v4141_v29  ;;  %v4268_v39 = vcombine.low %v428_v25, %v432_v26 }
  0x6a   : > { %v296_v32 = vld [vmem:[%s4960_s30 + $0xe0] sm:$0xff]  ;;  %3005 = vmatpush1.bf16.msra.mxu0 %v4140_v38 }
  0x6b   : > { %v420_v36 = vld [vmem:[%s4960_s30 + $0x4c0] sm:$0xff]  ;;  %v4133_v40 = vcombine.high %v292_v31, %v296_v32  ;;  %3045 = vmatprep.subr.bf16.mxu1 %v4269_v30  ;;  %v4132_v48 = vcombine.low %v292_v31, %v296_v32 }
  0x6c   : > { %v424_v37 = vld [vmem:[%s4960_s30 + $0x4e0] sm:$0xff]  ;;  %3046 = vmatpush1.bf16.msra.mxu1 %v4268_v39 }
  0x6d   : > { %v4261_v41 = vcombine.high %v420_v36, %v424_v37  ;;  %v284_v42 = vld [vmem:[%s4960_s30 + $0x80] sm:$0xff]  ;;  %3006 = vmatprep.subr.bf16.mxu0 %v4133_v40  ;;  %v4260_v49 = vcombine.low %v420_v36, %v424_v37 }
  0x6e   : > { %v288_v43 = vld [vmem:[%s4960_s30 + $0xa0] sm:$0xff]  ;;  %3007 = vmatpush1.bf16.msra.mxu0 %v4132_v48 }
  0x6f   : > { %v412_v46 = vld [vmem:[%s4960_s30 + $0x480] sm:$0xff]  ;;  %v4125_v50 = vcombine.high %v284_v42, %v288_v43  ;;  %3047 = vmatprep.subr.bf16.mxu1 %v4261_v41  ;;  %v4124_v57 = vcombine.low %v284_v42, %v288_v43 }
  0x70   : > { %v416_v47 = vld [vmem:[%s4960_s30 + $0x4a0] sm:$0xff]  ;;  %3048 = vmatpush1.bf16.msra.mxu1 %v4260_v49 }
  0x71   : > { %v4253_v51 = vcombine.high %v412_v46, %v416_v47  ;;  %v276_v52 = vld [vmem:[%s4960_s30 + $0x40] sm:$0xff]  ;;  %3008 = vmatprep.subr.bf16.mxu0 %v4125_v50  ;;  %v4252_v58 = vcombine.low %v412_v46, %v416_v47 }
  0x72   : > { %v280_v53 = vld [vmem:[%s4960_s30 + $0x60] sm:$0xff]  ;;  %3009 = vmatpush1.bf16.msra.mxu0 %v4124_v57 }
  0x73   : > { %v404_v55 = vld [vmem:[%s4960_s30 + $0x440] sm:$0xff]  ;;  %v4117_v59 = vcombine.high %v276_v52, %v280_v53  ;;  %3049 = vmatprep.subr.bf16.mxu1 %v4253_v51  ;;  %v4116_v4 = vcombine.low %v276_v52, %v280_v53 }
  0x74   : > { %v408_v56 = vld [vmem:[%s4960_s30 + $0x460] sm:$0xff]  ;;  %3050 = vmatpush1.bf16.msra.mxu1 %v4252_v58 }
  0x75   : > { %v266_v60 = vld [vmem:[%s4974_s29] sm:$0xff]  ;;  %v4245_v61 = vcombine.high %v404_v55, %v408_v56  ;;  %3010 = vmatprep.subr.bf16.mxu0 %v4117_v59  ;;  %v4244_v7 = vcombine.low %v404_v55, %v408_v56 }
  0x76   : > { %v268_v62 = vld [vmem:[%s4960_s30] sm:$0xff]  ;;  %v5015_v0 = vrot.slane %v266_v60, %v5007_v54  ;;  %v718_v1 = vcombine.high %v266_v60, %v266_v60  ;;  %3011 = vmatpush1.bf16.msra.mxu0 %v4116_v4 }
  0x77   : > { %v272_v63 = vld [vmem:[%s4960_s30 + $0x20] sm:$0xff]  ;;  %3051 = vmatprep.subr.bf16.mxu1 %v4245_v61 }
  0x78   : > { %v396_v2 = vld [vmem:[%s4960_s30 + $0x400] sm:$0xff]  ;;  %v5021_v5 = vcombine.high %v5015_v0, %v5015_v0  ;;  %v5024_v6 = vrot.slane %v718_v1, %v5007_v54  ;;  %v4109_v8 = vcombine.high %v268_v62, %v272_v63  ;;  %v4108_v15 = vcombine.low %v268_v62, %v272_v63  ;;  %3052 = vmatpush1.bf16.msra.mxu1 %v4244_v7 }
  0x79   : > { %v400_v3 = vld [vmem:[%s4960_s30 + $0x420] sm:$0xff] }
  0x7a   : > { %v4237_v9 = vcombine.high %v396_v2, %v400_v3  ;;  %v388_v10 = vld [vmem:[%s4960_s30 + $0x3c0] sm:$0xff]  ;;  %3030 = vmatprep.mubr.bf16.mxu0 %v5021_v5  ;;  %v5031_v12 = vcombine.high %v5024_v6, %v5024_v6  ;;  %3012 = vmatprep.subr.bf16.mxu0 %v4109_v8  ;;  %v4236_v16 = vcombine.low %v396_v2, %v400_v3 }
  0x7b   : > { %v392_v11 = vld [vmem:[%s4960_s30 + $0x3e0] sm:$0xff]  ;;  %3013 = vmatpush1.bf16.msra.mxu0 %v4108_v15 }
  0x7c   : > { %v516_v13 = vld [vmem:[%s4960_s30 + $0x7c0] sm:$0xff]  ;;  %3071 = vmatprep.mubr.bf16.mxu1 %v5031_v12  ;;  %v4229_v17 = vcombine.high %v388_v10, %v392_v11  ;;  %3053 = vmatprep.subr.bf16.mxu1 %v4237_v9  ;;  %v4228_v23 = vcombine.low %v388_v10, %v392_v11 }
  0x7d   : > { %v520_v14 = vld [vmem:[%s4960_s30 + $0x7e0] sm:$0xff]  ;;  %3054 = vmatpush1.bf16.msra.mxu1 %v4236_v16 }
  0x7e   : > { %v4357_v18 = vcombine.high %v516_v13, %v520_v14  ;;  %v380_v19 = vld [vmem:[%s4960_s30 + $0x380] sm:$0xff]  ;;  %3014 = vmatprep.subr.bf16.mxu0 %v4229_v17  ;;  %v4356_v24 = vcombine.low %v516_v13, %v520_v14 }
  0x7f   : > { %v384_v20 = vld [vmem:[%s4960_s30 + $0x3a0] sm:$0xff]  ;;  %3015 = vmatpush2.bf16.msra.mxu0 %v4228_v23 }
  0x80   : > { %v508_v21 = vld [vmem:[%s4960_s30 + $0x780] sm:$0xff]  ;;  %v4221_v25 = vcombine.high %v380_v19, %v384_v20  ;;  %3055 = vmatprep.subr.bf16.mxu1 %v4357_v18  ;;  %v4220_v31 = vcombine.low %v380_v19, %v384_v20 }
  0x81   : > { %v512_v22 = vld [vmem:[%s4960_s30 + $0x7a0] sm:$0xff]  ;;  %3056 = vmatpush2.bf16.msra.mxu1 %v4356_v24 }
  0x82   : > { %v4349_v26 = vcombine.high %v508_v21, %v512_v22  ;;  %v372_v27 = vld [vmem:[%s4960_s30 + $0x340] sm:$0xff]  ;;  %3016 = vmatprep.subr.bf16.mxu0 %v4221_v25  ;;  %v4348_v32 = vcombine.low %v508_v21, %v512_v22 }
  0x83   : > { %v376_v28 = vld [vmem:[%s4960_s30 + $0x360] sm:$0xff]  ;;  %3017 = vmatpush2.bf16.msra.mxu0 %v4220_v31 }
  0x84   : > { %v500_v29 = vld [vmem:[%s4960_s30 + $0x740] sm:$0xff]  ;;  %v4213_v33 = vcombine.high %v372_v27, %v376_v28  ;;  %3057 = vmatprep.subr.bf16.mxu1 %v4349_v26  ;;  %v4212_v39 = vcombine.low %v372_v27, %v376_v28  ;;  %v5071_v27 = vld [vmem:[%s4974_s29 + $0x8] sm:$0x3f] }
  0x85   : > { %v504_v30 = vld [vmem:[%s4960_s30 + $0x760] sm:$0xff]  ;;  %3058 = vmatpush2.bf16.msra.mxu1 %v4348_v32 }
  0x86   : > { %v4341_v34 = vcombine.high %v500_v29, %v504_v30  ;;  %v364_v35 = vld [vmem:[%s4960_s30 + $0x300] sm:$0xff]  ;;  %3018 = vmatprep.subr.bf16.mxu0 %v4213_v33  ;;  %v4340_v40 = vcombine.low %v500_v29, %v504_v30  ;;  %v5077_v30 = vrot.slane %v5071_v27, %v5007_v54 }
  0x87   : > { %v368_v36 = vld [vmem:[%s4960_s30 + $0x320] sm:$0xff]  ;;  %3019 = vmatpush2.bf16.msra.mxu0 %v4212_v39 }
  0x88   : > { %v492_v37 = vld [vmem:[%s4960_s30 + $0x700] sm:$0xff]  ;;  %v4205_v41 = vcombine.high %v364_v35, %v368_v36  ;;  %3059 = vmatprep.subr.bf16.mxu1 %v4341_v34  ;;  %v4204_v48 = vcombine.low %v364_v35, %v368_v36  ;;  %v5086_v39 = vcombine.high %v5077_v30, %v5077_v30 }
  0x89   : > { %v496_v38 = vld [vmem:[%s4960_s30 + $0x720] sm:$0xff]  ;;  %3060 = vmatpush2.bf16.msra.mxu1 %v4340_v40 }
  0x8a   : > { %v4333_v42 = vcombine.high %v492_v37, %v496_v38  ;;  %v356_v43 = vld [vmem:[%s4960_s30 + $0x2c0] sm:$0xff]  ;;  %3020 = vmatprep.subr.bf16.mxu0 %v4205_v41  ;;  %v4332_v49 = vcombine.low %v492_v37, %v496_v38 }
  0x8b   : > { %v360_v44 = vld [vmem:[%s4960_s30 + $0x2e0] sm:$0xff]  ;;  %3021 = vmatpush2.bf16.msra.mxu0 %v4204_v48 }
  0x8c   : > { %v484_v46 = vld [vmem:[%s4960_s30 + $0x6c0] sm:$0xff]  ;;  %v4197_v50 = vcombine.high %v356_v43, %v360_v44  ;;  %3061 = vmatprep.subr.bf16.mxu1 %v4333_v42  ;;  %v4196_v57 = vcombine.low %v356_v43, %v360_v44 }
  0x8d   : > { %v488_v47 = vld [vmem:[%s4960_s30 + $0x6e0] sm:$0xff]  ;;  %3062 = vmatpush2.bf16.msra.mxu1 %v4332_v49 }
  0x8e   : > { %v4325_v51 = vcombine.high %v484_v46, %v488_v47  ;;  %v348_v52 = vld [vmem:[%s4960_s30 + $0x280] sm:$0xff]  ;;  %3022 = vmatprep.subr.bf16.mxu0 %v4197_v50  ;;  %v4324_v58 = vcombine.low %v484_v46, %v488_v47  ;;  %v4815_v47 = vmov 0  }
  0x8f   : > { %v352_v53 = vld [vmem:[%s4960_s30 + $0x2a0] sm:$0xff]  ;;  %3023 = vmatpush2.bf16.msra.mxu0 %v4196_v57 }
  0x90   : > { %v476_v55 = vld [vmem:[%s4960_s30 + $0x680] sm:$0xff]  ;;  %v4189_v59 = vcombine.high %v348_v52, %v352_v53  ;;  %3063 = vmatprep.subr.bf16.mxu1 %v4325_v51  ;;  %v4188_v2 = vcombine.low %v348_v52, %v352_v53 }
  0x91   : > { %v480_v56 = vld [vmem:[%s4960_s30 + $0x6a0] sm:$0xff]  ;;  %3064 = vmatpush2.bf16.msra.mxu1 %v4324_v58 }
  0x92   : > { %v4317_v60 = vcombine.high %v476_v55, %v480_v56  ;;  %v340_v61 = vld [vmem:[%s4960_s30 + $0x240] sm:$0xff]  ;;  %3024 = vmatprep.subr.bf16.mxu0 %v4189_v59  ;;  %v4316_v3 = vcombine.low %v476_v55, %v480_v56 }
  0x93   : > { %v344_v62 = vld [vmem:[%s4960_s30 + $0x260] sm:$0xff]  ;;  %3025 = vmatpush2.bf16.msra.mxu0 %v4188_v2 }
  0x94   : > { %v468_v63 = vld [vmem:[%s4960_s30 + $0x640] sm:$0xff]  ;;  %v4181_v4 = vcombine.high %v340_v61, %v344_v62  ;;  %3065 = vmatprep.subr.bf16.mxu1 %v4317_v60  ;;  %v4180_v13 = vcombine.low %v340_v61, %v344_v62 }
  0x95   : > { %v472_v1 = vld [vmem:[%s4960_s30 + $0x660] sm:$0xff]  ;;  %3066 = vmatpush2.bf16.msra.mxu1 %v4316_v3 }
  0x96   : > { %v4309_v7 = vcombine.high %v468_v63, %v472_v1  ;;  %v332_v8 = vld [vmem:[%s4960_s30 + $0x200] sm:$0xff]  ;;  %3026 = vmatprep.subr.bf16.mxu0 %v4181_v4  ;;  %v4308_v14 = vcombine.low %v468_v63, %v472_v1 }
  0x97   : > { %v336_v9 = vld [vmem:[%s4960_s30 + $0x220] sm:$0xff]  ;;  %3027 = vmatpush2.bf16.msra.mxu0 %v4180_v13 }
  0x98   : > { %v460_v10 = vld [vmem:[%s4960_s30 + $0x600] sm:$0xff]  ;;  %v4173_v15 = vcombine.high %v332_v8, %v336_v9  ;;  %3067 = vmatprep.subr.bf16.mxu1 %v4309_v7  ;;  %v4172_v21 = vcombine.low %v332_v8, %v336_v9 }
  0x99   : > { %v464_v11 = vld [vmem:[%s4960_s30 + $0x620] sm:$0xff]  ;;  %3068 = vmatpush2.bf16.msra.mxu1 %v4308_v14 }
  0x9a   : > { %v4301_v16 = vcombine.high %v460_v10, %v464_v11  ;;  %v580_v17 = vld [vmem:[%s4960_s30 + $0x9c0] sm:$0xff]  ;;  %3028 = vmatprep.subr.bf16.mxu0 %v4173_v15  ;;  %v4300_v22 = vcombine.low %v460_v10, %v464_v11 }
  0x9b   : > { %v584_v18 = vld [vmem:[%s4960_s30 + $0x9e0] sm:$0xff]  ;;  %3029 = vmatpush2.bf16.msra.mxu0 %v4172_v21 }
  0x9c   : > { %v708_v19 = vld [vmem:[%s4960_s30 + $0xdc0] sm:$0xff]  ;;  %v4421_v23 = vcombine.high %v580_v17, %v584_v18  ;;  %3069 = vmatprep.subr.bf16.mxu1 %v4301_v16  ;;  %v4420_v31 = vcombine.low %v580_v17, %v584_v18 }
  0x9d   : > { %v712_v20 = vld [vmem:[%s4960_s30 + $0xde0] sm:$0xff]  ;;  %3070 = vmatpush2.bf16.msra.mxu1 %v4300_v22 }
  0x9e   : > { %v4549_v24 = vcombine.high %v708_v19, %v712_v20  ;;  %v572_v25 = vld [vmem:[%s4960_s30 + $0x980] sm:$0xff]  ;;  %3080 = vmatprep.subr.bf16.mxu0 %v4421_v23  ;;  %v4548_v32 = vcombine.low %v708_v19, %v712_v20  ;;  %3031 = vmatmul.mubr.bf16.vlgmr.msra.gmra.mxu0 %v5015_v0 }
  0x9f   : > { %v576_v26 = vld [vmem:[%s4960_s30 + $0x9a0] sm:$0xff]  ;;  %3081 = vmatpush1.bf16.msra.mxu0 %v4420_v31  ;;  %3112 = vmatprep.mubr.bf16.mxu0 %v5086_v39  ;;  %v325_v31 = vld [vmem:[%s4960_s30 + $0x1c8] sm:$0xff] }
  0xa0   : > { %v700_v28 = vld [vmem:[%s4960_s30 + $0xd80] sm:$0xff]  ;;  %v4413_v33 = vcombine.high %v572_v25, %v576_v26  ;;  %3121 = vmatprep.subr.bf16.mxu1 %v4549_v24  ;;  %3072 = vmatmul.mubr.bf16.vlgmr.msra.gmra.mxu1 %v5024_v6  ;;  %v4412_v40 = vcombine.low %v572_v25, %v576_v26 }
  0xa1   : > { %v704_v29 = vld [vmem:[%s4960_s30 + $0xda0] sm:$0xff]  ;;  %3122 = vmatpush1.bf16.msra.mxu1 %v4548_v32  ;;  %3153 = vmatprep.mubr.bf16.mxu1 %v4815_v47  ;;  %v329_v32 = vld [vmem:[%s4960_s30 + $0x1e8] sm:$0xff] }
  0xa2   : > { %v4541_v34 = vcombine.high %v700_v28, %v704_v29  ;;  %v564_v35 = vld [vmem:[%s4960_s30 + $0x940] sm:$0xff]  ;;  %3082 = vmatprep.subr.bf16.mxu0 %v4413_v33  ;;  %v4540_v41 = vcombine.low %v700_v28, %v704_v29 }
  0xa3   : > { %v568_v36 = vld [vmem:[%s4960_s30 + $0x960] sm:$0xff]  ;;  %3083 = vmatpush1.bf16.msra.mxu0 %v4412_v40 }
  0xa4   : > { %v692_v37 = vld [vmem:[%s4960_s30 + $0xd40] sm:$0xff]  ;;  %v4405_v42 = vcombine.high %v564_v35, %v568_v36  ;;  %3123 = vmatprep.subr.bf16.mxu1 %v4541_v34  ;;  %v4404_v50 = vcombine.low %v564_v35, %v568_v36  ;;  %v735_v34 = vcombine.high %v5071_v27, %v5071_v27  ;;  %v4166_v27 = vcombine.low %v325_v31, %v329_v32 }
  0xa5   : > { %v696_v38 = vld [vmem:[%s4960_s30 + $0xd60] sm:$0xff]  ;;  %3124 = vmatpush1.bf16.msra.mxu1 %v4540_v41  ;;  %v317_v41 = vld [vmem:[%s4960_s30 + $0x188] sm:$0xff] }
  0xa6   : > { %v4533_v43 = vcombine.high %v692_v37, %v696_v38  ;;  %v556_v44 = vld [vmem:[%s4960_s30 + $0x900] sm:$0xff]  ;;  %3084 = vmatprep.subr.bf16.mxu0 %v4405_v42  ;;  %v4532_v51 = vcombine.low %v692_v37, %v696_v38  ;;  %v4167_v37 = vcombine.high %v325_v31, %v329_v32  ;;  %v321_v42 = vld [vmem:[%s4960_s30 + $0x1a8] sm:$0xff] }
  0xa7   : > { %v560_v46 = vld [vmem:[%s4960_s30 + $0x920] sm:$0xff]  ;;  %3085 = vmatpush1.bf16.msra.mxu0 %v4404_v50 }
  0xa8   : > { %v684_v48 = vld [vmem:[%s4960_s30 + $0xd00] sm:$0xff]  ;;  %v4397_v52 = vcombine.high %v556_v44, %v560_v46  ;;  %3125 = vmatprep.subr.bf16.mxu1 %v4533_v43  ;;  %v4396_v59 = vcombine.low %v556_v44, %v560_v46  ;;  %v5122_v44 = vrot.slane %v735_v34, %v5007_v54  ;;  %v4158_v54 = vcombine.low %v317_v41, %v321_v42  ;;  %v273_v34 = vld [vmem:[%s4960_s30 + $0x28] sm:$0xff] }
  0xa9   : > { %v688_v49 = vld [vmem:[%s4960_s30 + $0xd20] sm:$0xff]  ;;  %3126 = vmatpush1.bf16.msra.mxu1 %v4532_v51  ;;  %v309_v51 = vld [vmem:[%s4960_s30 + $0x148] sm:$0xff] }
  0xaa   : > { %v4525_v53 = vcombine.high %v684_v48, %v688_v49  ;;  %v548_v55 = vld [vmem:[%s4960_s30 + $0x8c0] sm:$0xff]  ;;  %3086 = vmatprep.subr.bf16.mxu0 %v4397_v52  ;;  %v4524_v60 = vcombine.low %v684_v48, %v688_v49  ;;  %v4159_v48 = vcombine.high %v317_v41, %v321_v42  ;;  %v313_v52 = vld [vmem:[%s4960_s30 + $0x168] sm:$0xff] }
  0xab   : > { %v552_v56 = vld [vmem:[%s4960_s30 + $0x8e0] sm:$0xff]  ;;  %3087 = vmatpush1.bf16.msra.mxu0 %v4396_v59  ;;  %v301_v59 = vld [vmem:[%s4960_s30 + $0x108] sm:$0xff] }
  0xac   : > { %v676_v57 = vld [vmem:[%s4960_s30 + $0xcc0] sm:$0xff]  ;;  %v4389_v61 = vcombine.high %v548_v55, %v552_v56  ;;  %3127 = vmatprep.subr.bf16.mxu1 %v4525_v53  ;;  %v4388_v4 = vcombine.low %v548_v55, %v552_v56  ;;  %v4151_v56 = vcombine.high %v309_v51, %v313_v52  ;;  %v457_v41 = vld [vmem:[%s4960_s30 + $0x5e8] sm:$0xff] }
  0xad   : > { %v680_v58 = vld [vmem:[%s4960_s30 + $0xce0] sm:$0xff]  ;;  %3128 = vmatpush1.bf16.msra.mxu1 %v4524_v60  ;;  %v305_v60 = vld [vmem:[%s4960_s30 + $0x128] sm:$0xff] }
  0xae   : > { %v4517_v62 = vcombine.high %v676_v57, %v680_v58  ;;  %v540_v63 = vld [vmem:[%s4960_s30 + $0x880] sm:$0xff]  ;;  %3088 = vmatprep.subr.bf16.mxu0 %v4389_v61  ;;  %v4516_v7 = vcombine.low %v676_v57, %v680_v58  ;;  %v389_v42 = vld [vmem:[%s4960_s30 + $0x3c8] sm:$0xff] }
  0xaf   : > { %v544_v1 = vld [vmem:[%s4960_s30 + $0x8a0] sm:$0xff]  ;;  %3089 = vmatpush1.bf16.msra.mxu0 %v4388_v4  ;;  %v293_v4 = vld [vmem:[%s4960_s30 + $0xc8] sm:$0xff] }
  0xb0   : > { %v668_v2 = vld [vmem:[%s4960_s30 + $0xc80] sm:$0xff]  ;;  %v4381_v8 = vcombine.high %v540_v63, %v544_v1  ;;  %3129 = vmatprep.subr.bf16.mxu1 %v4517_v62  ;;  %v4380_v15 = vcombine.low %v540_v63, %v544_v1  ;;  %v4150_v62 = vcombine.low %v309_v51, %v313_v52  ;;  %v4143_v1 = vcombine.high %v301_v59, %v305_v60  ;;  %v449_v51 = vld [vmem:[%s4960_s30 + $0x5a8] sm:$0xff] }
  0xb1   : > { %v672_v3 = vld [vmem:[%s4960_s30 + $0xca0] sm:$0xff]  ;;  %3130 = vmatpush1.bf16.msra.mxu1 %v4516_v7  ;;  %v297_v7 = vld [vmem:[%s4960_s30 + $0xe8] sm:$0xff] }
  0xb2   : > { %v4509_v9 = vcombine.high %v668_v2, %v672_v3  ;;  %v532_v10 = vld [vmem:[%s4960_s30 + $0x840] sm:$0xff]  ;;  %3090 = vmatprep.subr.bf16.mxu0 %v4381_v8  ;;  %v4508_v16 = vcombine.low %v668_v2, %v672_v3  ;;  %v381_v52 = vld [vmem:[%s4960_s30 + $0x388] sm:$0xff] }
  0xb3   : > { %v536_v11 = vld [vmem:[%s4960_s30 + $0x860] sm:$0xff]  ;;  %3091 = vmatpush1.bf16.msra.mxu0 %v4380_v15  ;;  %v285_v15 = vld [vmem:[%s4960_s30 + $0x88] sm:$0xff] }
  0xb4   : > { %v660_v13 = vld [vmem:[%s4960_s30 + $0xc40] sm:$0xff]  ;;  %v4373_v17 = vcombine.high %v532_v10, %v536_v11  ;;  %3131 = vmatprep.subr.bf16.mxu1 %v4509_v9  ;;  %v4372_v23 = vcombine.low %v532_v10, %v536_v11  ;;  %v4142_v9 = vcombine.low %v301_v59, %v305_v60  ;;  %v4135_v11 = vcombine.high %v293_v4, %v297_v7  ;;  %v441_v59 = vld [vmem:[%s4960_s30 + $0x568] sm:$0xff] }
  0xb5   : > { %v664_v14 = vld [vmem:[%s4960_s30 + $0xc60] sm:$0xff]  ;;  %3132 = vmatpush1.bf16.msra.mxu1 %v4508_v16  ;;  %v289_v16 = vld [vmem:[%s4960_s30 + $0xa8] sm:$0xff] }
  0xb6   : > { %v4501_v18 = vcombine.high %v660_v13, %v664_v14  ;;  %v524_v19 = vld [vmem:[%s4960_s30 + $0x800] sm:$0xff]  ;;  %3092 = vmatprep.subr.bf16.mxu0 %v4373_v17  ;;  %v4500_v24 = vcombine.low %v660_v13, %v664_v14  ;;  %v373_v60 = vld [vmem:[%s4960_s30 + $0x348] sm:$0xff] }
  0xb7   : > { %v528_v20 = vld [vmem:[%s4960_s30 + $0x820] sm:$0xff]  ;;  %3093 = vmatpush1.bf16.msra.mxu0 %v4372_v23  ;;  %v277_v23 = vld [vmem:[%s4960_s30 + $0x48] sm:$0xff] }
  0xb8   : > { %v652_v21 = vld [vmem:[%s4960_s30 + $0xc00] sm:$0xff]  ;;  %v4365_v25 = vcombine.high %v524_v19, %v528_v20  ;;  %3133 = vmatprep.subr.bf16.mxu1 %v4501_v18  ;;  %v4364_v33 = vcombine.low %v524_v19, %v528_v20  ;;  %v4134_v18 = vcombine.low %v293_v4, %v297_v7  ;;  %v4127_v20 = vcombine.high %v285_v15, %v289_v16  ;;  %v433_v4 = vld [vmem:[%s4960_s30 + $0x528] sm:$0xff] }
  0xb9   : > { %v656_v22 = vld [vmem:[%s4960_s30 + $0xc20] sm:$0xff]  ;;  %3134 = vmatpush1.bf16.msra.mxu1 %v4500_v24  ;;  %v281_v24 = vld [vmem:[%s4960_s30 + $0x68] sm:$0xff] }
  0xba   : > { %v4493_v26 = vcombine.high %v652_v21, %v656_v22  ;;  %v644_v28 = vld [vmem:[%s4960_s30 + $0xbc0] sm:$0xff]  ;;  %3094 = vmatprep.subr.bf16.mxu0 %v4365_v25  ;;  %v4492_v35 = vcombine.low %v652_v21, %v656_v22  ;;  %v365_v7 = vld [vmem:[%s4960_s30 + $0x308] sm:$0xff] }
  0xbb   : > { %v648_v29 = vld [vmem:[%s4960_s30 + $0xbe0] sm:$0xff]  ;;  %3095 = vmatpush1.bf16.msra.mxu0 %v4364_v33  ;;  %v269_v33 = vld [vmem:[%s4960_s30 + $0x8] sm:$0xff] }
  0xbc   : > { %v4485_v36 = vcombine.high %v644_v28, %v648_v29  ;;  %3135 = vmatprep.subr.bf16.mxu1 %v4493_v26  ;;  %v636_v38 = vld [vmem:[%s4960_s30 + $0xb80] sm:$0xff]  ;;  %v4484_v43 = vcombine.low %v644_v28, %v648_v29  ;;  %v4126_v26 = vcombine.low %v285_v15, %v289_v16  ;;  %v4119_v29 = vcombine.high %v277_v23, %v281_v24  ;;  %v425_v15 = vld [vmem:[%s4960_s30 + $0x4e8] sm:$0xff] }
  0xbd   : > { %v640_v40 = vld [vmem:[%s4960_s30 + $0xba0] sm:$0xff]  ;;  %3136 = vmatpush1.bf16.msra.mxu1 %v4492_v35  ;;  %v357_v16 = vld [vmem:[%s4960_s30 + $0x2c8] sm:$0xff] }
  0xbe   : > { %3096 = vmatprep.subr.bf16.mxu0 %v4485_v36  ;;  %v4477_v46 = vcombine.high %v636_v38, %v640_v40  ;;  %3162 = vmatprep.subr.bf16.mxu1 %v4167_v37  ;;  %v628_v49 = vld [vmem:[%s4960_s30 + $0xb40] sm:$0xff]  ;;  %v4476_v53 = vcombine.low %v636_v38, %v640_v40  ;;  %v4118_v36 = vcombine.low %v277_v23, %v281_v24  ;;  %v453_v40 = vld [vmem:[%s4960_s30 + $0x5c8] sm:$0xff] }
  0xbf   : > { %v632_v50 = vld [vmem:[%s4960_s30 + $0xb60] sm:$0xff]  ;;  %3097 = vmatpush2.bf16.msra.mxu0 %v4484_v43  ;;  %v4111_v38 = vcombine.high %v269_v33, %v273_v34  ;;  %v393_v43 = vld [vmem:[%s4960_s30 + $0x3e8] sm:$0xff] }
  0xc0   : > { %3154 = vmatmul.mubr.bf16.vlgmr.msra.gmra.mxu1 %v5122_v44  ;;  %3098 = vmatprep.subr.bf16.mxu0 %v4477_v46  ;;  %v4469_v55 = vcombine.high %v628_v49, %v632_v50  ;;  %v620_v57 = vld [vmem:[%s4960_s30 + $0xb00] sm:$0xff]  ;;  %v4468_v61 = vcombine.low %v628_v49, %v632_v50  ;;  %v4110_v46 = vcombine.low %v269_v33, %v273_v34  ;;  %v445_v50 = vld [vmem:[%s4960_s30 + $0x588] sm:$0xff] }
  0xc1   : > { %3163 = vmatpush1.bf16.msra.mxu1 %v4166_v27  ;;  %v624_v58 = vld [vmem:[%s4960_s30 + $0xb20] sm:$0xff]  ;;  %3194 = vmatprep.mubr.bf16.mxu1 %v5021_v5  ;;  %v4231_v49 = vcombine.high %v389_v42, %v393_v43  ;;  %v417_v23 = vld [vmem:[%s4960_s30 + $0x4a8] sm:$0xff] }
  0xc2   : > { %3164 = vmatprep.subr.bf16.mxu1 %v4159_v48  ;;  %v4461_v63 = vcombine.high %v620_v57, %v624_v58  ;;  %v612_v2 = vld [vmem:[%s4960_s30 + $0xac0] sm:$0xff]  ;;  %v4460_v8 = vcombine.low %v620_v57, %v624_v58  ;;  %v4295_v48 = vcombine.high %v453_v40, %v457_v41  ;;  %v437_v58 = vld [vmem:[%s4960_s30 + $0x548] sm:$0xff] }
  0xc3   : > { %3099 = vmatpush2.bf16.msra.mxu0 %v4476_v53  ;;  %v616_v3 = vld [vmem:[%s4960_s30 + $0xae0] sm:$0xff]  ;;  %v385_v53 = vld [vmem:[%s4960_s30 + $0x3a8] sm:$0xff] }
  0xc4   : > { %3100 = vmatprep.subr.bf16.mxu0 %v4469_v55  ;;  %v4453_v10 = vcombine.high %v612_v2, %v616_v3  ;;  %v604_v13 = vld [vmem:[%s4960_s30 + $0xa80] sm:$0xff]  ;;  %v4452_v17 = vcombine.low %v612_v2, %v616_v3  ;;  %v4230_v55 = vcombine.low %v389_v42, %v393_v43  ;;  %v4223_v57 = vcombine.high %v381_v52, %v385_v53  ;;  %v429_v3 = vld [vmem:[%s4960_s30 + $0x508] sm:$0xff] }
  0xc5   : > { %3165 = vmatpush1.bf16.msra.mxu1 %v4158_v54  ;;  %v608_v14 = vld [vmem:[%s4960_s30 + $0xaa0] sm:$0xff]  ;;  %v4294_v54 = vcombine.low %v453_v40, %v457_v41  ;;  %v349_v24 = vld [vmem:[%s4960_s30 + $0x288] sm:$0xff] }
  0xc6   : > { %3166 = vmatprep.subr.bf16.mxu1 %v4151_v56  ;;  %v4445_v19 = vcombine.high %v604_v13, %v608_v14  ;;  %v596_v21 = vld [vmem:[%s4960_s30 + $0xa40] sm:$0xff]  ;;  %v4444_v25 = vcombine.low %v604_v13, %v608_v14  ;;  %v4287_v56 = vcombine.high %v445_v50, %v449_v51  ;;  %v421_v14 = vld [vmem:[%s4960_s30 + $0x4c8] sm:$0xff] }
  0xc7   : > { %3101 = vmatpush2.bf16.msra.mxu0 %v4468_v61  ;;  %v600_v22 = vld [vmem:[%s4960_s30 + $0xa60] sm:$0xff]  ;;  %v377_v61 = vld [vmem:[%s4960_s30 + $0x368] sm:$0xff] }
  0xc8   : > { %3102 = vmatprep.subr.bf16.mxu0 %v4461_v63  ;;  %v4437_v28 = vcombine.high %v596_v21, %v600_v22  ;;  %v588_v31 = vld [vmem:[%s4960_s30 + $0xa00] sm:$0xff]  ;;  %v4436_v35 = vcombine.low %v596_v21, %v600_v22  ;;  %v4222_v63 = vcombine.low %v381_v52, %v385_v53  ;;  %v4215_v2 = vcombine.high %v373_v60, %v377_v61  ;;  %v413_v22 = vld [vmem:[%s4960_s30 + $0x488] sm:$0xff] }
  0xc9   : > { %3167 = vmatpush1.bf16.msra.mxu1 %v4150_v62  ;;  %v592_v32 = vld [vmem:[%s4960_s30 + $0xa20] sm:$0xff]  ;;  %v4286_v62 = vcombine.low %v445_v50, %v449_v51  ;;  %v409_v33 = vld [vmem:[%s4960_s30 + $0x468] sm:$0xff] }
  0xca   : > { %3168 = vmatprep.subr.bf16.mxu1 %v4143_v1  ;;  %v4429_v37 = vcombine.high %v588_v31, %v592_v32  ;;  %v4428_v27 = vcombine.low %v588_v31, %v592_v32  ;;  %v4279_v1 = vcombine.high %v437_v58, %v441_v59  ;;  %v405_v32 = vld [vmem:[%s4960_s30 + $0x448] sm:$0xff] }
  0xcb   : > { %3103 = vmatpush2.bf16.msra.mxu0 %v4460_v8  ;;  %v369_v8 = vld [vmem:[%s4960_s30 + $0x328] sm:$0xff] }
  0xcc   : > { %3104 = vmatprep.subr.bf16.mxu0 %v4453_v10  ;;  %v4214_v10 = vcombine.low %v373_v60, %v377_v61  ;;  %v4207_v13 = vcombine.high %v365_v7, %v369_v8  ;;  %v341_v34 = vld [vmem:[%s4960_s30 + $0x248] sm:$0xff] }
  0xcd   : > { %3169 = vmatpush1.bf16.msra.mxu1 %v4142_v9  ;;  %v4278_v9 = vcombine.low %v437_v58, %v441_v59  ;;  %v397_v41 = vld [vmem:[%s4960_s30 + $0x408] sm:$0xff] }
  0xce   : > { %3170 = vmatprep.subr.bf16.mxu1 %v4135_v11  ;;  %v4271_v11 = vcombine.high %v429_v3, %v433_v4  ;;  %v401_v42 = vld [vmem:[%s4960_s30 + $0x428] sm:$0xff] }
  0xcf   : > { %3105 = vmatpush2.bf16.msra.mxu0 %v4452_v17  ;;  %v361_v17 = vld [vmem:[%s4960_s30 + $0x2e8] sm:$0xff] }
  0xd0   : > { %3106 = vmatprep.subr.bf16.mxu0 %v4445_v19  ;;  %v4206_v19 = vcombine.low %v365_v7, %v369_v8  ;;  %v4199_v21 = vcombine.high %v357_v16, %v361_v17  ;;  %v333_v43 = vld [vmem:[%s4960_s30 + $0x208] sm:$0xff] }
  0xd1   : > { %3171 = vmatpush1.bf16.msra.mxu1 %v4134_v18  ;;  %v4270_v18 = vcombine.low %v429_v3, %v433_v4  ;;  %v517_v51 = vld [vmem:[%s4960_s30 + $0x7c8] sm:$0xff] }
  0xd2   : > { %3172 = vmatprep.subr.bf16.mxu1 %v4127_v20  ;;  %v4263_v20 = vcombine.high %v421_v14, %v425_v15  ;;  %v521_v52 = vld [vmem:[%s4960_s30 + $0x7e8] sm:$0xff] }
  0xd3   : > { %3107 = vmatpush2.bf16.msra.mxu0 %v4444_v25  ;;  %v353_v25 = vld [vmem:[%s4960_s30 + $0x2a8] sm:$0xff] }
  0xd4   : > { %3108 = vmatprep.subr.bf16.mxu0 %v4437_v28  ;;  %v4198_v28 = vcombine.low %v357_v16, %v361_v17  ;;  %v4191_v31 = vcombine.high %v349_v24, %v353_v25  ;;  %v581_v53 = vld [vmem:[%s4960_s30 + $0x9c8] sm:$0xff] }
  0xd5   : > { %3173 = vmatpush1.bf16.msra.mxu1 %v4126_v26  ;;  %v4262_v26 = vcombine.low %v421_v14, %v425_v15  ;;  %v509_v59 = vld [vmem:[%s4960_s30 + $0x788] sm:$0xff] }
  0xd6   : > { %3174 = vmatprep.subr.bf16.mxu1 %v4119_v29  ;;  %v4255_v29 = vcombine.high %v413_v22, %v417_v23  ;;  %v513_v60 = vld [vmem:[%s4960_s30 + $0x7a8] sm:$0xff] }
  0xd7   : > { %3109 = vmatpush2.bf16.msra.mxu0 %v4436_v35  ;;  %v345_v35 = vld [vmem:[%s4960_s30 + $0x268] sm:$0xff] }
  0xd8   : > { %3110 = vmatprep.subr.bf16.mxu0 %v4429_v37  ;;  %v4190_v37 = vcombine.low %v349_v24, %v353_v25  ;;  %v4183_v40 = vcombine.high %v341_v34, %v345_v35  ;;  %v573_v61 = vld [vmem:[%s4960_s30 + $0x988] sm:$0xff] }
  0xd9   : > { %3175 = vmatpush1.bf16.msra.mxu1 %v4118_v36  ;;  %v4254_v36 = vcombine.low %v413_v22, %v417_v23  ;;  %v501_v4 = vld [vmem:[%s4960_s30 + $0x748] sm:$0xff] }
  0xda   : > { %3176 = vmatprep.subr.bf16.mxu1 %v4111_v38  ;;  %v4247_v38 = vcombine.high %v405_v32, %v409_v33  ;;  %v505_v7 = vld [vmem:[%s4960_s30 + $0x768] sm:$0xff] }
  0xdb   : > { %3111 = vmatpush2.bf16.msra.mxu0 %v4428_v27  ;;  %v337_v27 = vld [vmem:[%s4960_s30 + $0x228] sm:$0xff] }
  0xdc   : > { %3203 = vmatprep.subr.bf16.mxu0 %v4295_v48  ;;  %v4182_v48 = vcombine.low %v341_v34, %v345_v35  ;;  %v4175_v50 = vcombine.high %v333_v43, %v337_v27  ;;  %v565_v8 = vld [vmem:[%s4960_s30 + $0x948] sm:$0xff] }
  0xdd   : > { %3177 = vmatpush1.bf16.msra.mxu1 %v4110_v46  ;;  %v4246_v46 = vcombine.low %v405_v32, %v409_v33  ;;  %v493_v15 = vld [vmem:[%s4960_s30 + $0x708] sm:$0xff] }
  0xde   : > { %3178 = vmatprep.subr.bf16.mxu1 %v4231_v49  ;;  %3113 = vmatmul.mubr.bf16.vlgmr.msra.gmra.mxu0 %v5077_v30  ;;  %v4239_v49 = vcombine.high %v397_v41, %v401_v42  ;;  %v497_v16 = vld [vmem:[%s4960_s30 + $0x728] sm:$0xff] }
  0xdf   : > { %3204 = vmatpush1.bf16.msra.mxu0 %v4294_v54  ;;  %3235 = vmatprep.mubr.bf16.mxu0 %v5031_v12  ;;  %v585_v54 = vld [vmem:[%s4960_s30 + $0x9e8] sm:$0xff] }
  0xe0   : > { %3205 = vmatprep.subr.bf16.mxu0 %v4287_v56  ;;  %v4174_v56 = vcombine.low %v333_v43, %v337_v27  ;;  %v4423_v58 = vcombine.high %v581_v53, %v585_v54  ;;  %v557_v17 = vld [vmem:[%s4960_s30 + $0x908] sm:$0xff] }
  0xe1   : > { %3179 = vmatpush2.bf16.msra.mxu1 %v4230_v55  ;;  %v4238_v55 = vcombine.low %v397_v41, %v401_v42  ;;  %v485_v23 = vld [vmem:[%s4960_s30 + $0x6c8] sm:$0xff] }
  0xe2   : > { %3180 = vmatprep.subr.bf16.mxu1 %v4223_v57  ;;  %v4359_v57 = vcombine.high %v517_v51, %v521_v52  ;;  %v489_v24 = vld [vmem:[%s4960_s30 + $0x6e8] sm:$0xff] }
  0xe3   : > { %3206 = vmatpush1.bf16.msra.mxu0 %v4286_v62  ;;  %v577_v62 = vld [vmem:[%s4960_s30 + $0x9a8] sm:$0xff] }
  0xe4   : > { %3207 = vmatprep.subr.bf16.mxu0 %v4279_v1  ;;  %v4422_v1 = vcombine.low %v581_v53, %v585_v54  ;;  %v4415_v3 = vcombine.high %v573_v61, %v577_v62  ;;  %v549_v25 = vld [vmem:[%s4960_s30 + $0x8c8] sm:$0xff] }
  0xe5   : > { %3181 = vmatpush2.bf16.msra.mxu1 %v4222_v63  ;;  %v4358_v63 = vcombine.low %v517_v51, %v521_v52  ;;  %v477_v33 = vld [vmem:[%s4960_s30 + $0x688] sm:$0xff] }
  0xe6   : > { %3182 = vmatprep.subr.bf16.mxu1 %v4215_v2  ;;  %v4351_v2 = vcombine.high %v509_v59, %v513_v60  ;;  %v481_v34 = vld [vmem:[%s4960_s30 + $0x6a8] sm:$0xff] }
  0xe7   : > { %3208 = vmatpush1.bf16.msra.mxu0 %v4278_v9  ;;  %v569_v9 = vld [vmem:[%s4960_s30 + $0x968] sm:$0xff] }
  0xe8   : > { %3209 = vmatprep.subr.bf16.mxu0 %v4271_v11  ;;  %v4414_v11 = vcombine.low %v573_v61, %v577_v62  ;;  %v4407_v14 = vcombine.high %v565_v8, %v569_v9  ;;  %v541_v35 = vld [vmem:[%s4960_s30 + $0x888] sm:$0xff] }
  0xe9   : > { %3183 = vmatpush2.bf16.msra.mxu1 %v4214_v10  ;;  %v4350_v10 = vcombine.low %v509_v59, %v513_v60  ;;  %v469_v42 = vld [vmem:[%s4960_s30 + $0x648] sm:$0xff] }
  0xea   : > { %3184 = vmatprep.subr.bf16.mxu1 %v4207_v13  ;;  %v4343_v13 = vcombine.high %v501_v4, %v505_v7  ;;  %v473_v43 = vld [vmem:[%s4960_s30 + $0x668] sm:$0xff] }
  0xeb   : > { %3210 = vmatpush1.bf16.msra.mxu0 %v4270_v18  ;;  %v561_v18 = vld [vmem:[%s4960_s30 + $0x928] sm:$0xff] }
  0xec   : > { %3211 = vmatprep.subr.bf16.mxu0 %v4263_v20  ;;  %v4406_v20 = vcombine.low %v565_v8, %v569_v9  ;;  %v4399_v22 = vcombine.high %v557_v17, %v561_v18  ;;  %v533_v27 = vld [vmem:[%s4960_s30 + $0x848] sm:$0xff] }
  0xed   : > { %3185 = vmatpush2.bf16.msra.mxu1 %v4206_v19  ;;  %v4342_v19 = vcombine.low %v501_v4, %v505_v7  ;;  %v461_v52 = vld [vmem:[%s4960_s30 + $0x608] sm:$0xff] }
  0xee   : > { %3186 = vmatprep.subr.bf16.mxu1 %v4199_v21  ;;  %v4335_v21 = vcombine.high %v493_v15, %v497_v16  ;;  %v465_v53 = vld [vmem:[%s4960_s30 + $0x628] sm:$0xff] }
  0xef   : > { %3212 = vmatpush1.bf16.msra.mxu0 %v4262_v26  ;;  %v553_v26 = vld [vmem:[%s4960_s30 + $0x8e8] sm:$0xff] }
  0xf0   : > { %3213 = vmatprep.subr.bf16.mxu0 %v4255_v29  ;;  %v4398_v29 = vcombine.low %v557_v17, %v561_v18  ;;  %v4391_v32 = vcombine.high %v549_v25, %v553_v26  ;;  %v525_v54 = vld [vmem:[%s4960_s30 + $0x808] sm:$0xff] }
  0xf1   : > { %3187 = vmatpush2.bf16.msra.mxu1 %v4198_v28  ;;  %v4334_v28 = vcombine.low %v493_v15, %v497_v16  ;;  %v709_v60 = vld [vmem:[%s4960_s30 + $0xdc8] sm:$0xff] }
  0xf2   : > { %3188 = vmatprep.subr.bf16.mxu1 %v4191_v31  ;;  %v4327_v31 = vcombine.high %v485_v23, %v489_v24  ;;  %v713_v61 = vld [vmem:[%s4960_s30 + $0xde8] sm:$0xff] }
  0xf3   : > { %3214 = vmatpush1.bf16.msra.mxu0 %v4254_v36  ;;  %v545_v36 = vld [vmem:[%s4960_s30 + $0x8a8] sm:$0xff] }
  0xf4   : > { %3215 = vmatprep.subr.bf16.mxu0 %v4247_v38  ;;  %v4390_v38 = vcombine.low %v549_v25, %v553_v26  ;;  %v4383_v41 = vcombine.high %v541_v35, %v545_v36  ;;  %v645_v62 = vld [vmem:[%s4960_s30 + $0xbc8] sm:$0xff] }
  0xf5   : > { %3189 = vmatpush2.bf16.msra.mxu1 %v4190_v37  ;;  %v4326_v37 = vcombine.low %v485_v23, %v489_v24  ;;  %v701_v7 = vld [vmem:[%s4960_s30 + $0xd88] sm:$0xff] }
  0xf6   : > { %3190 = vmatprep.subr.bf16.mxu1 %v4183_v40  ;;  %v4319_v40 = vcombine.high %v477_v33, %v481_v34  ;;  %v705_v8 = vld [vmem:[%s4960_s30 + $0xda8] sm:$0xff] }
  0xf7   : > { %3216 = vmatpush1.bf16.msra.mxu0 %v4246_v46  ;;  %v537_v46 = vld [vmem:[%s4960_s30 + $0x868] sm:$0xff] }
  0xf8   : > { %3217 = vmatprep.subr.bf16.mxu0 %v4239_v49  ;;  %v4382_v49 = vcombine.low %v541_v35, %v545_v36  ;;  %v4375_v51 = vcombine.high %v533_v27, %v537_v46  ;;  %v637_v9 = vld [vmem:[%s4960_s30 + $0xb88] sm:$0xff] }
  0xf9   : > { %3191 = vmatpush2.bf16.msra.mxu1 %v4182_v48  ;;  %v4318_v48 = vcombine.low %v477_v33, %v481_v34  ;;  %v693_v16 = vld [vmem:[%s4960_s30 + $0xd48] sm:$0xff] }
  0xfa   : > { %3192 = vmatprep.subr.bf16.mxu1 %v4175_v50  ;;  %v4311_v50 = vcombine.high %v469_v42, %v473_v43  ;;  %v697_v17 = vld [vmem:[%s4960_s30 + $0xd68] sm:$0xff] }
  0xfb   : > { %3218 = vmatpush1.bf16.msra.mxu0 %v4238_v55  ;;  %v529_v55 = vld [vmem:[%s4960_s30 + $0x828] sm:$0xff] }
  0xfc   : > { %3219 = vmatprep.subr.bf16.mxu0 %v4359_v57  ;;  %v4374_v57 = vcombine.low %v533_v27, %v537_v46  ;;  %v4367_v59 = vcombine.high %v525_v54, %v529_v55  ;;  %v629_v18 = vld [vmem:[%s4960_s30 + $0xb48] sm:$0xff] }
  0xfd   : > { %3193 = vmatpush2.bf16.msra.mxu1 %v4174_v56  ;;  %v4310_v56 = vcombine.low %v469_v42, %v473_v43  ;;  %v685_v24 = vld [vmem:[%s4960_s30 + $0xd08] sm:$0xff] }
  0xfe   : > { %3244 = vmatprep.subr.bf16.mxu1 %v4423_v58  ;;  %v4303_v58 = vcombine.high %v461_v52, %v465_v53  ;;  %v689_v25 = vld [vmem:[%s4960_s30 + $0xd28] sm:$0xff] }
  0xff   : > { %3220 = vmatpush2.bf16.msra.mxu0 %v4358_v63  ;;  %v649_v63 = vld [vmem:[%s4960_s30 + $0xbe8] sm:$0xff] }
 0x100   : > { %3195 = vmatmul.mubr.bf16.vlgmr.msra.gmra.mxu1 %v5015_v0  ;;  %3221 = vmatprep.subr.bf16.mxu0 %v4351_v2  ;;  %v4366_v2 = vcombine.low %v525_v54, %v529_v55  ;;  %v4487_v4 = vcombine.high %v645_v62, %v649_v63  ;;  %v621_v26 = vld [vmem:[%s4960_s30 + $0xb08] sm:$0xff] }
 0x101   : > { %3245 = vmatpush1.bf16.msra.mxu1 %v4422_v1  ;;  %3276 = vmatprep.mubr.bf16.mxu1 %v5086_v39  ;;  %v4302_v1 = vcombine.low %v461_v52, %v465_v53  ;;  %v677_v34 = vld [vmem:[%s4960_s30 + $0xcc8] sm:$0xff] }
 0x102   : > { %3246 = vmatprep.subr.bf16.mxu1 %v4415_v3  ;;  %v4551_v3 = vcombine.high %v709_v60, %v713_v61  ;;  %v681_v35 = vld [vmem:[%s4960_s30 + $0xce8] sm:$0xff] }
 0x103   : > { %3222 = vmatpush2.bf16.msra.mxu0 %v4350_v10  ;;  %v641_v10 = vld [vmem:[%s4960_s30 + $0xba8] sm:$0xff] }
 0x104   : > { %3223 = vmatprep.subr.bf16.mxu0 %v4343_v13  ;;  %v4486_v13 = vcombine.low %v645_v62, %v649_v63  ;;  %v4479_v15 = vcombine.high %v637_v9, %v641_v10  ;;  %v613_v36 = vld [vmem:[%s4960_s30 + $0xac8] sm:$0xff] }
 0x105   : > { %3247 = vmatpush1.bf16.msra.mxu1 %v4414_v11  ;;  %v4550_v11 = vcombine.low %v709_v60, %v713_v61  ;;  %v669_v43 = vld [vmem:[%s4960_s30 + $0xc88] sm:$0xff] }
 0x106   : > { %3248 = vmatprep.subr.bf16.mxu1 %v4407_v14  ;;  %v4543_v14 = vcombine.high %v701_v7, %v705_v8  ;;  %v673_v27 = vld [vmem:[%s4960_s30 + $0xca8] sm:$0xff] }
 0x107   : > { %3224 = vmatpush2.bf16.msra.mxu0 %v4342_v19  ;;  %v633_v19 = vld [vmem:[%s4960_s30 + $0xb68] sm:$0xff] }
 0x108   : > { %3225 = vmatprep.subr.bf16.mxu0 %v4335_v21  ;;  %v4478_v21 = vcombine.low %v637_v9, %v641_v10  ;;  %v4471_v23 = vcombine.high %v629_v18, %v633_v19  ;;  %v605_v46 = vld [vmem:[%s4960_s30 + $0xa88] sm:$0xff]  ;;  %v330_v9 = vld [vmem:[%s4960_s30 + $0x1f0] sm:$0xff] }
 0x109   : > { %3249 = vmatpush1.bf16.msra.mxu1 %v4406_v20  ;;  %v4542_v20 = vcombine.low %v701_v7, %v705_v8  ;;  %v661_v53 = vld [vmem:[%s4960_s30 + $0xc48] sm:$0xff]  ;;  %v326_v8 = vld [vmem:[%s4960_s30 + $0x1d0] sm:$0xff] }
 0x10a   : > { %3250 = vmatprep.subr.bf16.mxu1 %v4399_v22  ;;  %v4535_v22 = vcombine.high %v693_v16, %v697_v17  ;;  %v665_v54 = vld [vmem:[%s4960_s30 + $0xc68] sm:$0xff]  ;;  %v454_v10 = vld [vmem:[%s4960_s30 + $0x5d0] sm:$0xff] }
 0x10b   : > { %3226 = vmatpush2.bf16.msra.mxu0 %v4334_v28  ;;  %v625_v28 = vld [vmem:[%s4960_s30 + $0xb28] sm:$0xff] }
 0x10c   : > { %3227 = vmatprep.subr.bf16.mxu0 %v4327_v31  ;;  %v4470_v31 = vcombine.low %v629_v18, %v633_v19  ;;  %v4463_v33 = vcombine.high %v621_v26, %v625_v28  ;;  %v597_v55 = vld [vmem:[%s4960_s30 + $0xa48] sm:$0xff]  ;;  %v322_v18 = vld [vmem:[%s4960_s30 + $0x1b0] sm:$0xff] }
 0x10d   : > { %3251 = vmatpush1.bf16.msra.mxu1 %v4398_v29  ;;  %v4534_v29 = vcombine.low %v693_v16, %v697_v17  ;;  %v653_v61 = vld [vmem:[%s4960_s30 + $0xc08] sm:$0xff]  ;;  %v318_v17 = vld [vmem:[%s4960_s30 + $0x190] sm:$0xff] }
 0x10e   : > { %3252 = vmatprep.subr.bf16.mxu1 %v4391_v32  ;;  %v4527_v32 = vcombine.high %v685_v24, %v689_v25  ;;  %v657_v62 = vld [vmem:[%s4960_s30 + $0xc28] sm:$0xff]  ;;  %v446_v19 = vld [vmem:[%s4960_s30 + $0x590] sm:$0xff] }
 0x10f   : > { %3228 = vmatpush2.bf16.msra.mxu0 %v4326_v37  ;;  %v617_v37 = vld [vmem:[%s4960_s30 + $0xae8] sm:$0xff] }
 0x110   : > { %3229 = vmatprep.subr.bf16.mxu0 %v4319_v40  ;;  %v4462_v40 = vcombine.low %v621_v26, %v625_v28  ;;  %v4455_v42 = vcombine.high %v613_v36, %v617_v37  ;;  %v589_v63 = vld [vmem:[%s4960_s30 + $0xa08] sm:$0xff]  ;;  %v314_v26 = vld [vmem:[%s4960_s30 + $0x170] sm:$0xff] }
 0x111   : > { %3253 = vmatpush1.bf16.msra.mxu1 %v4390_v38  ;;  %v4526_v38 = vcombine.low %v685_v24, %v689_v25  ;;  %v310_v25 = vld [vmem:[%s4960_s30 + $0x150] sm:$0xff] }
 0x112   : > { %3254 = vmatprep.subr.bf16.mxu1 %v4383_v41  ;;  %v4519_v41 = vcombine.high %v677_v34, %v681_v35  ;;  %v438_v28 = vld [vmem:[%s4960_s30 + $0x550] sm:$0xff] }
 0x113   : > { %3230 = vmatpush2.bf16.msra.mxu0 %v4318_v48  ;;  %v609_v48 = vld [vmem:[%s4960_s30 + $0xaa8] sm:$0xff] }
 0x114   : > { %3231 = vmatprep.subr.bf16.mxu0 %v4311_v50  ;;  %v4454_v50 = vcombine.low %v613_v36, %v617_v37  ;;  %v4447_v52 = vcombine.high %v605_v46, %v609_v48  ;;  %v306_v36 = vld [vmem:[%s4960_s30 + $0x130] sm:$0xff] }
 0x115   : > { %3255 = vmatpush1.bf16.msra.mxu1 %v4382_v49  ;;  %v4518_v49 = vcombine.low %v677_v34, %v681_v35  ;;  %v302_v35 = vld [vmem:[%s4960_s30 + $0x110] sm:$0xff] }
 0x116   : > { %3256 = vmatprep.subr.bf16.mxu1 %v4375_v51  ;;  %v4511_v51 = vcombine.high %v669_v43, %v673_v27  ;;  %v430_v37 = vld [vmem:[%s4960_s30 + $0x510] sm:$0xff] }
 0x117   : > { %3232 = vmatpush2.bf16.msra.mxu0 %v4310_v56  ;;  %v601_v56 = vld [vmem:[%s4960_s30 + $0xa68] sm:$0xff] }
 0x118   : > { %3233 = vmatprep.subr.bf16.mxu0 %v4303_v58  ;;  %v4446_v58 = vcombine.low %v605_v46, %v609_v48  ;;  %v4439_v60 = vcombine.high %v597_v55, %v601_v56  ;;  %v298_v46 = vld [vmem:[%s4960_s30 + $0xf0] sm:$0xff] }
 0x119   : > { %3257 = vmatpush1.bf16.msra.mxu1 %v4374_v57  ;;  %v4510_v57 = vcombine.low %v669_v43, %v673_v27  ;;  %v294_v27 = vld [vmem:[%s4960_s30 + $0xd0] sm:$0xff] }
 0x11a   : > { %3258 = vmatprep.subr.bf16.mxu1 %v4367_v59  ;;  %v4503_v59 = vcombine.high %v661_v53, %v665_v54  ;;  %v422_v48 = vld [vmem:[%s4960_s30 + $0x4d0] sm:$0xff] }
 0x11b   : > { %3234 = vmatpush2.bf16.msra.mxu0 %v4302_v1  ;;  %v593_v1 = vld [vmem:[%s4960_s30 + $0xa28] sm:$0xff] }
 0x11c   : > { %3285 = vmatprep.subr.bf16.mxu0 %v4551_v3  ;;  %v4438_v3 = vcombine.low %v597_v55, %v601_v56  ;;  %v4431_v7 = vcombine.high %v589_v63, %v593_v1  ;;  %v290_v55 = vld [vmem:[%s4960_s30 + $0xb0] sm:$0xff] }
 0x11d   : > { %3259 = vmatpush1.bf16.msra.mxu1 %v4366_v2  ;;  %v4502_v2 = vcombine.low %v661_v53, %v665_v54  ;;  %v286_v54 = vld [vmem:[%s4960_s30 + $0x90] sm:$0xff] }
 0x11e   : > { %3260 = vmatprep.subr.bf16.mxu1 %v4487_v4  ;;  %3236 = vmatmul.mubr.bf16.vlgmr.msra.gmra.mxu0 %v5024_v6  ;;  %v4495_v4 = vcombine.high %v653_v61, %v657_v62  ;;  %v414_v56 = vld [vmem:[%s4960_s30 + $0x490] sm:$0xff] }
 0x11f   : > { %3286 = vmatpush1.bf16.msra.mxu0 %v4550_v11  ;;  %3317 = vmatprep.mubr.bf16.mxu0 %v4815_v47  ;;  %v458_v11 = vld [vmem:[%s4960_s30 + $0x5f0] sm:$0xff] }
 0x120   : > { %3287 = vmatprep.subr.bf16.mxu0 %v4543_v14  ;;  %v4430_v14 = vcombine.low %v589_v63, %v593_v1  ;;  %v4297_v16 = vcombine.high %v454_v10, %v458_v11  ;;  %v282_v63 = vld [vmem:[%s4960_s30 + $0x70] sm:$0xff] }
 0x121   : > { %3261 = vmatpush2.bf16.msra.mxu1 %v4486_v13  ;;  %v4494_v13 = vcombine.low %v653_v61, %v657_v62  ;;  %v278_v62 = vld [vmem:[%s4960_s30 + $0x50] sm:$0xff] }
 0x122   : > { %3262 = vmatprep.subr.bf16.mxu1 %v4479_v15  ;;  %v4169_v15 = vcombine.high %v326_v8, %v330_v9  ;;  %v406_v1 = vld [vmem:[%s4960_s30 + $0x450] sm:$0xff] }
 0x123   : > { %3288 = vmatpush1.bf16.msra.mxu0 %v4542_v20  ;;  %v450_v20 = vld [vmem:[%s4960_s30 + $0x5b0] sm:$0xff] }
 0x124   : > { %3289 = vmatprep.subr.bf16.mxu0 %v4535_v22  ;;  %v4296_v22 = vcombine.low %v454_v10, %v458_v11  ;;  %v4289_v24 = vcombine.high %v446_v19, %v450_v20  ;;  %v274_v10 = vld [vmem:[%s4960_s30 + $0x30] sm:$0xff] }
 0x125   : > { %3263 = vmatpush2.bf16.msra.mxu1 %v4478_v21  ;;  %v4168_v21 = vcombine.low %v326_v8, %v330_v9  ;;  %v270_v9 = vld [vmem:[%s4960_s30 + $0x10] sm:$0xff] }
 0x126   : > { %3264 = vmatprep.subr.bf16.mxu1 %v4471_v23  ;;  %v4161_v23 = vcombine.high %v318_v17, %v322_v18  ;;  %v398_v11 = vld [vmem:[%s4960_s30 + $0x410] sm:$0xff] }
 0x127   : > { %3290 = vmatpush1.bf16.msra.mxu0 %v4534_v29  ;;  %v442_v29 = vld [vmem:[%s4960_s30 + $0x570] sm:$0xff] }
 0x128   : > { %3291 = vmatprep.subr.bf16.mxu0 %v4527_v32  ;;  %v4288_v32 = vcombine.low %v446_v19, %v450_v20  ;;  %v4281_v34 = vcombine.high %v438_v28, %v442_v29  ;;  %v394_v19 = vld [vmem:[%s4960_s30 + $0x3f0] sm:$0xff] }
 0x129   : > { %3265 = vmatpush2.bf16.msra.mxu1 %v4470_v31  ;;  %v4160_v31 = vcombine.low %v318_v17, %v322_v18  ;;  %v390_v18 = vld [vmem:[%s4960_s30 + $0x3d0] sm:$0xff] }
 0x12a   : > { %3266 = vmatprep.subr.bf16.mxu1 %v4463_v33  ;;  %v4153_v33 = vcombine.high %v310_v25, %v314_v26  ;;  %v518_v20 = vld [vmem:[%s4960_s30 + $0x7d0] sm:$0xff] }
 0x12b   : > { %3292 = vmatpush1.bf16.msra.mxu0 %v4526_v38  ;;  %v434_v38 = vld [vmem:[%s4960_s30 + $0x530] sm:$0xff] }
 0x12c   : > { %3293 = vmatprep.subr.bf16.mxu0 %v4519_v41  ;;  %v4280_v41 = vcombine.low %v438_v28, %v442_v29  ;;  %v4273_v43 = vcombine.high %v430_v37, %v434_v38  ;;  %v386_v28 = vld [vmem:[%s4960_s30 + $0x3b0] sm:$0xff] }
 0x12d   : > { %3267 = vmatpush2.bf16.msra.mxu1 %v4462_v40  ;;  %v4152_v40 = vcombine.low %v310_v25, %v314_v26  ;;  %v382_v26 = vld [vmem:[%s4960_s30 + $0x390] sm:$0xff] }
 0x12e   : > { %3268 = vmatprep.subr.bf16.mxu1 %v4455_v42  ;;  %v4145_v42 = vcombine.high %v302_v35, %v306_v36  ;;  %v510_v29 = vld [vmem:[%s4960_s30 + $0x790] sm:$0xff] }
 0x12f   : > { %3294 = vmatpush1.bf16.msra.mxu0 %v4518_v49  ;;  %v426_v49 = vld [vmem:[%s4960_s30 + $0x4f0] sm:$0xff] }
 0x130   : > { %3295 = vmatprep.subr.bf16.mxu0 %v4511_v51  ;;  %v4272_v51 = vcombine.low %v430_v37, %v434_v38  ;;  %v4265_v53 = vcombine.high %v422_v48, %v426_v49  ;;  %v378_v37 = vld [vmem:[%s4960_s30 + $0x370] sm:$0xff] }
 0x131   : > { %3269 = vmatpush2.bf16.msra.mxu1 %v4454_v50  ;;  %v4144_v50 = vcombine.low %v302_v35, %v306_v36  ;;  %v374_v36 = vld [vmem:[%s4960_s30 + $0x350] sm:$0xff] }
 0x132   : > { %3270 = vmatprep.subr.bf16.mxu1 %v4447_v52  ;;  %v4137_v52 = vcombine.high %v294_v27, %v298_v46 }
 0x133   : > { %3296 = vmatpush1.bf16.msra.mxu0 %v4510_v57  ;;  %v418_v57 = vld [vmem:[%s4960_s30 + $0x4b0] sm:$0xff] }
 0x134   : > { %3297 = vmatprep.subr.bf16.mxu0 %v4503_v59  ;;  %v4264_v59 = vcombine.low %v422_v48, %v426_v49  ;;  %v4257_v61 = vcombine.high %v414_v56, %v418_v57  ;;  %v4217_v48 = vcombine.high %v374_v36, %v378_v37 }
 0x135   : > { %3271 = vmatpush2.bf16.msra.mxu1 %v4446_v58  ;;  %v4136_v58 = vcombine.low %v294_v27, %v298_v46 }
 0x136   : > { %3272 = vmatprep.subr.bf16.mxu1 %v4439_v60  ;;  %v4129_v60 = vcombine.high %v286_v54, %v290_v55 }
 0x137   : > { %3298 = vmatpush1.bf16.msra.mxu0 %v4502_v2  ;;  %v410_v2 = vld [vmem:[%s4960_s30 + $0x470] sm:$0xff] }
 0x138   : > { %3299 = vmatprep.subr.bf16.mxu0 %v4495_v4  ;;  %v4256_v4 = vcombine.low %v414_v56, %v418_v57  ;;  %v4249_v8 = vcombine.high %v406_v1, %v410_v2  ;;  %v4216_v57 = vcombine.low %v374_v36, %v378_v37  ;;  %v582_v37 = vld [vmem:[%s4960_s30 + $0x9d0] sm:$0xff] }
 0x139   : > { %3273 = vmatpush2.bf16.msra.mxu1 %v4438_v3  ;;  %v4128_v3 = vcombine.low %v286_v54, %v290_v55  ;;  %v494_v54 = vld [vmem:[%s4960_s30 + $0x710] sm:$0xff] }
 0x13a   : > { %3274 = vmatprep.subr.bf16.mxu1 %v4431_v7  ;;  %v4121_v7 = vcombine.high %v278_v62, %v282_v63  ;;  %v498_v55 = vld [vmem:[%s4960_s30 + $0x730] sm:$0xff] }
 0x13b   : > { %3300 = vmatpush1.bf16.msra.mxu0 %v4494_v13  ;;  %v402_v13 = vld [vmem:[%s4960_s30 + $0x430] sm:$0xff] }
 0x13c   : > { %3326 = vmatprep.subr.bf16.mxu0 %v4169_v15  ;;  %v4248_v15 = vcombine.low %v406_v1, %v410_v2  ;;  %v4241_v17 = vcombine.high %v398_v11, %v402_v13  ;;  %v362_v1 = vld [vmem:[%s4960_s30 + $0x2f0] sm:$0xff] }
 0x13d   : > { %3275 = vmatpush2.bf16.msra.mxu1 %v4430_v14  ;;  %v4120_v14 = vcombine.low %v278_v62, %v282_v63  ;;  %v4337_v62 = vcombine.high %v494_v54, %v498_v55  ;;  %v358_v63 = vld [vmem:[%s4960_s30 + $0x2d0] sm:$0xff] }
 0x13e   : > { %3367 = vmatprep.subr.bf16.mxu1 %v4297_v16  ;;  %3318 = vmatmul.mubr.bf16.vlgmr.msra.gmra.mxu0 %v5122_v44  ;;  %v4113_v16 = vcombine.high %v270_v9, %v274_v10  ;;  %v486_v2 = vld [vmem:[%s4960_s30 + $0x6d0] sm:$0xff] }
 0x13f   : > { %3327 = vmatpush1.bf16.msra.mxu0 %v4168_v21  ;;  %3358 = vmatprep.mubr.bf16.mxu0 %v5021_v5  ;;  %v522_v21 = vld [vmem:[%s4960_s30 + $0x7f0] sm:$0xff] }
 0x140   : > { %3277 = vmatmul.mubr.bf16.vlgmr.msra.gmra.mxu1 %v5077_v30  ;;  %3328 = vmatprep.subr.bf16.mxu0 %v4161_v23  ;;  %v4240_v23 = vcombine.low %v398_v11, %v402_v13  ;;  %v4361_v25 = vcombine.high %v518_v20, %v522_v21  ;;  %v354_v11 = vld [vmem:[%s4960_s30 + $0x2b0] sm:$0xff] }
 0x141   : > { %3368 = vmatpush1.bf16.msra.mxu1 %v4296_v22  ;;  %3399 = vmatprep.mubr.bf16.mxu1 %v5031_v12  ;;  %v4112_v22 = vcombine.low %v270_v9, %v274_v10  ;;  %v350_v10 = vld [vmem:[%s4960_s30 + $0x290] sm:$0xff] }
 0x142   : > { %3369 = vmatprep.subr.bf16.mxu1 %v4289_v24  ;;  %v4233_v24 = vcombine.high %v390_v18, %v394_v19  ;;  %v478_v13 = vld [vmem:[%s4960_s30 + $0x690] sm:$0xff] }
 0x143   : > { %3329 = vmatpush1.bf16.msra.mxu0 %v4160_v31  ;;  %v514_v31 = vld [vmem:[%s4960_s30 + $0x7b0] sm:$0xff] }
 0x144   : > { %3330 = vmatprep.subr.bf16.mxu0 %v4153_v33  ;;  %v4360_v33 = vcombine.low %v518_v20, %v522_v21  ;;  %v4353_v35 = vcombine.high %v510_v29, %v514_v31  ;;  %v4352_v46 = vcombine.low %v510_v29, %v514_v31  ;;  %v346_v20 = vld [vmem:[%s4960_s30 + $0x270] sm:$0xff] }
 0x145   : > { %3370 = vmatpush1.bf16.msra.mxu1 %v4288_v32  ;;  %v4232_v32 = vcombine.low %v390_v18, %v394_v19  ;;  %v342_v19 = vld [vmem:[%s4960_s30 + $0x250] sm:$0xff] }
 0x146   : > { %3371 = vmatprep.subr.bf16.mxu1 %v4281_v34  ;;  %v4225_v34 = vcombine.high %v382_v26, %v386_v28  ;;  %v470_v21 = vld [vmem:[%s4960_s30 + $0x650] sm:$0xff] }
 0x147   : > { %3331 = vmatpush1.bf16.msra.mxu0 %v4152_v40  ;;  %v502_v40 = vld [vmem:[%s4960_s30 + $0x750] sm:$0xff] }
 0x148   : > { %3332 = vmatprep.subr.bf16.mxu0 %v4145_v42  ;;  %v338_v29 = vld [vmem:[%s4960_s30 + $0x230] sm:$0xff] }
 0x149   : > { %3372 = vmatpush1.bf16.msra.mxu1 %v4280_v41  ;;  %v506_v41 = vld [vmem:[%s4960_s30 + $0x770] sm:$0xff] }
 0x14a   : > { %3373 = vmatprep.subr.bf16.mxu1 %v4273_v43  ;;  %v4224_v43 = vcombine.low %v382_v26, %v386_v28  ;;  %v334_v28 = vld [vmem:[%s4960_s30 + $0x210] sm:$0xff] }
 0x14b   : > { %3333 = vmatpush1.bf16.msra.mxu0 %v4144_v50  ;;  %v4345_v50 = vcombine.high %v502_v40, %v506_v41  ;;  %v462_v31 = vld [vmem:[%s4960_s30 + $0x610] sm:$0xff] }
 0x14c   : > { %3334 = vmatprep.subr.bf16.mxu0 %v4137_v52  ;;  %v370_v52 = vld [vmem:[%s4960_s30 + $0x330] sm:$0xff] }
 0x14d   : > { %3374 = vmatpush1.bf16.msra.mxu1 %v4272_v51  ;;  %v366_v51 = vld [vmem:[%s4960_s30 + $0x310] sm:$0xff] }
 0x14e   : > { %3375 = vmatprep.subr.bf16.mxu1 %v4265_v53 }
 0x14f   : > { %3335 = vmatpush1.bf16.msra.mxu0 %v4136_v58 }
 0x150   : > { %3336 = vmatprep.subr.bf16.mxu0 %v4129_v60  ;;  %v4209_v60 = vcombine.high %v366_v51, %v370_v52 }
 0x151   : > { %3376 = vmatpush1.bf16.msra.mxu1 %v4264_v59  ;;  %v4344_v59 = vcombine.low %v502_v40, %v506_v41  ;;  %v586_v40 = vld [vmem:[%s4960_s30 + $0x9f0] sm:$0xff] }
 0x152   : > { %3377 = vmatprep.subr.bf16.mxu1 %v4257_v61  ;;  %v710_v41 = vld [vmem:[%s4960_s30 + $0xdd0] sm:$0xff] }
 0x153   : > { %3337 = vmatpush1.bf16.msra.mxu0 %v4128_v3  ;;  %v490_v3 = vld [vmem:[%s4960_s30 + $0x6f0] sm:$0xff] }
 0x154   : > { %3338 = vmatprep.subr.bf16.mxu0 %v4121_v7  ;;  %v4336_v7 = vcombine.low %v494_v54, %v498_v55  ;;  %v4329_v9 = vcombine.high %v486_v2, %v490_v3  ;;  %v702_v54 = vld [vmem:[%s4960_s30 + $0xd90] sm:$0xff] }
 0x155   : > { %3378 = vmatpush1.bf16.msra.mxu1 %v4256_v4  ;;  %v4208_v4 = vcombine.low %v366_v51, %v370_v52  ;;  %v574_v52 = vld [vmem:[%s4960_s30 + $0x990] sm:$0xff] }
 0x156   : > { %3379 = vmatprep.subr.bf16.mxu1 %v4249_v8  ;;  %v4201_v8 = vcombine.high %v358_v63, %v362_v1  ;;  %v706_v55 = vld [vmem:[%s4960_s30 + $0xdb0] sm:$0xff] }
 0x157   : > { %3339 = vmatpush1.bf16.msra.mxu0 %v4120_v14  ;;  %v482_v14 = vld [vmem:[%s4960_s30 + $0x6b0] sm:$0xff] }
 0x158   : > { %3340 = vmatprep.subr.bf16.mxu0 %v4113_v16  ;;  %v4328_v16 = vcombine.low %v486_v2, %v490_v3  ;;  %v4321_v18 = vcombine.high %v478_v13, %v482_v14  ;;  %v4544_v3 = vcombine.low %v702_v54, %v706_v55 }
 0x159   : > { %3380 = vmatpush1.bf16.msra.mxu1 %v4248_v15  ;;  %v4200_v15 = vcombine.low %v358_v63, %v362_v1  ;;  %v698_v63 = vld [vmem:[%s4960_s30 + $0xd70] sm:$0xff] }
 0x15a   : > { %3381 = vmatprep.subr.bf16.mxu1 %v4241_v17  ;;  %v4193_v17 = vcombine.high %v350_v10, %v354_v11 }
 0x15b   : > { %3341 = vmatpush1.bf16.msra.mxu0 %v4112_v22  ;;  %v474_v22 = vld [vmem:[%s4960_s30 + $0x670] sm:$0xff] }
 0x15c   : > { %3342 = vmatprep.subr.bf16.mxu0 %v4233_v24  ;;  %v4320_v24 = vcombine.low %v478_v13, %v482_v14  ;;  %v4313_v26 = vcombine.high %v470_v21, %v474_v22  ;;  %v690_v13 = vld [vmem:[%s4960_s30 + $0xd30] sm:$0xff] }
 0x15d   : > { %3382 = vmatpush1.bf16.msra.mxu1 %v4240_v23  ;;  %v4192_v23 = vcombine.low %v350_v10, %v354_v11  ;;  %v562_v10 = vld [vmem:[%s4960_s30 + $0x930] sm:$0xff] }
 0x15e   : > { %3383 = vmatprep.subr.bf16.mxu1 %v4361_v25  ;;  %v5298_v38 = vpop.f32.mrf.mxu0  ;;  %v4185_v25 = vcombine.high %v342_v19, %v346_v20  ;;  %v686_v11 = vld [vmem:[%s4960_s30 + $0xd10] sm:$0xff] }
 0x15f   : > { %3343 = vmatpush2.bf16.msra.mxu0 %v4232_v32  ;;  %v466_v32 = vld [vmem:[%s4960_s30 + $0x630] sm:$0xff] }
 0x160   : > { %v5302_v42 = vpop.f32.mrf.mxu1  ;;  %v5304_v27 = vpop.f32.mrf.mxu0  ;;  %3344 = vmatprep.subr.bf16.mxu0 %v4225_v34  ;;  %v4312_v34 = vcombine.low %v470_v21, %v474_v22  ;;  %v4305_v36 = vcombine.high %v462_v31, %v466_v32  ;;  %v554_v21 = vld [vmem:[%s4960_s30 + $0x8f0] sm:$0xff] }
 0x161   : > { %3384 = vmatpush2.bf16.msra.mxu1 %v4360_v33  ;;  %v4184_v33 = vcombine.low %v342_v19, %v346_v20  ;;  %v4529_v19 = vcombine.high %v686_v11, %v690_v13  ;;  %v550_v20 = vld [vmem:[%s4960_s30 + $0x8d0] sm:$0xff] }
 0x162   : > { %v5306_v49 = vpop.f32.mrf.mxu1  ;;  %3385 = vmatprep.subr.bf16.mxu1 %v4353_v35  ;;  %v3036_v53 = vpop.f32.mrf.mxu0  ;;  %v4177_v35 = vcombine.high %v334_v28, %v338_v29  ;;  %v678_v22 = vld [vmem:[%s4960_s30 + $0xcd0] sm:$0xff] }
 0x163   : > { %3345 = vmatpush2.bf16.msra.mxu0 %v4224_v43  ;;  %v714_v43 = vld [vmem:[%s4960_s30 + $0xdf0] sm:$0xff] }
 0x164   : > { %v3077_v56 = vpop.f32.mrf.mxu1  ;;  %v3037_v58 = vpop.f32.mrf.mxu0  ;;  %3346 = vmatprep.subr.bf16.mxu0 %v4217_v48  ;;  %v4304_v48 = vcombine.low %v462_v31, %v466_v32  ;;  %v4553_v51 = vcombine.high %v710_v41, %v714_v43  ;;  %v578_v53 = vld [vmem:[%s4960_s30 + $0x9b0] sm:$0xff] }
 0x165   : > { %3386 = vmatpush2.bf16.msra.mxu1 %v4352_v46  ;;  %v4176_v46 = vcombine.low %v334_v28, %v338_v29  ;;  %v4424_v56 = vcombine.low %v582_v37, %v586_v40  ;;  %v4417_v58 = vcombine.high %v574_v52, %v578_v53  ;;  %v4416_v2 = vcombine.low %v574_v52, %v578_v53  ;;  %v542_v29 = vld [vmem:[%s4960_s30 + $0x890] sm:$0xff] }
 0x166   : > { %v3078_v61 = vpop.f32.mrf.mxu1  ;;  %3387 = vmatprep.subr.bf16.mxu1 %v4345_v50  ;;  %v4425_v50 = vcombine.high %v582_v37, %v586_v40  ;;  %v546_v31 = vld [vmem:[%s4960_s30 + $0x8b0] sm:$0xff] }
 0x167   : > { %3347 = vmatpush2.bf16.msra.mxu0 %v4216_v57  ;;  %v4552_v57 = vcombine.low %v710_v41, %v714_v43  ;;  %v570_v61 = vld [vmem:[%s4960_s30 + $0x970] sm:$0xff] }
 0x168   : > { %3348 = vmatprep.subr.bf16.mxu0 %v4209_v60  ;;  %v566_v60 = vld [vmem:[%s4960_s30 + $0x950] sm:$0xff] }
 0x169   : > { %3388 = vmatpush2.bf16.msra.mxu1 %v4344_v59  ;;  %v4545_v59 = vcombine.high %v702_v54, %v706_v55  ;;  %v670_v32 = vld [vmem:[%s4960_s30 + $0xc90] sm:$0xff] }
 0x16a   : > { %3389 = vmatprep.subr.bf16.mxu1 %v4337_v62  ;;  %v694_v62 = vld [vmem:[%s4960_s30 + $0xd50] sm:$0xff] }
 0x16b   : > { %3349 = vmatpush2.bf16.msra.mxu0 %v4208_v4  ;;  %v4409_v4 = vcombine.high %v566_v60, %v570_v61  ;;  %v534_v40 = vld [vmem:[%s4960_s30 + $0x850] sm:$0xff] }
 0x16c   : > { %3350 = vmatprep.subr.bf16.mxu0 %v4201_v8  ;;  %v4537_v8 = vcombine.high %v694_v62, %v698_v63  ;;  %v538_v41 = vld [vmem:[%s4960_s30 + $0x870] sm:$0xff] }
 0x16d   : > { %3390 = vmatpush2.bf16.msra.mxu1 %v4336_v7  ;;  %v662_v43 = vld [vmem:[%s4960_s30 + $0xc50] sm:$0xff] }
 0x16e   : > { %3391 = vmatprep.subr.bf16.mxu1 %v4329_v9  ;;  %v558_v9 = vld [vmem:[%s4960_s30 + $0x910] sm:$0xff] }
 0x16f   : > { %3351 = vmatpush2.bf16.msra.mxu0 %v4200_v15  ;;  %v4408_v15 = vcombine.low %v566_v60, %v570_v61  ;;  %v526_v53 = vld [vmem:[%s4960_s30 + $0x810] sm:$0xff] }
 0x170   : > { %3352 = vmatprep.subr.bf16.mxu0 %v4193_v17  ;;  %v4401_v17 = vcombine.high %v558_v9, %v562_v10  ;;  %v530_v54 = vld [vmem:[%s4960_s30 + $0x830] sm:$0xff] }
 0x171   : > { %3392 = vmatpush2.bf16.msra.mxu1 %v4328_v16  ;;  %v4536_v16 = vcombine.low %v694_v62, %v698_v63  ;;  %v654_v55 = vld [vmem:[%s4960_s30 + $0xc10] sm:$0xff]  ;;  %v327_v63 = vld [vmem:[%s4960_s30 + $0x1d8] sm:$0xff] }
 0x172   : > { %3393 = vmatprep.subr.bf16.mxu1 %v4321_v18  ;;  %v646_v61 = vld [vmem:[%s4960_s30 + $0xbd0] sm:$0xff] }
 0x173   : > { %3353 = vmatpush2.bf16.msra.mxu0 %v4192_v23  ;;  %v682_v23 = vld [vmem:[%s4960_s30 + $0xcf0] sm:$0xff] }
 0x174   : > { %3354 = vmatprep.subr.bf16.mxu0 %v4185_v25  ;;  %v4528_v25 = vcombine.low %v686_v11, %v690_v13  ;;  %v4521_v28 = vcombine.high %v678_v22, %v682_v23  ;;  %v650_v62 = vld [vmem:[%s4960_s30 + $0xbf0] sm:$0xff]  ;;  %v319_v13 = vld [vmem:[%s4960_s30 + $0x198] sm:$0xff] }
 0x175   : > { %3394 = vmatpush2.bf16.msra.mxu1 %v4320_v24  ;;  %v4400_v24 = vcombine.low %v558_v9, %v562_v10  ;;  %v638_v10 = vld [vmem:[%s4960_s30 + $0xb90] sm:$0xff] }
 0x176   : > { %3395 = vmatprep.subr.bf16.mxu1 %v4313_v26  ;;  %v4393_v26 = vcombine.high %v550_v20, %v554_v21  ;;  %v642_v11 = vld [vmem:[%s4960_s30 + $0xbb0] sm:$0xff] }
 0x177   : > { %3355 = vmatpush2.bf16.msra.mxu0 %v4184_v33  ;;  %v674_v33 = vld [vmem:[%s4960_s30 + $0xcb0] sm:$0xff] }
 0x178   : > { %3356 = vmatprep.subr.bf16.mxu0 %v4177_v35  ;;  %v4520_v35 = vcombine.low %v678_v22, %v682_v23  ;;  %v4513_v37 = vcombine.high %v670_v32, %v674_v33  ;;  %v311_v23 = vld [vmem:[%s4960_s30 + $0x158] sm:$0xff] }
 0x179   : > { %3396 = vmatpush2.bf16.msra.mxu1 %v4312_v34  ;;  %v4392_v34 = vcombine.low %v550_v20, %v554_v21  ;;  %v630_v20 = vld [vmem:[%s4960_s30 + $0xb50] sm:$0xff] }
 0x17a   : > { %3397 = vmatprep.subr.bf16.mxu1 %v4305_v36  ;;  %v4385_v36 = vcombine.high %v542_v29, %v546_v31  ;;  %v634_v21 = vld [vmem:[%s4960_s30 + $0xb70] sm:$0xff] }
 0x17b   : > { %3357 = vmatpush2.bf16.msra.mxu0 %v4176_v46  ;;  %v666_v46 = vld [vmem:[%s4960_s30 + $0xc70] sm:$0xff] }
 0x17c   : > { %3408 = vmatprep.subr.bf16.mxu0 %v4425_v50  ;;  %v4512_v50 = vcombine.low %v670_v32, %v674_v33  ;;  %v4505_v52 = vcombine.high %v662_v43, %v666_v46  ;;  %v622_v33 = vld [vmem:[%s4960_s30 + $0xb10] sm:$0xff] }
 0x17d   : > { %3398 = vmatpush2.bf16.msra.mxu1 %v4304_v48  ;;  %v4384_v48 = vcombine.low %v542_v29, %v546_v31  ;;  %v4473_v29 = vcombine.high %v630_v20, %v634_v21 }
 0x17e   : > { %3449 = vmatprep.subr.bf16.mxu1 %v4553_v51  ;;  %3359 = vmatmul.mubr.bf16.vlgmr.msra.gmra.mxu0 %v5015_v0  ;;  %v4377_v51 = vcombine.high %v534_v40, %v538_v41 }
 0x17f   : > { %3409 = vmatpush1.bf16.msra.mxu0 %v4424_v56  ;;  %3440 = vmatprep.mubr.bf16.mxu0 %v5086_v39  ;;  %v658_v56 = vld [vmem:[%s4960_s30 + $0xc30] sm:$0xff] }
 0x180   : > { %v5341_v1 = vpop.f32.mrf.mxu1  ;;  %3400 = vmatmul.mubr.bf16.vlgmr.msra.gmra.mxu1 %v5024_v6  ;;  %3410 = vmatprep.subr.bf16.mxu0 %v4417_v58  ;;  %v4504_v58 = vcombine.low %v662_v43, %v666_v46  ;;  %v4497_v60 = vcombine.high %v654_v55, %v658_v56 }
 0x181   : > { %3450 = vmatpush1.bf16.msra.mxu1 %v4552_v57  ;;  %3481 = vmatprep.mubr.bf16.mxu1 %v4815_v47  ;;  %v4376_v57 = vcombine.low %v534_v40, %v538_v41  ;;  %v4472_v40 = vcombine.low %v630_v20, %v634_v21  ;;  %v262_v41 = vld [vmem:[#allocation8] sm:$0xff] }
 0x182   : > { %v5344_v7 = vpop.f32.mrf.mxu1  ;;  %3451 = vmatprep.subr.bf16.mxu1 %v4545_v59  ;;  %v4369_v59 = vcombine.high %v526_v53, %v530_v54 }
 0x183   : > { %3411 = vmatpush1.bf16.msra.mxu0 %v4416_v2  ;;  %v331_v2 = vld [vmem:[%s4960_s30 + $0x1f8] sm:$0xff] }
 0x184   : > { %v3159_v14 = vpop.f32.mrf.mxu1  ;;  %3412 = vmatprep.subr.bf16.mxu0 %v4409_v4  ;;  %v4496_v4 = vcombine.low %v654_v55, %v658_v56  ;;  %v4171_v9 = vcombine.high %v327_v63, %v331_v2 }
 0x185   : > { %3452 = vmatpush1.bf16.msra.mxu1 %v4544_v3  ;;  %v4368_v3 = vcombine.low %v526_v53, %v530_v54  ;;  %v323_v14 = vld [vmem:[%s4960_s30 + $0x1b8] sm:$0xff] }
 0x186   : > { %v3160_v18 = vpop.f32.mrf.mxu1  ;;  %3453 = vmatprep.subr.bf16.mxu1 %v4537_v8  ;;  %v4489_v8 = vcombine.high %v646_v61, %v650_v62  ;;  %v299_v53 = vld [vmem:[%s4960_s30 + $0xf8] sm:$0xff] }
 0x187   : > { %3413 = vmatpush1.bf16.msra.mxu0 %v4408_v15  ;;  %v4488_v15 = vcombine.low %v646_v61, %v650_v62  ;;  %v3074_v18 = vadd.f32 %v5302_v42, %v5298_v38  ;;  %v4162_v42 = vcombine.low %v319_v13, %v323_v14  ;;  %v291_v61 = vld [vmem:[%s4960_s30 + $0xb8] sm:$0xff] }
 0x188   : > { %3414 = vmatprep.subr.bf16.mxu0 %v4401_v17  ;;  %v4481_v17 = vcombine.high %v638_v10, %v642_v11 }
 0x189   : > { %3454 = vmatpush1.bf16.msra.mxu1 %v4536_v16  ;;  %v4170_v16 = vcombine.low %v327_v63, %v331_v2 }
 0x18a   : > { %3455 = vmatprep.subr.bf16.mxu1 %v4529_v19  ;;  %v4163_v19 = vcombine.high %v319_v13, %v323_v14 }
 0x18b   : > { %3415 = vmatpush1.bf16.msra.mxu0 %v4400_v24  ;;  %v315_v24 = vld [vmem:[%s4960_s30 + $0x178] sm:$0xff] }
 0x18c   : > { %3416 = vmatprep.subr.bf16.mxu0 %v4393_v26  ;;  %v4155_v32 = vcombine.high %v311_v23, %v315_v24  ;;  %v4154_v46 = vcombine.low %v311_v23, %v315_v24  ;;  %v455_v24 = vld [vmem:[%s4960_s30 + $0x5d8] sm:$0xff] }
 0x18d   : > { %3456 = vmatpush1.bf16.msra.mxu1 %v4528_v25  ;;  %v3076_v25 = vadd.f32 %v5306_v49, %v5304_v27  ;;  %v303_v49 = vld [vmem:[%s4960_s30 + $0x118] sm:$0xff] }
 0x18e   : > { %3457 = vmatprep.subr.bf16.mxu1 %v4521_v28  ;;  %v4480_v28 = vcombine.low %v638_v10, %v642_v11  ;;  %v283_v10 = vld [vmem:[%s4960_s30 + $0x78] sm:$0xff] }
 0x18f   : > { %3417 = vmatpush1.bf16.msra.mxu0 %v4392_v34  ;;  %v626_v34 = vld [vmem:[%s4960_s30 + $0xb30] sm:$0xff] }
 0x190   : > { %3418 = vmatprep.subr.bf16.mxu0 %v4385_v36  ;;  %v4464_v54 = vcombine.low %v622_v33, %v626_v34 }
 0x191   : > { %3458 = vmatpush1.bf16.msra.mxu1 %v4520_v35  ;;  %v307_v35 = vld [vmem:[%s4960_s30 + $0x138] sm:$0xff] }
 0x192   : > { %3459 = vmatprep.subr.bf16.mxu1 %v4513_v37  ;;  %v4146_v55 = vcombine.low %v303_v49, %v307_v35 }
 0x193   : > { %3419 = vmatpush1.bf16.msra.mxu0 %v4384_v48  ;;  %v4465_v48 = vcombine.high %v622_v33, %v626_v34  ;;  %v451_v33 = vld [vmem:[%s4960_s30 + $0x5b8] sm:$0xff] }
 0x194   : > { %3420 = vmatprep.subr.bf16.mxu0 %v4377_v51  ;;  %v614_v51 = vld [vmem:[%s4960_s30 + $0xad0] sm:$0xff]  ;;  %v383_v34 = vld [vmem:[%s4960_s30 + $0x398] sm:$0xff] }
 0x195   : > { %3460 = vmatpush1.bf16.msra.mxu1 %v4512_v50  ;;  %v4147_v50 = vcombine.high %v303_v49, %v307_v35 }
 0x196   : > { %3461 = vmatprep.subr.bf16.mxu1 %v4505_v52  ;;  %v618_v52 = vld [vmem:[%s4960_s30 + $0xaf0] sm:$0xff] }
 0x197   : > { %3421 = vmatpush1.bf16.msra.mxu0 %v4376_v57  ;;  %v4457_v56 = vcombine.high %v614_v51, %v618_v52  ;;  %v4456_v62 = vcombine.low %v614_v51, %v618_v52 }
 0x198   : > { %3422 = vmatprep.subr.bf16.mxu0 %v4369_v59  ;;  %v610_v59 = vld [vmem:[%s4960_s30 + $0xab0] sm:$0xff] }
 0x199   : > { %3462 = vmatpush1.bf16.msra.mxu1 %v4504_v58  ;;  %v606_v58 = vld [vmem:[%s4960_s30 + $0xa90] sm:$0xff] }
 0x19a   : > { %3463 = vmatprep.subr.bf16.mxu1 %v4497_v60  ;;  %v287_v60 = vld [vmem:[%s4960_s30 + $0x98] sm:$0xff]  ;;  %v4449_v2 = vcombine.high %v606_v58, %v610_v59  ;;  %v4448_v11 = vcombine.low %v606_v58, %v610_v59 }
 0x19b   : > { %3423 = vmatpush1.bf16.msra.mxu0 %v4368_v3  ;;  %v4131_v3 = vcombine.high %v287_v60, %v291_v61  ;;  %v4130_v13 = vcombine.low %v287_v60, %v291_v61  ;;  %v423_v61 = vld [vmem:[%s4960_s30 + $0x4d8] sm:$0xff] }
 0x19c   : > { %3424 = vmatprep.subr.bf16.mxu0 %v4489_v8  ;;  %v602_v8 = vld [vmem:[%s4960_s30 + $0xa70] sm:$0xff] }
 0x19d   : > { %3464 = vmatpush1.bf16.msra.mxu1 %v4496_v4  ;;  %v598_v4 = vld [vmem:[%s4960_s30 + $0xa50] sm:$0xff] }
 0x19e   : > { %3490 = vmatprep.subr.bf16.mxu1 %v4171_v9  ;;  %v3114_v22 = vpop.f32.mrf.mxu0  ;;  %v279_v9 = vld [vmem:[%s4960_s30 + $0x58] sm:$0xff]  ;;  %v4441_v14 = vcombine.high %v598_v4, %v602_v8  ;;  %v4440_v20 = vcombine.low %v598_v4, %v602_v8 }
 0x19f   : > { %v3115_v26 = vadd.f32 %v3114_v22, %v3074_v18  ;;  %3425 = vmatpush2.bf16.msra.mxu0 %v4488_v15  ;;  %v4123_v15 = vcombine.high %v279_v9, %v283_v10  ;;  %v271_v18 = vld [vmem:[%s4960_s30 + $0x18] sm:$0xff]  ;;  %v4122_v21 = vcombine.low %v279_v9, %v283_v10 }
 0x1a0   : > { %3482 = vmatmul.mubr.bf16.vlgmr.msra.gmra.mxu1 %v5122_v44  ;;  %v3116_v38 = vpop.f32.mrf.mxu0  ;;  %3426 = vmatprep.subr.bf16.mxu0 %v4481_v17  ;;  %v594_v17 = vld [vmem:[%s4960_s30 + $0xa30] sm:$0xff]  ;;  %v415_v10 = vld [vmem:[%s4960_s30 + $0x498] sm:$0xff] }
 0x1a1   : > { %3491 = vmatpush1.bf16.msra.mxu1 %v4170_v16  ;;  %v3117_v31 = vadd.f32 %v3116_v38, %v3076_v25  ;;  %3522 = vmatprep.mubr.bf16.mxu1 %v5021_v5  ;;  %v3156_v36 = vadd.f32 %v5341_v1, %v3115_v26  ;;  %v295_v1 = vld [vmem:[%s4960_s30 + $0xd8] sm:$0xff]  ;;  %v590_v16 = vld [vmem:[%s4960_s30 + $0xa10] sm:$0xff] }
 0x1a2   : > { %3492 = vmatprep.subr.bf16.mxu1 %v4163_v19  ;;  %v3118_v27 = vpop.f32.mrf.mxu0  ;;  %v4139_v57 = vcombine.high %v295_v1, %v299_v53  ;;  %v4138_v63 = vcombine.low %v295_v1, %v299_v53  ;;  %v275_v19 = vld [vmem:[%s4960_s30 + $0x38] sm:$0xff]  ;;  %v4433_v22 = vcombine.high %v590_v16, %v594_v17  ;;  %v4432_v38 = vcombine.low %v590_v16, %v594_v17 }
 0x1a3   : > { %v3158_v37 = vadd.f32 %v5344_v7, %v3117_v31  ;;  %3427 = vmatpush2.bf16.msra.mxu0 %v4480_v28  ;;  %v4115_v23 = vcombine.high %v271_v18, %v275_v19  ;;  %v459_v25 = vld [vmem:[%s4960_s30 + $0x5f8] sm:$0xff] }
 0x1a4   : > { %v3119_v43 = vpop.f32.mrf.mxu0  ;;  %3428 = vmatprep.subr.bf16.mxu0 %v4473_v29  ;;  %v391_v26 = vld [vmem:[%s4960_s30 + $0x3d8] sm:$0xff]  ;;  %v4299_v29 = vcombine.high %v455_v24, %v459_v25  ;;  %v4298_v49 = vcombine.low %v455_v24, %v459_v25 }
 0x1a5   : > { %3493 = vmatpush1.bf16.msra.mxu1 %v4162_v42  ;;  %v3662_v5 = vcombine.low %v3156_v36, %v3158_v37  ;;  %v395_v28 = vld [vmem:[%s4960_s30 + $0x3f8] sm:$0xff]  ;;  %v4114_v42 = vcombine.low %v271_v18, %v275_v19 }
 0x1a6   : > { %3494 = vmatprep.subr.bf16.mxu1 %v4155_v32  ;;  %v4235_v31 = vcombine.high %v391_v26, %v395_v28  ;;  %v447_v32 = vld [vmem:[%s4960_s30 + $0x598] sm:$0xff]  ;;  %v4234_v35 = vcombine.low %v391_v26, %v395_v28 }
 0x1a7   : > { %v3670_v7 = vadd.f32 %v3662_v5, %v262_v41  ;;  %3429 = vmatpush2.bf16.msra.mxu0 %v4472_v40  ;;  %v387_v27 = vld [vmem:[%s4960_s30 + $0x3b8] sm:$0xff]  ;;  %v4291_v36 = vcombine.high %v447_v32, %v451_v33  ;;  %v4290_v5 = vcombine.low %v447_v32, %v451_v33 }
 0x1a8   : > { %3430 = vmatprep.subr.bf16.mxu0 %v4465_v48  ;;  %v4227_v37 = vcombine.high %v383_v34, %v387_v27  ;;  %v439_v40 = vld [vmem:[%s4960_s30 + $0x558] sm:$0xff] }
 0x1a9   : > { %3495 = vmatpush1.bf16.msra.mxu1 %v4154_v46  ;;  %3674 = vst [vmem:[#allocation8] sm:$0xff] %v3670_v7  ;;  %v443_v41 = vld [vmem:[%s4960_s30 + $0x578] sm:$0xff] }
 0x1aa   : > { %3496 = vmatprep.subr.bf16.mxu1 %v4147_v50  ;;  %v375_v43 = vld [vmem:[%s4960_s30 + $0x358] sm:$0xff]  ;;  %v4226_v50 = vcombine.low %v383_v34, %v387_v27  ;;  %v4283_v51 = vcombine.high %v439_v40, %v443_v41 }
 0x1ab   : > { %3431 = vmatpush2.bf16.msra.mxu0 %v4464_v54  ;;  %v379_v46 = vld [vmem:[%s4960_s30 + $0x378] sm:$0xff] }
 0x1ac   : > { %3432 = vmatprep.subr.bf16.mxu0 %v4457_v56  ;;  %v4219_v1 = vcombine.high %v375_v43, %v379_v46  ;;  %v431_v53 = vld [vmem:[%s4960_s30 + $0x518] sm:$0xff] }
 0x1ad   : > { %3497 = vmatpush1.bf16.msra.mxu1 %v4146_v55  ;;  %v435_v7 = vld [vmem:[%s4960_s30 + $0x538] sm:$0xff] }
 0x1ae   : > { %3498 = vmatprep.subr.bf16.mxu1 %v4139_v57  ;;  %v367_v54 = vld [vmem:[%s4960_s30 + $0x318] sm:$0xff]  ;;  %v4282_v57 = vcombine.low %v439_v40, %v443_v41  ;;  %v4275_v58 = vcombine.high %v431_v53, %v435_v7 }
 0x1af   : > { %3433 = vmatpush2.bf16.msra.mxu0 %v4456_v62  ;;  %v371_v55 = vld [vmem:[%s4960_s30 + $0x338] sm:$0xff] }
 0x1b0   : > { %3434 = vmatprep.subr.bf16.mxu0 %v4449_v2  ;;  %v4211_v60 = vcombine.high %v367_v54, %v371_v55  ;;  %v427_v62 = vld [vmem:[%s4960_s30 + $0x4f8] sm:$0xff]  ;;  %v4210_v4 = vcombine.low %v367_v54, %v371_v55 }
 0x1b1   : > { %3499 = vmatpush1.bf16.msra.mxu1 %v4138_v63  ;;  %v359_v63 = vld [vmem:[%s4960_s30 + $0x2d8] sm:$0xff]  ;;  %v4267_v8 = vcombine.high %v423_v61, %v427_v62 }
 0x1b2   : > { %3500 = vmatprep.subr.bf16.mxu1 %v4131_v3  ;;  %v363_v2 = vld [vmem:[%s4960_s30 + $0x2f8] sm:$0xff]  ;;  %v4274_v3 = vcombine.low %v431_v53, %v435_v7 }
 0x1b3   : > { %3435 = vmatpush2.bf16.msra.mxu0 %v4448_v11  ;;  %v4203_v9 = vcombine.high %v359_v63, %v363_v2  ;;  %v419_v11 = vld [vmem:[%s4960_s30 + $0x4b8] sm:$0xff]  ;;  %v4202_v16 = vcombine.low %v359_v63, %v363_v2 }
 0x1b4   : > { %3436 = vmatprep.subr.bf16.mxu0 %v4441_v14  ;;  %v355_v14 = vld [vmem:[%s4960_s30 + $0x2b8] sm:$0xff]  ;;  %v4259_v17 = vcombine.high %v415_v10, %v419_v11 }
 0x1b5   : > { %3501 = vmatpush1.bf16.msra.mxu1 %v4130_v13  ;;  %v351_v13 = vld [vmem:[%s4960_s30 + $0x298] sm:$0xff] }
 0x1b6   : > { %3502 = vmatprep.subr.bf16.mxu1 %v4123_v15  ;;  %v4266_v15 = vcombine.low %v423_v61, %v427_v62  ;;  %v4195_v18 = vcombine.high %v351_v13, %v355_v14  ;;  %v407_v19 = vld [vmem:[%s4960_s30 + $0x458] sm:$0xff]  ;;  %v4194_v24 = vcombine.low %v351_v13, %v355_v14 }
 0x1b7   : > { %3437 = vmatpush2.bf16.msra.mxu0 %v4440_v20  ;;  %v411_v20 = vld [vmem:[%s4960_s30 + $0x478] sm:$0xff] }
 0x1b8   : > { %3438 = vmatprep.subr.bf16.mxu0 %v4433_v22  ;;  %v347_v22 = vld [vmem:[%s4960_s30 + $0x278] sm:$0xff]  ;;  %v4251_v25 = vcombine.high %v407_v19, %v411_v20 }
 0x1b9   : > { %3503 = vmatpush1.bf16.msra.mxu1 %v4122_v21  ;;  %v343_v21 = vld [vmem:[%s4960_s30 + $0x258] sm:$0xff] }
 0x1ba   : > { %3504 = vmatprep.subr.bf16.mxu1 %v4115_v23  ;;  %v4258_v23 = vcombine.low %v415_v10, %v419_v11  ;;  %v4187_v26 = vcombine.high %v343_v21, %v347_v22  ;;  %v399_v28 = vld [vmem:[%s4960_s30 + $0x418] sm:$0xff]  ;;  %v4186_v32 = vcombine.low %v343_v21, %v347_v22 }
 0x1bb   : > { %3439 = vmatpush2.bf16.msra.mxu0 %v4432_v38  ;;  %v403_v38 = vld [vmem:[%s4960_s30 + $0x438] sm:$0xff] }
 0x1bc   : > { %3531 = vmatprep.subr.bf16.mxu0 %v4299_v29  ;;  %v339_v29 = vld [vmem:[%s4960_s30 + $0x238] sm:$0xff]  ;;  %v4243_v33 = vcombine.high %v399_v28, %v403_v38 }
 0x1bd   : > { %3505 = vmatpush1.bf16.msra.mxu1 %v4114_v42  ;;  %v335_v42 = vld [vmem:[%s4960_s30 + $0x218] sm:$0xff] }
 0x1be   : > { %3506 = vmatprep.subr.bf16.mxu1 %v4235_v31  ;;  %3441 = vmatmul.mubr.bf16.vlgmr.msra.gmra.mxu0 %v5077_v30  ;;  %v4250_v31 = vcombine.low %v407_v19, %v411_v20  ;;  %v4179_v34 = vcombine.high %v335_v42, %v339_v29  ;;  %v519_v27 = vld [vmem:[%s4960_s30 + $0x7d8] sm:$0xff]  ;;  %v4178_v40 = vcombine.low %v335_v42, %v339_v29 }
 0x1bf   : > { %3532 = vmatpush1.bf16.msra.mxu0 %v4298_v49  ;;  %3563 = vmatprep.mubr.bf16.mxu0 %v5031_v12  ;;  %v4218_v12 = vcombine.low %v375_v43, %v379_v46  ;;  %v523_v49 = vld [vmem:[%s4960_s30 + $0x7f8] sm:$0xff] }
 0x1c0   : > { %v5421_v48 = vpop.f32.mrf.mxu1  ;;  %3533 = vmatprep.subr.bf16.mxu0 %v4291_v36  ;;  %v587_v36 = vld [vmem:[%s4960_s30 + $0x9f8] sm:$0xff]  ;;  %v4363_v41 = vcombine.high %v519_v27, %v523_v49 }
 0x1c1   : > { %3507 = vmatpush2.bf16.msra.mxu1 %v4234_v35  ;;  %v583_v35 = vld [vmem:[%s4960_s30 + $0x9d8] sm:$0xff] }
 0x1c2   : > { %v5424_v52 = vpop.f32.mrf.mxu1  ;;  %3508 = vmatprep.subr.bf16.mxu1 %v4227_v37  ;;  %v4242_v37 = vcombine.low %v399_v28, %v403_v38  ;;  %v4427_v43 = vcombine.high %v583_v35, %v587_v36  ;;  %v511_v46 = vld [vmem:[%s4960_s30 + $0x798] sm:$0xff]  ;;  %v4426_v53 = vcombine.low %v583_v35, %v587_v36 }
 0x1c3   : > { %3534 = vmatpush1.bf16.msra.mxu0 %v4290_v5  ;;  %v515_v5 = vld [vmem:[%s4960_s30 + $0x7b8] sm:$0xff] }
 0x1c4   : > { %v3200_v56 = vpop.f32.mrf.mxu1  ;;  %3535 = vmatprep.subr.bf16.mxu0 %v4283_v51  ;;  %v579_v51 = vld [vmem:[%s4960_s30 + $0x9b8] sm:$0xff]  ;;  %v4355_v7 = vcombine.high %v511_v46, %v515_v5 }
 0x1c5   : > { %3509 = vmatpush2.bf16.msra.mxu1 %v4226_v50  ;;  %v575_v50 = vld [vmem:[%s4960_s30 + $0x998] sm:$0xff] }
 0x1c6   : > { %v3201_v59 = vpop.f32.mrf.mxu1  ;;  %3510 = vmatprep.subr.bf16.mxu1 %v4219_v1  ;;  %v4362_v1 = vcombine.low %v519_v27, %v523_v49  ;;  %v4419_v54 = vcombine.high %v575_v50, %v579_v51  ;;  %v503_v55 = vld [vmem:[%s4960_s30 + $0x758] sm:$0xff]  ;;  %v4418_v61 = vcombine.low %v575_v50, %v579_v51 }
 0x1c7   : > { %3536 = vmatpush1.bf16.msra.mxu0 %v4282_v57  ;;  %v507_v56 = vld [vmem:[%s4960_s30 + $0x778] sm:$0xff]  ;;  %v4354_v59 = vcombine.low %v511_v46, %v515_v5 }
 0x1c8   : > { %3537 = vmatprep.subr.bf16.mxu0 %v4275_v58  ;;  %v571_v58 = vld [vmem:[%s4960_s30 + $0x978] sm:$0xff]  ;;  %v4347_v62 = vcombine.high %v503_v55, %v507_v56 }
 0x1c9   : > { %3511 = vmatpush2.bf16.msra.mxu1 %v4218_v12  ;;  %v567_v12 = vld [vmem:[%s4960_s30 + $0x958] sm:$0xff] }
 0x1ca   : > { %3512 = vmatprep.subr.bf16.mxu1 %v4211_v60  ;;  %v4411_v63 = vcombine.high %v567_v12, %v571_v58  ;;  %v495_v2 = vld [vmem:[%s4960_s30 + $0x718] sm:$0xff]  ;;  %v4410_v11 = vcombine.low %v567_v12, %v571_v58 }
 0x1cb   : > { %3538 = vmatpush1.bf16.msra.mxu0 %v4274_v3  ;;  %v499_v3 = vld [vmem:[%s4960_s30 + $0x738] sm:$0xff] }
 0x1cc   : > { %3539 = vmatprep.subr.bf16.mxu0 %v4267_v8  ;;  %v563_v8 = vld [vmem:[%s4960_s30 + $0x938] sm:$0xff]  ;;  %v4339_v13 = vcombine.high %v495_v2, %v499_v3 }
 0x1cd   : > { %3513 = vmatpush2.bf16.msra.mxu1 %v4210_v4  ;;  %v479_v22 = vld [vmem:[%s4960_s30 + $0x698] sm:$0xff] }
 0x1ce   : > { %3514 = vmatprep.subr.bf16.mxu1 %v4203_v9  ;;  %v4346_v9 = vcombine.low %v503_v55, %v507_v56  ;;  %v471_v29 = vld [vmem:[%s4960_s30 + $0x658] sm:$0xff] }
 0x1cf   : > { %3540 = vmatpush1.bf16.msra.mxu0 %v4266_v15  ;;  %v487_v15 = vld [vmem:[%s4960_s30 + $0x6d8] sm:$0xff] }
 0x1d0   : > { %3541 = vmatprep.subr.bf16.mxu0 %v4259_v17  ;;  %v555_v17 = vld [vmem:[%s4960_s30 + $0x8f8] sm:$0xff] }
 0x1d1   : > { %3515 = vmatpush2.bf16.msra.mxu1 %v4202_v16  ;;  %v491_v16 = vld [vmem:[%s4960_s30 + $0x6f8] sm:$0xff] }
 0x1d2   : > { %3516 = vmatprep.subr.bf16.mxu1 %v4195_v18  ;;  %v4338_v18 = vcombine.low %v495_v2, %v499_v3  ;;  %v4331_v20 = vcombine.high %v487_v15, %v491_v16  ;;  %v463_v36 = vld [vmem:[%s4960_s30 + $0x618] sm:$0xff] }
 0x1d3   : > { %3542 = vmatpush1.bf16.msra.mxu0 %v4258_v23  ;;  %v483_v23 = vld [vmem:[%s4960_s30 + $0x6b8] sm:$0xff] }
 0x1d4   : > { %3543 = vmatprep.subr.bf16.mxu0 %v4251_v25  ;;  %v547_v25 = vld [vmem:[%s4960_s30 + $0x8b8] sm:$0xff]  ;;  %v4323_v38 = vcombine.high %v479_v22, %v483_v23 }
 0x1d5   : > { %3517 = vmatpush2.bf16.msra.mxu1 %v4194_v24  ;;  %v543_v24 = vld [vmem:[%s4960_s30 + $0x898] sm:$0xff] }
 0x1d6   : > { %3518 = vmatprep.subr.bf16.mxu1 %v4187_v26  ;;  %v4330_v26 = vcombine.low %v487_v15, %v491_v16  ;;  %v4387_v42 = vcombine.high %v543_v24, %v547_v25  ;;  %v4386_v27 = vcombine.low %v543_v24, %v547_v25  ;;  %v711_v51 = vld [vmem:[%s4960_s30 + $0xdd8] sm:$0xff] }
 0x1d7   : > { %3544 = vmatpush1.bf16.msra.mxu0 %v4250_v31  ;;  %v475_v31 = vld [vmem:[%s4960_s30 + $0x678] sm:$0xff] }
 0x1d8   : > { %3545 = vmatprep.subr.bf16.mxu0 %v4243_v33  ;;  %v539_v33 = vld [vmem:[%s4960_s30 + $0x878] sm:$0xff]  ;;  %v4315_v49 = vcombine.high %v471_v29, %v475_v31 }
 0x1d9   : > { %3519 = vmatpush2.bf16.msra.mxu1 %v4186_v32  ;;  %v535_v32 = vld [vmem:[%s4960_s30 + $0x858] sm:$0xff] }
 0x1da   : > { %3520 = vmatprep.subr.bf16.mxu1 %v4179_v34  ;;  %v4322_v34 = vcombine.low %v479_v22, %v483_v23  ;;  %v4379_v35 = vcombine.high %v535_v32, %v539_v33  ;;  %v4378_v46 = vcombine.low %v535_v32, %v539_v33  ;;  %v703_v58 = vld [vmem:[%s4960_s30 + $0xd98] sm:$0xff] }
 0x1db   : > { %3546 = vmatpush1.bf16.msra.mxu0 %v4242_v37  ;;  %v467_v37 = vld [vmem:[%s4960_s30 + $0x638] sm:$0xff] }
 0x1dc   : > { %3547 = vmatprep.subr.bf16.mxu0 %v4363_v41  ;;  %v531_v41 = vld [vmem:[%s4960_s30 + $0x838] sm:$0xff]  ;;  %v4307_v5 = vcombine.high %v463_v36, %v467_v37 }
 0x1dd   : > { %3521 = vmatpush2.bf16.msra.mxu1 %v4178_v40  ;;  %v527_v40 = vld [vmem:[%s4960_s30 + $0x818] sm:$0xff] }
 0x1de   : > { %3572 = vmatprep.subr.bf16.mxu1 %v4427_v43  ;;  %v5456_v57 = vpop.f32.mrf.mxu0  ;;  %v4314_v43 = vcombine.low %v471_v29, %v475_v31  ;;  %v4371_v50 = vcombine.high %v527_v40, %v531_v41  ;;  %v4370_v55 = vcombine.low %v527_v40, %v531_v41  ;;  %v623_v23 = vld [vmem:[%s4960_s30 + $0xb18] sm:$0xff] }
 0x1df   : > { %3548 = vmatpush2.bf16.msra.mxu0 %v4362_v1  ;;  %v715_v1 = vld [vmem:[%s4960_s30 + $0xdf8] sm:$0xff] }
 0x1e0   : > { %3523 = vmatmul.mubr.bf16.vlgmr.msra.gmra.mxu1 %v5015_v0  ;;  %v5461_v60 = vpop.f32.mrf.mxu0  ;;  %3549 = vmatprep.subr.bf16.mxu0 %v4355_v7  ;;  %v559_v0 = vld [vmem:[%s4960_s30 + $0x918] sm:$0xff]  ;;  %v4555_v56 = vcombine.high %v711_v51, %v715_v1 }
 0x1e1   : > { %3573 = vmatpush1.bf16.msra.mxu1 %v4426_v53  ;;  %3604 = vmatprep.mubr.bf16.mxu1 %v5086_v39  ;;  %v4403_v14 = vcombine.high %v559_v0, %v563_v8  ;;  %v551_v39 = vld [vmem:[%s4960_s30 + $0x8d8] sm:$0xff]  ;;  %v4402_v19 = vcombine.low %v559_v0, %v563_v8 }
 0x1e2   : > { %3574 = vmatprep.subr.bf16.mxu1 %v4419_v54  ;;  %v3241_v4 = vpop.f32.mrf.mxu0  ;;  %v4395_v21 = vcombine.high %v551_v39, %v555_v17  ;;  %v4394_v28 = vcombine.low %v551_v39, %v555_v17  ;;  %v647_v53 = vld [vmem:[%s4960_s30 + $0xbd8] sm:$0xff]  ;;  %v4306_v54 = vcombine.low %v463_v36, %v467_v37  ;;  %v3240_v39 = vadd.f32 %v5461_v60, %v5424_v52 }
 0x1e3   : > { %3550 = vmatpush2.bf16.msra.mxu0 %v4354_v59  ;;  %v651_v7 = vld [vmem:[%s4960_s30 + $0xbf8] sm:$0xff] }
 0x1e4   : > { %v3242_v10 = vpop.f32.mrf.mxu0  ;;  %3551 = vmatprep.subr.bf16.mxu0 %v4347_v62  ;;  %v4491_v12 = vcombine.high %v647_v53, %v651_v7  ;;  %v707_v59 = vld [vmem:[%s4960_s30 + $0xdb8] sm:$0xff]  ;;  %v4490_v2 = vcombine.low %v647_v53, %v651_v7 }
 0x1e5   : > { %3575 = vmatpush1.bf16.msra.mxu1 %v4418_v61  ;;  %v639_v61 = vld [vmem:[%s4960_s30 + $0xb98] sm:$0xff]  ;;  %v4547_v3 = vcombine.high %v703_v58, %v707_v59  ;;  %v4546_v16 = vcombine.low %v703_v58, %v707_v59 }
 0x1e6   : > { %3576 = vmatprep.subr.bf16.mxu1 %v4411_v63  ;;  %v643_v62 = vld [vmem:[%s4960_s30 + $0xbb8] sm:$0xff]  ;;  %v4554_v63 = vcombine.low %v711_v51, %v715_v1 }
 0x1e7   : > { %3552 = vmatpush2.bf16.msra.mxu0 %v4346_v9  ;;  %v4483_v4 = vcombine.high %v639_v61, %v643_v62  ;;  %v695_v0 = vld [vmem:[%s4960_s30 + $0xd58] sm:$0xff]  ;;  %v3238_v9 = vadd.f32 %v5456_v57, %v5421_v48  ;;  %v4482_v15 = vcombine.low %v639_v61, %v643_v62 }
 0x1e8   : > { %3553 = vmatprep.subr.bf16.mxu0 %v4339_v13  ;;  %v699_v8 = vld [vmem:[%s4960_s30 + $0xd78] sm:$0xff] }
 0x1e9   : > { %3577 = vmatpush1.bf16.msra.mxu1 %v4410_v11  ;;  %v631_v11 = vld [vmem:[%s4960_s30 + $0xb58] sm:$0xff]  ;;  %v4538_v60 = vcombine.low %v695_v0, %v699_v8 }
 0x1ea   : > { %3578 = vmatprep.subr.bf16.mxu1 %v4403_v14  ;;  %v635_v13 = vld [vmem:[%s4960_s30 + $0xb78] sm:$0xff] }
 0x1eb   : > { %3554 = vmatpush2.bf16.msra.mxu0 %v4338_v18  ;;  %v4475_v18 = vcombine.high %v631_v11, %v635_v13  ;;  %v627_v24 = vld [vmem:[%s4960_s30 + $0xb38] sm:$0xff]  ;;  %v4474_v52 = vcombine.low %v631_v11, %v635_v13 }
 0x1ec   : > { %3555 = vmatprep.subr.bf16.mxu0 %v4331_v20  ;;  %v691_v20 = vld [vmem:[%s4960_s30 + $0xd38] sm:$0xff]  ;;  %v4467_v31 = vcombine.high %v623_v23, %v627_v24  ;;  %v4466_v37 = vcombine.low %v623_v23, %v627_v24 }
 0x1ed   : > { %3579 = vmatpush1.bf16.msra.mxu1 %v4402_v19  ;;  %v687_v19 = vld [vmem:[%s4960_s30 + $0xd18] sm:$0xff] }
 0x1ee   : > { %3580 = vmatprep.subr.bf16.mxu1 %v4395_v21  ;;  %v679_v32 = vld [vmem:[%s4960_s30 + $0xcd8] sm:$0xff] }
 0x1ef   : > { %3556 = vmatpush2.bf16.msra.mxu0 %v4330_v26  ;;  %v683_v33 = vld [vmem:[%s4960_s30 + $0xcf8] sm:$0xff] }
 0x1f0   : > { %3557 = vmatprep.subr.bf16.mxu0 %v4323_v38  ;;  %v4531_v38 = vcombine.high %v687_v19, %v691_v20  ;;  %v4523_v40 = vcombine.high %v679_v32, %v683_v33  ;;  %v4522_v51 = vcombine.low %v679_v32, %v683_v33 }
 0x1f1   : > { %3581 = vmatpush1.bf16.msra.mxu1 %v4394_v28 }
 0x1f2   : > { %3582 = vmatprep.subr.bf16.mxu1 %v4387_v42  ;;  %v263_v42 = vld [vmem:[#allocation8 + $0x8] sm:$0xff] }
 0x1f3   : > { %3558 = vmatpush2.bf16.msra.mxu0 %v4322_v34 }
 0x1f4   : > { %3559 = vmatprep.subr.bf16.mxu0 %v4315_v49  ;;  %v619_v49 = vld [vmem:[%s4960_s30 + $0xaf8] sm:$0xff] }
 0x1f5   : > { %3583 = vmatpush1.bf16.msra.mxu1 %v4386_v27  ;;  %v615_v27 = vld [vmem:[%s4960_s30 + $0xad8] sm:$0xff] }
 0x1f6   : > { %3584 = vmatprep.subr.bf16.mxu1 %v4379_v35  ;;  %v4530_v35 = vcombine.low %v687_v19, %v691_v20  ;;  %v4459_v41 = vcombine.high %v615_v27, %v619_v49  ;;  %v4458_v1 = vcombine.low %v615_v27, %v619_v49 }
 0x1f7   : > { %3560 = vmatpush2.bf16.msra.mxu0 %v4314_v43  ;;  %v671_v43 = vld [vmem:[%s4960_s30 + $0xc98] sm:$0xff] }
 0x1f8   : > { %3561 = vmatprep.subr.bf16.mxu0 %v4307_v5  ;;  %v607_v5 = vld [vmem:[%s4960_s30 + $0xa98] sm:$0xff] }
 0x1f9   : > { %3585 = vmatpush1.bf16.msra.mxu1 %v4378_v46  ;;  %v675_v46 = vld [vmem:[%s4960_s30 + $0xcb8] sm:$0xff] }
 0x1fa   : > { %3586 = vmatprep.subr.bf16.mxu1 %v4371_v50  ;;  %v611_v50 = vld [vmem:[%s4960_s30 + $0xab8] sm:$0xff]  ;;  %v4515_v53 = vcombine.high %v671_v43, %v675_v46  ;;  %v4514_v58 = vcombine.low %v671_v43, %v675_v46 }
 0x1fb   : > { %3562 = vmatpush2.bf16.msra.mxu0 %v4306_v54  ;;  %v4451_v7 = vcombine.high %v607_v5, %v611_v50  ;;  %v663_v54 = vld [vmem:[%s4960_s30 + $0xc58] sm:$0xff]  ;;  %v4450_v59 = vcombine.low %v607_v5, %v611_v50 }
 0x1fc   : > { %3613 = vmatprep.subr.bf16.mxu0 %v4555_v56  ;;  %v599_v56 = vld [vmem:[%s4960_s30 + $0xa58] sm:$0xff] }
 0x1fd   : > { %3587 = vmatpush1.bf16.msra.mxu1 %v4370_v55  ;;  %v667_v55 = vld [vmem:[%s4960_s30 + $0xc78] sm:$0xff] }
 0x1fe   : > { %3588 = vmatprep.subr.bf16.mxu1 %v4491_v12  ;;  %v3319_v10 = vpop.f32.mrf.mxu0  ;;  %3564 = vmatmul.mubr.bf16.vlgmr.msra.gmra.mxu0 %v5024_v6  ;;  %v4539_v6 = vcombine.high %v695_v0, %v699_v8  ;;  %v603_v12 = vld [vmem:[%s4960_s30 + $0xa78] sm:$0xff]  ;;  %v4507_v61 = vcombine.high %v663_v54, %v667_v55  ;;  %v4506_v0 = vcombine.low %v663_v54, %v667_v55  ;;  %v265_v55 = vld [vmem:[#allocation8 + $0x18] sm:$0xff] }
 0x1ff   : > { %3614 = vmatpush1.bf16.msra.mxu0 %v4554_v63  ;;  %3645 = vmatprep.mubr.bf16.mxu0 %v4815_v47  ;;  %v4443_v62 = vcombine.high %v599_v56, %v603_v12  ;;  %v655_v63 = vld [vmem:[%s4960_s30 + $0xc18] sm:$0xff]  ;;  %v4442_v8 = vcombine.low %v599_v56, %v603_v12 }
 0x200   : > { %v3278_v14 = vpop.f32.mrf.mxu1  ;;  %v3321_v48 = vpop.f32.mrf.mxu0  ;;  %3615 = vmatprep.subr.bf16.mxu0 %v4547_v3  ;;  %v591_v3 = vld [vmem:[%s4960_s30 + $0xa18] sm:$0xff] }
 0x201   : > { %v3279_v17 = vadd.f32 %v3278_v14, %v3238_v9  ;;  %3589 = vmatpush2.bf16.msra.mxu1 %v4490_v2  ;;  %v659_v2 = vld [vmem:[%s4960_s30 + $0xc38] sm:$0xff] }
 0x202   : > { %v3280_v57 = vpop.f32.mrf.mxu1  ;;  %3590 = vmatprep.subr.bf16.mxu1 %v4483_v4  ;;  %v3323_v22 = vpop.f32.mrf.mxu0  ;;  %v595_v4 = vld [vmem:[%s4960_s30 + $0xa38] sm:$0xff]  ;;  %v4499_v9 = vcombine.high %v655_v63, %v659_v2  ;;  %v4498_v11 = vcombine.low %v655_v63, %v659_v2 }
 0x203   : > { %v3281_v21 = vadd.f32 %v3280_v57, %v3240_v39  ;;  %3616 = vmatpush1.bf16.msra.mxu0 %v4546_v16  ;;  %v3320_v25 = vadd.f32 %v3319_v10, %v3279_v17  ;;  %v4435_v10 = vcombine.high %v591_v3, %v595_v4  ;;  %v4434_v13 = vcombine.low %v591_v3, %v595_v4 }
 0x204   : > { %v3282_v47 = vpop.f32.mrf.mxu1  ;;  %v3324_v28 = vpop.f32.mrf.mxu0  ;;  %3617 = vmatprep.subr.bf16.mxu0 %v4539_v6 }
 0x205   : > { %v3322_v26 = vadd.f32 %v3321_v48, %v3281_v21  ;;  %3591 = vmatpush2.bf16.msra.mxu1 %v4482_v15 }
 0x206   : > { %v3283_v29 = vpop.f32.mrf.mxu1  ;;  %3592 = vmatprep.subr.bf16.mxu1 %v4475_v18 }
 0x207   : > { %v3663_v34 = vcombine.low %v3320_v25, %v3322_v26  ;;  %3618 = vmatpush1.bf16.msra.mxu0 %v4538_v60  ;;  %v264_v26 = vld [vmem:[#allocation8 + $0x10] sm:$0xff] }
 0x208   : > { %3619 = vmatprep.subr.bf16.mxu0 %v4531_v38 }
 0x209   : > { %v3671_v36 = vadd.f32 %v3663_v34, %v263_v42  ;;  %3593 = vmatpush2.bf16.msra.mxu1 %v4474_v52 }
 0x20a   : > { %3594 = vmatprep.subr.bf16.mxu1 %v4467_v31 }
 0x20b   : > { %3675 = vst [vmem:[#allocation8 + $0x8] sm:$0xff] %v3671_v36  ;;  %3620 = vmatpush1.bf16.msra.mxu0 %v4530_v35 }
 0x20c   : > { %3621 = vmatprep.subr.bf16.mxu0 %v4523_v40 }
 0x20d   : > { %3595 = vmatpush2.bf16.msra.mxu1 %v4466_v37 }
 0x20e   : > { %3596 = vmatprep.subr.bf16.mxu1 %v4459_v41 }
 0x20f   : > { %3622 = vmatpush1.bf16.msra.mxu0 %v4522_v51 }
 0x210   : > { %3623 = vmatprep.subr.bf16.mxu0 %v4515_v53 }
 0x211   : > { %3597 = vmatpush2.bf16.msra.mxu1 %v4458_v1 }
 0x212   : > { %3598 = vmatprep.subr.bf16.mxu1 %v4451_v7 }
 0x213   : > { %3624 = vmatpush1.bf16.msra.mxu0 %v4514_v58 }
 0x214   : > { %3625 = vmatprep.subr.bf16.mxu0 %v4507_v61 }
 0x215   : > { %3599 = vmatpush2.bf16.msra.mxu1 %v4450_v59 }
 0x216   : > { %3600 = vmatprep.subr.bf16.mxu1 %v4443_v62 }
 0x217   : > { %3626 = vmatpush1.bf16.msra.mxu0 %v4506_v0 }
 0x218   : > { %3627 = vmatprep.subr.bf16.mxu0 %v4499_v9 }
 0x219   : > { %3601 = vmatpush2.bf16.msra.mxu1 %v4442_v8 }
 0x21a   : > { %3602 = vmatprep.subr.bf16.mxu1 %v4435_v10 }
 0x21b   : > { %3628 = vmatpush1.bf16.msra.mxu0 %v4498_v11 }
 0x21d   : > { %3603 = vmatpush2.bf16.msra.mxu1 %v4434_v13 }
 0x21e   : > { %3646 = vmatmul.mubr.bf16.vlgmr.msra.gmra.mxu0 %v5122_v44 }
 0x220   : > { %3605 = vmatmul.mubr.bf16.vlgmr.msra.gmra.mxu1 %v5077_v30 }
 0x23e   : > { %v3360_v14 = vpop.f32.mrf.mxu0 }
 0x240   : > { %v3401_v15 = vpop.f32.mrf.mxu1  ;;  %v3362_v16 = vpop.f32.mrf.mxu0 }
 0x241   : > { %v3402_v22 = vadd.f32 %v3401_v15, %v3360_v14 }
 0x242   : > { %v3403_v39 = vpop.f32.mrf.mxu1  ;;  %v3364_v17 = vpop.f32.mrf.mxu0 }
 0x243   : > { %v3404_v24 = vadd.f32 %v3403_v39, %v3362_v16 }
 0x244   : > { %v3405_v48 = vpop.f32.mrf.mxu1  ;;  %v3365_v6 = vpop.f32.mrf.mxu0 }
 0x246   : > { %v3406_v57 = vpop.f32.mrf.mxu1 }
 0x260   : > { %v3483_v18 = vpop.f32.mrf.mxu1 }
 0x262   : > { %v3485_v19 = vpop.f32.mrf.mxu1 }
 0x264   : > { %v3487_v20 = vpop.f32.mrf.mxu1 }
 0x266   : > { %v3488_v21 = vpop.f32.mrf.mxu1 }
 0x27e   : > { %v3442_v23 = vpop.f32.mrf.mxu0 }
 0x27f   : > { %v3443_v47 = vadd.f32 %v3442_v23, %v3402_v22 }
 0x280   : > { %v3444_v52 = vpop.f32.mrf.mxu0 }
 0x281   : > { %v3445_v44 = vadd.f32 %v3444_v52, %v3404_v24  ;;  %v3484_v30 = vadd.f32 %v3483_v18, %v3443_v47 }
 0x282   : > { %v3446_v60 = vpop.f32.mrf.mxu0 }
 0x283   : > { %v3486_v25 = vadd.f32 %v3485_v19, %v3445_v44 }
 0x284   : > { %v3447_v28 = vpop.f32.mrf.mxu0 }
 0x285   : > { %v3664_v38 = vcombine.low %v3484_v30, %v3486_v25 }
 0x287   : > { %v3672_v42 = vadd.f32 %v3664_v38, %v264_v26 }
 0x289   : > { %3676 = vst [vmem:[#allocation8 + $0x10] sm:$0xff] %v3672_v42 }
 0x2a0   : > { %v3524_v29 = vpop.f32.mrf.mxu1 }
 0x2a2   : > { %v3526_v31 = vpop.f32.mrf.mxu1 }
 0x2a4   : > { %v3528_v32 = vpop.f32.mrf.mxu1 }
 0x2a6   : > { %v3529_v33 = vpop.f32.mrf.mxu1 }
 0x2be   : > { %v3565_v34 = vpop.f32.mrf.mxu0 }
 0x2bf   : > { %v3566_v36 = vadd.f32 %v3565_v34, %v3524_v29 }
 0x2c0   : > { %v3567_v27 = vpop.f32.mrf.mxu0 }
 0x2c1   : > { %v3568_v41 = vadd.f32 %v3567_v27, %v3526_v31 }
 0x2c2   : > { %v3569_v49 = vpop.f32.mrf.mxu0 }
 0x2c4   : > { %v3570_v35 = vpop.f32.mrf.mxu0 }
 0x2de   : > { %v3647_v37 = vpop.f32.mrf.mxu0 }
 0x2e0   : > { %v3606_v40 = vpop.f32.mrf.mxu1  ;;  %v3649_v46 = vpop.f32.mrf.mxu0 }
 0x2e1   : > { %v3607_v43 = vadd.f32 %v3606_v40, %v3566_v36 }
 0x2e2   : > { %v3608_v5 = vpop.f32.mrf.mxu1  ;;  %v3651_v51 = vpop.f32.mrf.mxu0 }
 0x2e3   : > { %v3609_v50 = vadd.f32 %v3608_v5, %v3568_v41  ;;  %v3648_v53 = vadd.f32 %v3647_v37, %v3607_v43 }
 0x2e4   : > { %v3610_v1 = vpop.f32.mrf.mxu1  ;;  %v3652_v54 = vpop.f32.mrf.mxu0 }
 0x2e5   : > { %v3650_v7 = vadd.f32 %v3649_v46, %v3609_v50 }
 0x2e6   : > { %v3611_v56 = vpop.f32.mrf.mxu1 }
 0x2e7   : > { %v3665_v12 = vcombine.low %v3648_v53, %v3650_v7  ;;  %3681 = sbr.rel (%p4556_p7) target bundleno = 826 (0x33a), region = 56 }
 0x2e9   : > { %v3673_v58 = vadd.f32 %v3665_v12, %v265_v55 }
 0x2eb   : > { %3677 = vst [vmem:[#allocation8 + $0x18] sm:$0xff] %v3673_v58 }
 0x2ec   : > { %v3682_v59 = vld [vmem:[#allocation8] sm:$0xff]  ;;  %vm3698_vm0 = vcmask 1043456   ;;  %v3683_v63 = vld [vmem:[#allocation8 + $0x8] sm:$0xff]  ;;  %v5528_v11 = vld [vmem:[#allocation8 + $0x10] sm:$0xff] }
 0x2ed   : > { %v3690_v61 = vcombine.high %v3682_v59, %v3682_v59  ;;  %v3699_v62 = vsel %vm3698_vm0, %v3682_v59, 0.0  ;;  %v3691_v4 = vcombine.high %v3683_v63, %v3683_v63  ;;  %v3713_v0 = vsel %vm3698_vm0, %v3683_v63, 0.0 }
 0x2ee   : > { %v3700_v2 = vrot.slane %v3699_v62, 4  ;;  %v3714_v10 = vrot.slane %v3713_v0, 4  ;;  %v3692_v17 = vcombine.high %v5528_v11, %v5528_v11  ;;  %v3727_v19 = vsel %vm3698_vm0, %v5528_v11, 0.0 }
 0x2ef   : > { %v3706_v3 = vsel %vm3698_vm0, %v3690_v61, 0.0  ;;  %v3720_v13 = vsel %vm3698_vm0, %v3691_v4, 0.0  ;;  %v3728_v47 = vrot.slane %v3727_v19, 4 }
 0x2f0   : > { %v3701_v8 = vadd.f32 %v3700_v2, %v3699_v62  ;;  %v3707_v9 = vrot.slane %v3706_v3, 4  ;;  %v3715_v16 = vadd.f32 %v3714_v10, %v3713_v0  ;;  %v3721_v39 = vrot.slane %v3720_v13, 4 }
 0x2f1   : > { %v3734_v20 = vsel %vm3698_vm0, %v3692_v17, 0.0  ;;  %v3729_v26 = vadd.f32 %v3728_v47, %v3727_v19 }
 0x2f2   : > { %v3702_v14 = vrot.slane %v3701_v8, 2  ;;  %v3708_v15 = vadd.f32 %v3707_v9, %v3706_v3  ;;  %v3716_v57 = vrot.slane %v3715_v16, 2  ;;  %v3722_v18 = vadd.f32 %v3721_v39, %v3720_v13  ;;  %v5536_v38 = vld [vmem:[#allocation8 + $0x18] sm:$0xff] }
 0x2f3   : > { %v3735_v52 = vrot.slane %v3734_v20, 4  ;;  %v3730_v33 = vrot.slane %v3729_v26, 2  ;;  %v3693_v36 = vcombine.high %v5536_v38, %v5536_v38  ;;  %v3741_v41 = vsel %vm3698_vm0, %v5536_v38, 0.0 }
 0x2f4   : > { %v3703_v48 = vadd.f32 %v3702_v14, %v3701_v8  ;;  %v3709_v6 = vrot.slane %v3708_v15, 2  ;;  %v3717_v23 = vadd.f32 %v3716_v57, %v3715_v16  ;;  %v3723_v24 = vrot.slane %v3722_v18, 2 }
 0x2f5   : > { %v3736_v28 = vadd.f32 %v3735_v52, %v3734_v20  ;;  %v3731_v37 = vadd.f32 %v3730_v33, %v3729_v26  ;;  %v3742_v5 = vrot.slane %v3741_v41, 4  ;;  %v3748_v50 = vsel %vm3698_vm0, %v3693_v36, 0.0 }
 0x2f6   : > { %v3704_v21 = vrot.slane %v3703_v48, 1  ;;  %v3710_v22 = vadd.f32 %v3709_v6, %v3708_v15  ;;  %v3718_v30 = vrot.slane %v3717_v23, 1  ;;  %v3724_v25 = vadd.f32 %v3723_v24, %v3722_v18 }
 0x2f7   : > { %v3737_v34 = vrot.slane %v3736_v28, 2  ;;  %v3732_v51 = vrot.slane %v3731_v37, 1  ;;  %v3749_v53 = vrot.slane %v3748_v50, 4  ;;  %v3743_v55 = vadd.f32 %v3742_v5, %v3741_v41 }
 0x2f8   : > { %v3705_v44 = vadd.f32 %v3704_v21, %v3703_v48  ;;  %v3711_v60 = vrot.slane %v3710_v22, 1  ;;  %v3719_v31 = vadd.f32 %v3718_v30, %v3717_v23  ;;  %v3725_v32 = vrot.slane %v3724_v25, 1 }
 0x2f9   : > { %v3738_v40 = vadd.f32 %v3737_v34, %v3736_v28  ;;  %v3733_v56 = vadd.f32 %v3732_v51, %v3731_v37  ;;  %v3750_v58 = vadd.f32 %v3749_v53, %v3748_v50  ;;  %v3744_v2 = vrot.slane %v3743_v55, 2 }
 0x2fa   : > { %v3712_v42 = vadd.f32 %v3711_v60, %v3710_v22  ;;  %v3756_v29 = vmul.f32 0.25, %v3705_v44  ;;  %v3726_v49 = vadd.f32 %v3725_v32, %v3724_v25  ;;  %v3758_v35 = vmul.f32 0.25, %v3719_v31 }
 0x2fb   : > { %v3739_v1 = vrot.slane %v3738_v40, 1  ;;  %v3760_v3 = vmul.f32 0.25, %v3733_v56  ;;  %v3751_v0 = vrot.slane %v3750_v58, 2  ;;  %v3745_v10 = vadd.f32 %v3744_v2, %v3743_v55 }
 0x2fc   : > { %v3757_v27 = vmul.f32 0.25, %v3712_v42  ;;  %v3759_v46 = vmul.f32 0.25, %v3726_v49 }
 0x2fd   : > { %v3740_v12 = vadd.f32 %v3739_v1, %v3738_v40  ;;  %v3752_v15 = vadd.f32 %v3751_v0, %v3750_v58  ;;  %v3746_v17 = vrot.slane %v3745_v10, 1 }
 0x2fe   : > { %v3772_v43 = vcombine.low %v3756_v29, %v3757_v27  ;;  %v3773_v54 = vcombine.low %v3758_v35, %v3759_v46 }
 0x2ff   : > { %v3761_v4 = vmul.f32 0.25, %v3740_v12  ;;  %v3747_v20 = vadd.f32 %v3746_v17, %v3745_v10  ;;  %v3753_v21 = vrot.slane %v3752_v15, 1 }
 0x300   : > { %v5543_v7 = vsub.f32 %v3682_v59, %v3772_v43  ;;  %v5547_v62 = vsub.f32 %v3683_v63, %v3773_v54 }
 0x301   : > { %v3774_v14 = vcombine.low %v3760_v3, %v3761_v4  ;;  %v3754_v44 = vadd.f32 %v3753_v21, %v3752_v15  ;;  %v3762_v60 = vmul.f32 0.25, %v3747_v20  ;;  %v3904_v21 = vsub.s32 0, %v5000_v45 }
 0x302   : > { %v3784_v61 = vmul.f32 %v5543_v7, %v5543_v7  ;;  %v3785_v59 = vmul.f32 %v5547_v62, %v5547_v62 }
 0x303   : > { %v5555_v18 = vsub.f32 %v5528_v11, %v3774_v14  ;;  %v3763_v29 = vmul.f32 0.25, %v3754_v44  ;;  %v5571_v44 = vld [vmem:[#allocation5] sm:$0xff] }
 0x304   : > { %v3792_v8 = vcombine.high %v3784_v61, %v3784_v61  ;;  %v3800_v9 = vsel %vm3698_vm0, %v3784_v61, 0.0  ;;  %v3793_v39 = vcombine.high %v3785_v59, %v3785_v59  ;;  %v3814_v63 = vsel %vm3698_vm0, %v3785_v59, 0.0 }
 0x305   : > { %v3801_v13 = vrot.slane %v3800_v9, 4  ;;  %v3815_v57 = vrot.slane %v3814_v63, 4  ;;  %v3786_v52 = vmul.f32 %v5555_v18, %v5555_v18  ;;  %v3775_v35 = vcombine.low %v3762_v60, %v3763_v29 }
 0x306   : > { %v3807_v16 = vsel %vm3698_vm0, %v3792_v8, 0.0  ;;  %v3821_v19 = vsel %vm3698_vm0, %v3793_v39, 0.0  ;;  %v3905_v29 = vrot.slane %v5571_v44, %v3904_v21 }
 0x307   : > { %v3802_v48 = vadd.f32 %v3801_v13, %v3800_v9  ;;  %v3808_v6 = vrot.slane %v3807_v16, 4  ;;  %v3816_v24 = vadd.f32 %v3815_v57, %v3814_v63  ;;  %v3822_v47 = vrot.slane %v3821_v19, 4 }
 0x308   : > { %v3794_v42 = vcombine.high %v3786_v52, %v3786_v52  ;;  %v3828_v11 = vsel %vm3698_vm0, %v3786_v52, 0.0  ;;  %v5563_v5 = vsub.f32 %v5536_v38, %v3775_v35 }
 0x309   : > { %v3803_v22 = vrot.slane %v3802_v48, 2  ;;  %v3809_v23 = vadd.f32 %v3808_v6, %v3807_v16  ;;  %v3817_v26 = vrot.slane %v3816_v24, 2  ;;  %v3823_v28 = vadd.f32 %v3822_v47, %v3821_v19 }
 0x30a   : > { %v3829_v27 = vrot.slane %v3828_v11, 4  ;;  %v3835_v49 = vsel %vm3698_vm0, %v3794_v42, 0.0  ;;  %v3787_v56 = vmul.f32 %v5563_v5, %v5563_v5  ;;  %v3916_v42 = vsub.s32 3, %v5000_v45 }
 0x30b   : > { %v3804_v30 = vadd.f32 %v3803_v22, %v3802_v48  ;;  %v3810_v25 = vrot.slane %v3809_v23, 2  ;;  %v3818_v33 = vadd.f32 %v3817_v26, %v3816_v24  ;;  %v3824_v34 = vrot.slane %v3823_v28, 2  ;;  %v5573_v26 = vld [vmem:[#allocation7] sm:$0xff] }
 0x30c   : > { %v3830_v43 = vadd.f32 %v3829_v27, %v3828_v11  ;;  %v3836_v46 = vrot.slane %v3835_v49, 4  ;;  %v3795_v0 = vcombine.high %v3787_v56, %v3787_v56  ;;  %v3842_v8 = vsel %vm3698_vm0, %v3787_v56, 0.0 }
 0x30d   : > { %v3805_v31 = vrot.slane %v3804_v30, 1  ;;  %v3811_v32 = vadd.f32 %v3810_v25, %v3809_v23  ;;  %v3819_v40 = vrot.slane %v3818_v33, 1  ;;  %v3825_v41 = vadd.f32 %v3824_v34, %v3823_v28 }
 0x30e   : > { %v3831_v54 = vrot.slane %v3830_v43, 2  ;;  %v3837_v55 = vadd.f32 %v3836_v46, %v3835_v49  ;;  %v3843_v14 = vrot.slane %v3842_v8, 4  ;;  %v3849_v15 = vsel %vm3698_vm0, %v3795_v0, 0.0 }
 0x30f   : > { %v3806_v36 = vadd.f32 %v3805_v31, %v3804_v30  ;;  %v3812_v37 = vrot.slane %v3811_v32, 1  ;;  %v3820_v1 = vadd.f32 %v3819_v40, %v3818_v33  ;;  %v3826_v53 = vrot.slane %v3825_v41, 1 }
 0x310   : > { %v3832_v3 = vadd.f32 %v3831_v54, %v3830_v43  ;;  %v3838_v4 = vrot.slane %v3837_v55, 2  ;;  %v3850_v39 = vrot.slane %v3849_v15, 4  ;;  %v3844_v48 = vadd.f32 %v3843_v14, %v3842_v8 }
 0x311   : > { %v3813_v50 = vadd.f32 %v3812_v37, %v3811_v32  ;;  %v3856_v51 = vmul.f32 0.25, %v3806_v36  ;;  %v3827_v61 = vadd.f32 %v3826_v53, %v3825_v41  ;;  %v3858_v2 = vmul.f32 0.25, %v3820_v1 }
 0x312   : > { %v3833_v10 = vrot.slane %v3832_v3, 1  ;;  %v3839_v13 = vadd.f32 %v3838_v4, %v3837_v55  ;;  %v3851_v6 = vadd.f32 %v3850_v39, %v3849_v15  ;;  %v3845_v20 = vrot.slane %v3844_v48, 2 }
 0x313   : > { %v3857_v12 = vmul.f32 0.25, %v3813_v50  ;;  %v3864_v58 = vadd.f32 1e-05, %v3856_v51  ;;  %v3859_v9 = vmul.f32 0.25, %v3827_v61  ;;  %v3866_v59 = vadd.f32 1e-05, %v3858_v2 }
 0x314   : > { %v3834_v63 = vadd.f32 %v3833_v10, %v3832_v3  ;;  %v3840_v17 = vrot.slane %v3839_v13, 1  ;;  %v3852_v22 = vrot.slane %v3851_v6, 2  ;;  %v3908_v23 = vsub.s32 1, %v5000_v45 }
 0x315   : > { %v3865_v38 = vadd.f32 1e-05, %v3857_v12  ;;  %4644 = vrsqrt.f32 %v3864_v58  ;;  %v3867_v16 = vadd.f32 1e-05, %v3859_v9  ;;  %v3846_v52 = vadd.f32 %v3845_v20, %v3844_v48 }
 0x316   : > { %v3841_v57 = vadd.f32 %v3840_v17, %v3839_v13  ;;  %v3860_v19 = vmul.f32 0.25, %v3834_v63  ;;  %v3853_v60 = vadd.f32 %v3852_v22, %v3851_v6  ;;  %v3912_v28 = vsub.s32 2, %v5000_v45 }
 0x317   : > { %4646 = vrsqrt.f32 %v3865_v38  ;;  %v3847_v25 = vrot.slane %v3846_v52, 1  ;;  %v3909_v31 = vrot.slane %v5571_v44, %v3908_v23  ;;  %v3951_v27 = vrot.slane %v5573_v26, %v3904_v21 }
 0x318   : > { %4648 = vrsqrt.f32 %v3866_v59  ;;  %v3861_v24 = vmul.f32 0.25, %v3841_v57  ;;  %v3868_v47 = vadd.f32 1e-05, %v3860_v19  ;;  %v3854_v11 = vrot.slane %v3853_v60, 1 }
 0x319   : > { %4650 = vrsqrt.f32 %v3867_v16  ;;  %v3848_v32 = vadd.f32 %v3847_v25, %v3846_v52  ;;  %v3955_v49 = vrot.slane %v5573_v26, %v3908_v23  ;;  %v3913_v36 = vrot.slane %v5571_v44, %v3912_v28 }
 0x31a   : > { %v3869_v30 = vadd.f32 1e-05, %v3861_v24  ;;  %4652 = vrsqrt.f32 %v3868_v47  ;;  %v3855_v33 = vadd.f32 %v3854_v11, %v3853_v60  ;;  %v3917_v37 = vrot.slane %v5571_v44, %v3916_v42 }
 0x31b   : > { %v3862_v35 = vmul.f32 0.25, %v3848_v32  ;;  %v3934_v43 = vcombine.low %v3905_v29, %v3909_v31  ;;  %v3959_v1 = vrot.slane %v5573_v26, %v3912_v28  ;;  %v3963_v53 = vrot.slane %v5573_v26, %v3916_v42 }
 0x31c   : > { %4654 = vrsqrt.f32 %v3869_v30  ;;  %v3863_v40 = vmul.f32 0.25, %v3855_v33  ;;  %v3980_v56 = vcombine.low %v3951_v27, %v3955_v49  ;;  %v3920_v12 = vsub.s32 4, %v5000_v45 }
 0x31d   : > { %v3870_v46 = vadd.f32 1e-05, %v3862_v35  ;;  %v3924_v58 = vsub.s32 5, %v5000_v45  ;;  %v3935_v3 = vcombine.low %v3913_v36, %v3917_v37  ;;  %v3981_v8 = vcombine.low %v3959_v1, %v3963_v53 }
 0x31e   : > { %v3871_v54 = vadd.f32 1e-05, %v3863_v40  ;;  %v3921_v38 = vrot.slane %v5571_v44, %v3920_v12  ;;  %v3967_v14 = vrot.slane %v5573_v26, %v3920_v12 }
 0x31f   : > { %4656 = vrsqrt.f32 %v3870_v46  ;;  %v3925_v9 = vrot.slane %v5571_v44, %v3924_v58  ;;  %v3971_v15 = vrot.slane %v5573_v26, %v3924_v58 }
 0x320   : > { %4658 = vrsqrt.f32 %v3871_v54 }
 0x321   : > { %v3936_v48 = vcombine.low %v3921_v38, %v3925_v9  ;;  %v3982_v20 = vcombine.low %v3967_v14, %v3971_v15 }
 0x322   : > { %v4645_v34 = vpop.eup %4644 }
 0x324   : > { %v4647_v41 = vpop.eup %4646 }
 0x325   : > { %v4649_v50 = vpop.eup %4648  ;;  %v3888_v51 = vcombine.low %v4645_v34, %v4647_v41 }
 0x326   : > { %v4651_v55 = vpop.eup %4650 }
 0x327   : > { %v3896_v61 = vmul.f32 %v3888_v51, %v5543_v7  ;;  %v3889_v2 = vcombine.low %v4649_v50, %v4651_v55  ;;  %v4653_v59 = vpop.eup %4652  ;;  %v3928_v7 = vsub.s32 6, %v5000_v45 }
 0x329   : > { %v3942_v4 = vmul.f32 %v3934_v43, %v3896_v61  ;;  %v3897_v0 = vmul.f32 %v3889_v2, %v5547_v62  ;;  %v4655_v16 = vpop.eup %4654  ;;  %v3932_v62 = vsub.s32 7, %v5000_v45  ;;  %v3929_v22 = vrot.slane %v5571_v44, %v3928_v7 }
 0x32a   : > { %v3890_v17 = vcombine.low %v4653_v59, %v4655_v16  ;;  %v3975_v52 = vrot.slane %v5573_v26, %v3928_v7 }
 0x32b   : > { %v3988_v10 = vadd.f32 %v3980_v56, %v3942_v4  ;;  %v3943_v13 = vmul.f32 %v3935_v3, %v3897_v0  ;;  %v3933_v23 = vrot.slane %v5571_v44, %v3932_v62  ;;  %v3979_v45 = vrot.slane %v5573_v26, %v3932_v62 }
 0x32c   : > { %v3898_v19 = vmul.f32 %v3890_v17, %v5555_v18  ;;  %v4657_v47 = vpop.eup %4656 }
 0x32d   : > { %vm3992_vm1 = vcmp.gt.f32.partialorder %v3988_v10, 0.0  ;;  %v3996_v39 = vmul.f32 0.1, %v3988_v10  ;;  %v3989_v63 = vadd.f32 %v3981_v8, %v3943_v13  ;;  %v4659_v60 = vpop.eup %4658  ;;  %v3937_v28 = vcombine.low %v3929_v22, %v3933_v23 }
 0x32e   : > { %v3944_v24 = vmul.f32 %v3936_v48, %v3898_v19  ;;  %v3891_v25 = vcombine.low %v4657_v47, %v4659_v60  ;;  %v3983_v11 = vcombine.low %v3975_v52, %v3979_v45 }
 0x32f   : > { %v4000_v6 = vsel %vm3992_vm1, %v3988_v10, %v3996_v39  ;;  %vm3993_vm2 = vcmp.gt.f32.partialorder %v3989_v63, 0.0  ;;  %v3997_v57 = vmul.f32 0.1, %v3989_v63 }
 0x330   : > { %4004 = vst [vmem:[#allocation8] sm:$0xff] %v4000_v6  ;;  %v3990_v30 = vadd.f32 %v3982_v20, %v3944_v24  ;;  %v3899_v18 = vmul.f32 %v3891_v25, %v5563_v5 }
 0x331   : > { %v4001_v21 = vsel %vm3993_vm2, %v3989_v63, %v3997_v57 }
 0x332   : > { %4005 = vst [vmem:[#allocation8 + $0x8] sm:$0xff] %v4001_v21  ;;  %vm3994_vm3 = vcmp.gt.f32.partialorder %v3990_v30, 0.0  ;;  %v3998_v42 = vmul.f32 0.1, %v3990_v30  ;;  %v3945_v31 = vmul.f32 %v3937_v28, %v3899_v18 }
 0x334   : > { %v4002_v29 = vsel %vm3994_vm3, %v3990_v30, %v3998_v42  ;;  %v3991_v44 = vadd.f32 %v3983_v11, %v3945_v31 }
 0x335   : > { %4006 = vst [vmem:[#allocation8 + $0x10] sm:$0xff] %v4002_v29 }
 0x336   : > { %vm3995_vm4 = vcmp.gt.f32.partialorder %v3991_v44, 0.0  ;;  %v3999_v32 = vmul.f32 0.1, %v3991_v44 }
 0x338   : > { %v4003_v33 = vsel %vm3995_vm4, %v3991_v44, %v3999_v32 }
 0x339   : > { %4007 = vst [vmem:[#allocation8 + $0x18] sm:$0xff] %v4003_v33 }
 0x33a PF: > { %p4596_p11 = scmp.eq.s32.totalorder %s4861_s19, 6  ;;  %s4816_s25 = smov [#allocation8]  }
 0x33b   : > { %s4015_s18 = sshll.u32 %s4816_s25, 4  ;;  %s4016_s18 = int_to_ptr.vmem [resolvable:$true] %s4015_s18 }
 0x33c   : > { %s4740_s5 = scalar_lea.vmem %s4016_s18, 512  ;;  %p4747_p3 = scmp.lt.s32.totalorder %s4016_s18, %s4016_s18 }
 0x33d   : > { %p4741_p4 = scmp.ne.s32.totalorder %s4016_s18, %s4740_s5  ;;  %p4748_p5 = scmp.lt.s32.totalorder %s4740_s5, %s4740_s5 }
 0x33f   : > { %p4742_p12 = pnand %p4741_p4, %p4596_p11  ;;  %p4749_p10 = por %p4748_p5, %p4747_p3 }
 0x341   : > { %p4743_p2 = pneg %p4742_p12 }
 0x343   : > { %p4750_p9 = pnand %p4749_p10, %p4743_p2 }
 0x345   : > { %4753 = shalt.err (!%p4750_p9)
}
 0x346   : > { %4577 = dma.vmem_to_hbm [thread:$0]  (%p4596_p11), %s4016_s18, 512, %s5630_s4, [#allocation4]  }
 0x347   : > { %4789 = dma.done.wait (%p4596_p11), [#allocation4], 512  }
 0x348   : > { %4791 = vsyncadd (%p4596_p11), [#allocation4], 4294966784 }
 0x349 PF: > { %p16_p13 = scmp.ge.s32.totalorder %s4864_s20, 9   ;;  %s5646_s15 = smov %s4798_s16 }
 0x34a   : > { %s5647_s16 = smov %s4802_s17  ;;  %s5648_s17 = smov %s4874_s23 }
 0x34b   : > { %s5649_s18 = smov %s4864_s20  ;;  %18 = sbr.rel (!%p16_p13) target bundleno = 5 (0x5), region = 92 }
 0x350   :  { %4028 = vsyncpa [#allocation3], 1 }
 0x351   :  { %4030 = vsyncpa [#allocation3 + $0x1], 1 }
 0x352   :  { %4031 = vsyncpa [#allocation6], 1 }
 0x353   :  { %4032 = vsyncpa [#allocation4], 1 }
 0x354   :  { %4034 = vsyncpa [#allocation4 + $0x1], 1 }

</bundles_post_ra>
